<compile_context>
chip_gen: v5e
topology: v5e:2x2
jax: 0.10.0
libtpu: 0.0.40
codegen_flags: <defaults>
</compile_context>

<pallas_src>
import math

import jax
import jax.numpy as jnp
from jax.experimental import pallas as pl
from jax.experimental.pallas import tpu as pltpu

# ----------------------------------------------------------------------------
# Problem sizes (small, consistent with the module's shape requirements:
# dim_x == dim_d and dim_y == 1 are implied by the reshapes in forward()).
# ----------------------------------------------------------------------------
BATCH = 8
DIM_X = 4
DIM_D = 4          # must equal DIM_X (implied by the PyTorch reshapes)
DIM_Y = 1          # must be 1 (implied by .squeeze(1) usage)
DIM_H = 32
NUM_H = 3          # -> NUM_H - 1 = 2 hidden Linear layers
N_STEPS = 8
T_FINAL = 1.0

DELTA_T = T_FINAL / N_STEPS
SQRT_DT = math.sqrt(DELTA_T)
INV_SQRT_DT = 1.0 / SQRT_DT
X0_VAL = 1.0          # equation.x_0 (constant vector of ones)
SIGMA_COEF = 0.2      # hard-coded 0.2 in the PyTorch Milstein term (1/2*0.2**2*...)

assert DIM_X == DIM_D, "PyTorch reshapes require dim_x == dim_d"
assert DIM_Y == 1, "PyTorch .squeeze(1) usage requires dim_y == 1"


# ----------------------------------------------------------------------------
# Fused kernel: whole N_STEPS Milstein loop (two phi evals per step + updates).
# ----------------------------------------------------------------------------
def mil_fused_kernel(W_ref, S_ref, y0_ref,
                     w_in_x_ref, w_in_t_ref, b_in_ref,
                     w_h_ref, b_h_ref, w_out_ref, b_out_ref,
                     x_out_ref, y_out_ref):
    # phi(u) with u = [xin, t] folded as  xin @ Wx + t * Wt + b  (no concat).
    def phi_flat(xin, t_scalar):
        h = jnp.dot(xin, w_in_x_ref[...], preferred_element_type=jnp.float32)
        h = h + t_scalar * w_in_t_ref[...] + b_in_ref[...]
        h = jnp.maximum(h, 0.0)
        for l in range(NUM_H - 1):
            h = jnp.dot(h, w_h_ref[l],
                        preferred_element_type=jnp.float32) + b_h_ref[l]
            h = jnp.maximum(h, 0.0)
        # DIM_Y == 1, so the (BATCH, DIM_Y*DIM_D) output IS z.squeeze(1).
        return jnp.dot(h, w_out_ref[...],
                       preferred_element_type=jnp.float32) + b_out_ref[...]

    x = jnp.full((BATCH, DIM_X), X0_VAL, dtype=jnp.float32)
    y = jnp.zeros((BATCH, DIM_Y), dtype=jnp.float32) + y0_ref[0]

    # N_STEPS is small and static -> fully unrolled Python loop (LLO visible).
    for i in range(N_STEPS):
        t_i = DELTA_T * i                 # compile-time constant
        w = W_ref[i]                      # (BATCH, DIM_D) Brownian increment
        S = S_ref[i]                      # SMEM scalar (+/- 1)

        z = phi_flat(x, t_i)              # (BATCH, DIM_D)

        w2md = w * w - DELTA_T
        mil = 0.5 * SIGMA_COEF * SIGMA_COEF * w2md
        Xi = INV_SQRT_DT * 0.5 * w2md * S

        term = x + z * Xi                 # DIM_X == DIM_D
        net_eval = phi_flat(term, t_i)
        backward_mil = jnp.sum(net_eval - z, axis=1, keepdims=True)   # (B, 1)

        # x update:  b(t,x,y) = 0.1*x ;  sigma(t,x) = diag(0.2*x) so
        # sigma @ w == 0.2 * x * w  (elementwise, no batched matmul needed).
        x = x + 0.1 * x * DELTA_T + 0.2 * x * w + mil * x

        # y update: mirrors the PyTorch statement order (x already updated;
        # f(t,x,y,z) = 0.05*y + 0.01*sum(z) does not depend on x anyway).
        f_val = 0.05 * y + 0.01 * jnp.sum(z, axis=1, keepdims=True)
        zw = jnp.sum(z * w, axis=1, keepdims=True)          # matmul(z, w)
        y = y - f_val * DELTA_T + zw + backward_mil * (S * INV_SQRT_DT)

    x_out_ref[...] = x
    y_out_ref[...] = y


_fused_forward = pl.pallas_call(
    mil_fused_kernel,
    in_specs=[
        pl.BlockSpec(memory_space=pltpu.MemorySpace.VMEM),   # W_t  (N, B, D)
        pl.BlockSpec(memory_space=pltpu.MemorySpace.SMEM),   # S_vals (N,)
        pl.BlockSpec(memory_space=pltpu.MemorySpace.SMEM),   # y_0 (1,)
        pl.BlockSpec(memory_space=pltpu.MemorySpace.VMEM),   # w_in_x (DIM_X, H)
        pl.BlockSpec(memory_space=pltpu.MemorySpace.VMEM),   # w_in_t (1, H)
        pl.BlockSpec(memory_space=pltpu.MemorySpace.VMEM),   # b_in   (1, H)
        pl.BlockSpec(memory_space=pltpu.MemorySpace.VMEM),   # w_h    (L, H, H)
        pl.BlockSpec(memory_space=pltpu.MemorySpace.VMEM),   # b_h    (L, 1, H)
        pl.BlockSpec(memory_space=pltpu.MemorySpace.VMEM),   # w_out  (H, Y*D)
        pl.BlockSpec(memory_space=pltpu.MemorySpace.VMEM),   # b_out  (1, Y*D)
    ],
    out_specs=(pl.BlockSpec(memory_space=pltpu.MemorySpace.VMEM),
               pl.BlockSpec(memory_space=pltpu.MemorySpace.VMEM)),
    out_shape=(jax.ShapeDtypeStruct((BATCH, DIM_X), jnp.float32),
               jax.ShapeDtypeStruct((BATCH, DIM_Y), jnp.float32)),
)


def forward(params, y_0, W, S_vals):
    """Single fused-kernel forward.  W: (BATCH, DIM_D, N_STEPS)."""
    # (B, D, N) -> (N, B, D): contiguous per-step (B, D) slabs for the kernel.
    W_t = jnp.transpose(W, (2, 0, 1))
    w_in_x = params["w_in"][:DIM_X, :]            # x-part of the input layer
    w_in_t = params["w_in"][DIM_X:DIM_X + 1, :]   # time-column part
    return _fused_forward(W_t, S_vals, y_0,
                          w_in_x, w_in_t, params["b_in"],
                          params["w_h"], params["b_h"],
                          params["w_out"], params["b_out"])


# ----------------------------------------------------------------------------
# Plain-JAX reference (mirrors Model_Mil.forward statement by statement).
# ----------------------------------------------------------------------------
def eq_b(t, x, y):
    return 0.1 * x


def eq_sigma(t, x):
    return 0.2 * x[:, :, None] * jnp.eye(DIM_X, DIM_D, dtype=x.dtype)


def eq_f(t, x, y, z):
    return 0.05 * y + 0.01 * jnp.sum(z, axis=(1, 2))[:, None]


def forward_reference(params, y_0, W, S_vals):
    def phi(u):
        h = jnp.maximum(u @ params["w_in"] + params["b_in"], 0.0)
        for l in range(NUM_H - 1):
            h = jnp.maximum(h @ params["w_h"][l] + params["b_h"][l], 0.0)
        return (h @ params["w_out"] + params["b_out"]).reshape(-1, DIM_Y, DIM_D)

    x = X0_VAL + jnp.zeros((BATCH, DIM_X), jnp.float32)
    y = y_0 + jnp.zeros((BATCH, DIM_Y), jnp.float32)
    for i in range(N_STEPS):
        t_i = DELTA_T * i
        t_col = jnp.full((BATCH, 1), t_i, jnp.float32)
        z = phi(jnp.concatenate([x, t_col], axis=1))
        w = W[:, :, i].reshape(-1, DIM_D, 1)
        mil = 0.5 * SIGMA_COEF ** 2 * (w ** 2 - DELTA_T)
        S = S_vals[i]
        Xi = (INV_SQRT_DT * 0.5 * (w ** 2 - DELTA_T) * S).reshape(-1, DIM_D)
        term = x + (jnp.squeeze(z, 1) * Xi).reshape(BATCH, DIM_X)
        net_eval = jnp.squeeze(phi(jnp.concatenate([term, t_col], axis=1)), 1)
        backward_mil = (net_eval - z.reshape(BATCH, DIM_X)) @ jnp.ones(
            (DIM_D,), jnp.float32)
        x = (x + eq_b(t_i, x, y) * DELTA_T
             + jnp.matmul(eq_sigma(t_i, x), w).reshape(-1, DIM_X)
             + mil.reshape(-1, DIM_X) * x)
        y = (y - eq_f(t_i, x, y, z) * DELTA_T
             + jnp.matmul(z, w).reshape(-1, DIM_Y)
             + backward_mil.reshape(-1, DIM_Y) * S * INV_SQRT_DT)
    return x, y


# ----------------------------------------------------------------------------
# Deterministic parameter / input construction.
# ----------------------------------------------------------------------------
def init_params(key):
    ks = jax.random.split(key, 6)
    scale = 0.1
    return {
        "w_in": scale * jax.random.normal(ks[0], (DIM_X + 1, DIM_H), jnp.float32),
        "b_in": scale * jax.random.normal(ks[1], (1, DIM_H), jnp.float32),
        "w_h": scale * jax.random.normal(ks[2], (NUM_H - 1, DIM_H, DIM_H), jnp.float32),
        "b_h": scale * jax.random.normal(ks[3], (NUM_H - 1, 1, DIM_H), jnp.float32),
        "w_out": scale * jax.random.normal(ks[4], (DIM_H, DIM_Y * DIM_D), jnp.float32),
        "b_out": scale * jax.random.normal(ks[5], (1, DIM_Y * DIM_D), jnp.float32),
    }


if __name__ == "__main__":
    key = jax.random.PRNGKey(0)
    k_params, k_y0, k_W, k_S = jax.random.split(key, 4)

    params = init_params(k_params)
    y_0 = jax.random.uniform(k_y0, (DIM_Y,), jnp.float32)      # nn.Parameter y_0
    # torch.randn(...) * sqrt(dt) and np.random.choice([-1,1]) per step are
    # host-side RNG in the PyTorch module; reproduced as deterministic inputs.
    W = jax.random.normal(k_W, (BATCH, DIM_D, N_STEPS), jnp.float32) * SQRT_DT
    S_vals = 2.0 * jax.random.bernoulli(k_S, 0.5, (N_STEPS,)).astype(jnp.float32) - 1.0

    fwd = jax.jit(forward)
    x_out, y_out = fwd(params, y_0, W, S_vals)
    jax.block_until_ready((x_out, y_out))

    # Numerical cross-check against the plain-JAX reference.
    x_ref, y_ref = jax.jit(forward_reference)(params, y_0, W, S_vals)
    jax.block_until_ready((x_ref, y_ref))

    assert x_out.shape == (BATCH, DIM_X)
    assert y_out.shape == (BATCH, DIM_Y)
    assert bool(jnp.all(jnp.isfinite(x_out))) and bool(jnp.all(jnp.isfinite(y_out)))
    assert bool(jnp.allclose(x_out, x_ref, rtol=1e-2, atol=1e-2))
    assert bool(jnp.allclose(y_out, y_ref, rtol=1e-2, atol=1e-2))
    print("KERNEL_OK")
</pallas_src>

<mosaic_0001>
module attributes {stable_mosaic.version = 11 : i64} {
  func.func @mil_fused_kernel(%arg0: memref<8x8x4xf32, #tpu.memory_space<vmem>>, %arg1: memref<8xf32, #tpu.memory_space<smem>>, %arg2: memref<1xf32, #tpu.memory_space<smem>>, %arg3: memref<4x32xf32, #tpu.memory_space<vmem>>, %arg4: memref<1x32xf32, #tpu.memory_space<vmem>>, %arg5: memref<1x32xf32, #tpu.memory_space<vmem>>, %arg6: memref<2x32x32xf32, #tpu.memory_space<vmem>>, %arg7: memref<2x1x32xf32, #tpu.memory_space<vmem>>, %arg8: memref<32x4xf32, #tpu.memory_space<vmem>>, %arg9: memref<1x4xf32, #tpu.memory_space<vmem>>, %arg10: memref<8x4xf32, #tpu.memory_space<vmem>>, %arg11: memref<8x1xf32, #tpu.memory_space<vmem>>) attributes {dimension_semantics = [], scalar_prefetch = 0 : i64, scratch_operands = 0 : i64, tpu.core_type = #tpu.core_type<tc>} {
    %cst = arith.constant 1.000000e+00 : f32
    %0 = vector.broadcast %cst : f32 to vector<8x4xf32>
    %cst_0 = arith.constant 0.000000e+00 : f32
    %1 = vector.broadcast %cst_0 : f32 to vector<8x1xf32>
    %c0 = arith.constant 0 : index
    %2 = memref.load %arg2[%c0] : memref<1xf32, #tpu.memory_space<smem>>
    %3 = vector.broadcast %2 : f32 to vector<8x1xf32>
    %4 = arith.addf %1, %3 : vector<8x1xf32>
    %c0_1 = arith.constant 0 : index
    %c0_2 = arith.constant 0 : index
    %c0_3 = arith.constant 0 : index
    %5 = vector.load %arg0[%c0_1, %c0_2, %c0_3] : memref<8x8x4xf32, #tpu.memory_space<vmem>>, vector<1x8x4xf32>
    %6 = vector.shape_cast %5 : vector<1x8x4xf32> to vector<8x4xf32>
    %c0_4 = arith.constant 0 : index
    %7 = memref.load %arg1[%c0_4] : memref<8xf32, #tpu.memory_space<smem>>
    %c0_5 = arith.constant 0 : index
    %c0_6 = arith.constant 0 : index
    %8 = vector.load %arg3[%c0_5, %c0_6] : memref<4x32xf32, #tpu.memory_space<vmem>>, vector<4x32xf32>
    %cst_7 = arith.constant dense<0.000000e+00> : vector<8x32xf32>
    %9 = tpu.matmul %0, %8, %cst_7 {dimension_numbers = #tpu.dot_dimension_numbers<[1], [0], [0], [1], [0, 0, 1, 1], [], []>} : vector<8x4xf32>, vector<4x32xf32>, vector<8x32xf32> -> vector<8x32xf32>
    %c0_8 = arith.constant 0 : index
    %c0_9 = arith.constant 0 : index
    %10 = vector.load %arg4[%c0_8, %c0_9] : memref<1x32xf32, #tpu.memory_space<vmem>>, vector<1x32xf32>
    %cst_10 = arith.constant 0.000000e+00 : f32
    %11 = vector.broadcast %cst_10 : f32 to vector<1x32xf32>
    %12 = arith.mulf %11, %10 : vector<1x32xf32>
    %13 = vector.broadcast %12 : vector<1x32xf32> to vector<8x32xf32>
    %14 = arith.addf %9, %13 : vector<8x32xf32>
    %c0_11 = arith.constant 0 : index
    %c0_12 = arith.constant 0 : index
    %15 = vector.load %arg5[%c0_11, %c0_12] : memref<1x32xf32, #tpu.memory_space<vmem>>, vector<1x32xf32>
    %16 = vector.broadcast %15 : vector<1x32xf32> to vector<8x32xf32>
    %17 = arith.addf %14, %16 : vector<8x32xf32>
    %cst_13 = arith.constant 0.000000e+00 : f32
    %18 = vector.broadcast %cst_13 : f32 to vector<8x32xf32>
    %19 = arith.maximumf %17, %18 : vector<8x32xf32>
    %c0_14 = arith.constant 0 : index
    %c0_15 = arith.constant 0 : index
    %c0_16 = arith.constant 0 : index
    %20 = vector.load %arg6[%c0_14, %c0_15, %c0_16] : memref<2x32x32xf32, #tpu.memory_space<vmem>>, vector<1x32x32xf32>
    %21 = vector.shape_cast %20 : vector<1x32x32xf32> to vector<32x32xf32>
    %cst_17 = arith.constant dense<0.000000e+00> : vector<8x32xf32>
    %22 = tpu.matmul %19, %21, %cst_17 {dimension_numbers = #tpu.dot_dimension_numbers<[1], [0], [0], [1], [0, 0, 1, 1], [], []>} : vector<8x32xf32>, vector<32x32xf32>, vector<8x32xf32> -> vector<8x32xf32>
    %c0_18 = arith.constant 0 : index
    %c0_19 = arith.constant 0 : index
    %c0_20 = arith.constant 0 : index
    %23 = vector.load %arg7[%c0_18, %c0_19, %c0_20] : memref<2x1x32xf32, #tpu.memory_space<vmem>>, vector<1x1x32xf32>
    %24 = vector.shape_cast %23 : vector<1x1x32xf32> to vector<1x32xf32>
    %25 = vector.broadcast %24 : vector<1x32xf32> to vector<8x32xf32>
    %26 = arith.addf %22, %25 : vector<8x32xf32>
    %cst_21 = arith.constant 0.000000e+00 : f32
    %27 = vector.broadcast %cst_21 : f32 to vector<8x32xf32>
    %28 = arith.maximumf %26, %27 : vector<8x32xf32>
    %c1 = arith.constant 1 : index
    %c0_22 = arith.constant 0 : index
    %c0_23 = arith.constant 0 : index
    %29 = vector.load %arg6[%c1, %c0_22, %c0_23] : memref<2x32x32xf32, #tpu.memory_space<vmem>>, vector<1x32x32xf32>
    %30 = vector.shape_cast %29 : vector<1x32x32xf32> to vector<32x32xf32>
    %cst_24 = arith.constant dense<0.000000e+00> : vector<8x32xf32>
    %31 = tpu.matmul %28, %30, %cst_24 {dimension_numbers = #tpu.dot_dimension_numbers<[1], [0], [0], [1], [0, 0, 1, 1], [], []>} : vector<8x32xf32>, vector<32x32xf32>, vector<8x32xf32> -> vector<8x32xf32>
    %c1_25 = arith.constant 1 : index
    %c0_26 = arith.constant 0 : index
    %c0_27 = arith.constant 0 : index
    %32 = vector.load %arg7[%c1_25, %c0_26, %c0_27] : memref<2x1x32xf32, #tpu.memory_space<vmem>>, vector<1x1x32xf32>
    %33 = vector.shape_cast %32 : vector<1x1x32xf32> to vector<1x32xf32>
    %34 = vector.broadcast %33 : vector<1x32xf32> to vector<8x32xf32>
    %35 = arith.addf %31, %34 : vector<8x32xf32>
    %cst_28 = arith.constant 0.000000e+00 : f32
    %36 = vector.broadcast %cst_28 : f32 to vector<8x32xf32>
    %37 = arith.maximumf %35, %36 : vector<8x32xf32>
    %c0_29 = arith.constant 0 : index
    %c0_30 = arith.constant 0 : index
    %38 = vector.load %arg8[%c0_29, %c0_30] : memref<32x4xf32, #tpu.memory_space<vmem>>, vector<32x4xf32>
    %cst_31 = arith.constant dense<0.000000e+00> : vector<8x4xf32>
    %39 = tpu.matmul %37, %38, %cst_31 {dimension_numbers = #tpu.dot_dimension_numbers<[1], [0], [0], [1], [0, 0, 1, 1], [], []>} : vector<8x32xf32>, vector<32x4xf32>, vector<8x4xf32> -> vector<8x4xf32>
    %c0_32 = arith.constant 0 : index
    %c0_33 = arith.constant 0 : index
    %40 = vector.load %arg9[%c0_32, %c0_33] : memref<1x4xf32, #tpu.memory_space<vmem>>, vector<1x4xf32>
    %41 = vector.broadcast %40 : vector<1x4xf32> to vector<8x4xf32>
    %42 = arith.addf %39, %41 : vector<8x4xf32>
    %43 = arith.mulf %6, %6 : vector<8x4xf32>
    %cst_34 = arith.constant 1.250000e-01 : f32
    %44 = vector.broadcast %cst_34 : f32 to vector<8x4xf32>
    %45 = arith.subf %43, %44 : vector<8x4xf32>
    %cst_35 = arith.constant 2.000000e-02 : f32
    %46 = vector.broadcast %cst_35 : f32 to vector<8x4xf32>
    %47 = arith.mulf %46, %45 : vector<8x4xf32>
    %cst_36 = arith.constant 1.41421354 : f32
    %48 = vector.broadcast %cst_36 : f32 to vector<8x4xf32>
    %49 = arith.mulf %48, %45 : vector<8x4xf32>
    %50 = vector.broadcast %7 : f32 to vector<8x4xf32>
    %51 = arith.mulf %49, %50 : vector<8x4xf32>
    %52 = arith.mulf %42, %51 : vector<8x4xf32>
    %53 = arith.addf %0, %52 : vector<8x4xf32>
    %c0_37 = arith.constant 0 : index
    %c0_38 = arith.constant 0 : index
    %54 = vector.load %arg3[%c0_37, %c0_38] : memref<4x32xf32, #tpu.memory_space<vmem>>, vector<4x32xf32>
    %cst_39 = arith.constant dense<0.000000e+00> : vector<8x32xf32>
    %55 = tpu.matmul %53, %54, %cst_39 {dimension_numbers = #tpu.dot_dimension_numbers<[1], [0], [0], [1], [0, 0, 1, 1], [], []>} : vector<8x4xf32>, vector<4x32xf32>, vector<8x32xf32> -> vector<8x32xf32>
    %c0_40 = arith.constant 0 : index
    %c0_41 = arith.constant 0 : index
    %56 = vector.load %arg4[%c0_40, %c0_41] : memref<1x32xf32, #tpu.memory_space<vmem>>, vector<1x32xf32>
    %cst_42 = arith.constant 0.000000e+00 : f32
    %57 = vector.broadcast %cst_42 : f32 to vector<1x32xf32>
    %58 = arith.mulf %57, %56 : vector<1x32xf32>
    %59 = vector.broadcast %58 : vector<1x32xf32> to vector<8x32xf32>
    %60 = arith.addf %55, %59 : vector<8x32xf32>
    %c0_43 = arith.constant 0 : index
    %c0_44 = arith.constant 0 : index
    %61 = vector.load %arg5[%c0_43, %c0_44] : memref<1x32xf32, #tpu.memory_space<vmem>>, vector<1x32xf32>
    %62 = vector.broadcast %61 : vector<1x32xf32> to vector<8x32xf32>
    %63 = arith.addf %60, %62 : vector<8x32xf32>
    %cst_45 = arith.constant 0.000000e+00 : f32
    %64 = vector.broadcast %cst_45 : f32 to vector<8x32xf32>
    %65 = arith.maximumf %63, %64 : vector<8x32xf32>
    %c0_46 = arith.constant 0 : index
    %c0_47 = arith.constant 0 : index
    %c0_48 = arith.constant 0 : index
    %66 = vector.load %arg6[%c0_46, %c0_47, %c0_48] : memref<2x32x32xf32, #tpu.memory_space<vmem>>, vector<1x32x32xf32>
    %67 = vector.shape_cast %66 : vector<1x32x32xf32> to vector<32x32xf32>
    %cst_49 = arith.constant dense<0.000000e+00> : vector<8x32xf32>
    %68 = tpu.matmul %65, %67, %cst_49 {dimension_numbers = #tpu.dot_dimension_numbers<[1], [0], [0], [1], [0, 0, 1, 1], [], []>} : vector<8x32xf32>, vector<32x32xf32>, vector<8x32xf32> -> vector<8x32xf32>
    %c0_50 = arith.constant 0 : index
    %c0_51 = arith.constant 0 : index
    %c0_52 = arith.constant 0 : index
    %69 = vector.load %arg7[%c0_50, %c0_51, %c0_52] : memref<2x1x32xf32, #tpu.memory_space<vmem>>, vector<1x1x32xf32>
    %70 = vector.shape_cast %69 : vector<1x1x32xf32> to vector<1x32xf32>
    %71 = vector.broadcast %70 : vector<1x32xf32> to vector<8x32xf32>
    %72 = arith.addf %68, %71 : vector<8x32xf32>
    %cst_53 = arith.constant 0.000000e+00 : f32
    %73 = vector.broadcast %cst_53 : f32 to vector<8x32xf32>
    %74 = arith.maximumf %72, %73 : vector<8x32xf32>
    %c1_54 = arith.constant 1 : index
    %c0_55 = arith.constant 0 : index
    %c0_56 = arith.constant 0 : index
    %75 = vector.load %arg6[%c1_54, %c0_55, %c0_56] : memref<2x32x32xf32, #tpu.memory_space<vmem>>, vector<1x32x32xf32>
    %76 = vector.shape_cast %75 : vector<1x32x32xf32> to vector<32x32xf32>
    %cst_57 = arith.constant dense<0.000000e+00> : vector<8x32xf32>
    %77 = tpu.matmul %74, %76, %cst_57 {dimension_numbers = #tpu.dot_dimension_numbers<[1], [0], [0], [1], [0, 0, 1, 1], [], []>} : vector<8x32xf32>, vector<32x32xf32>, vector<8x32xf32> -> vector<8x32xf32>
    %c1_58 = arith.constant 1 : index
    %c0_59 = arith.constant 0 : index
    %c0_60 = arith.constant 0 : index
    %78 = vector.load %arg7[%c1_58, %c0_59, %c0_60] : memref<2x1x32xf32, #tpu.memory_space<vmem>>, vector<1x1x32xf32>
    %79 = vector.shape_cast %78 : vector<1x1x32xf32> to vector<1x32xf32>
    %80 = vector.broadcast %79 : vector<1x32xf32> to vector<8x32xf32>
    %81 = arith.addf %77, %80 : vector<8x32xf32>
    %cst_61 = arith.constant 0.000000e+00 : f32
    %82 = vector.broadcast %cst_61 : f32 to vector<8x32xf32>
    %83 = arith.maximumf %81, %82 : vector<8x32xf32>
    %c0_62 = arith.constant 0 : index
    %c0_63 = arith.constant 0 : index
    %84 = vector.load %arg8[%c0_62, %c0_63] : memref<32x4xf32, #tpu.memory_space<vmem>>, vector<32x4xf32>
    %cst_64 = arith.constant dense<0.000000e+00> : vector<8x4xf32>
    %85 = tpu.matmul %83, %84, %cst_64 {dimension_numbers = #tpu.dot_dimension_numbers<[1], [0], [0], [1], [0, 0, 1, 1], [], []>} : vector<8x32xf32>, vector<32x4xf32>, vector<8x4xf32> -> vector<8x4xf32>
    %c0_65 = arith.constant 0 : index
    %c0_66 = arith.constant 0 : index
    %86 = vector.load %arg9[%c0_65, %c0_66] : memref<1x4xf32, #tpu.memory_space<vmem>>, vector<1x4xf32>
    %87 = vector.broadcast %86 : vector<1x4xf32> to vector<8x4xf32>
    %88 = arith.addf %85, %87 : vector<8x4xf32>
    %89 = arith.subf %88, %42 : vector<8x4xf32>
    %cst_67 = arith.constant dense<0.000000e+00> : vector<8xf32>
    %90 = vector.multi_reduction <add>, %89, %cst_67 [1] : vector<8x4xf32> to vector<8xf32>
    %91 = vector.shape_cast %90 : vector<8xf32> to vector<8x1xf32>
    %cst_68 = arith.constant 1.000000e-01 : f32
    %92 = vector.broadcast %cst_68 : f32 to vector<8x4xf32>
    %93 = arith.mulf %92, %0 : vector<8x4xf32>
    %cst_69 = arith.constant 1.250000e-01 : f32
    %94 = vector.broadcast %cst_69 : f32 to vector<8x4xf32>
    %95 = arith.mulf %93, %94 : vector<8x4xf32>
    %96 = arith.addf %0, %95 : vector<8x4xf32>
    %cst_70 = arith.constant 2.000000e-01 : f32
    %97 = vector.broadcast %cst_70 : f32 to vector<8x4xf32>
    %98 = arith.mulf %97, %0 : vector<8x4xf32>
    %99 = arith.mulf %98, %6 : vector<8x4xf32>
    %100 = arith.addf %96, %99 : vector<8x4xf32>
    %101 = arith.mulf %47, %0 : vector<8x4xf32>
    %102 = arith.addf %100, %101 : vector<8x4xf32>
    %cst_71 = arith.constant 5.000000e-02 : f32
    %103 = vector.broadcast %cst_71 : f32 to vector<8x1xf32>
    %104 = arith.mulf %103, %4 : vector<8x1xf32>
    %cst_72 = arith.constant dense<0.000000e+00> : vector<8xf32>
    %105 = vector.multi_reduction <add>, %42, %cst_72 [1] : vector<8x4xf32> to vector<8xf32>
    %106 = vector.shape_cast %105 : vector<8xf32> to vector<8x1xf32>
    %cst_73 = arith.constant 0.00999999977 : f32
    %107 = vector.broadcast %cst_73 : f32 to vector<8x1xf32>
    %108 = arith.mulf %107, %106 : vector<8x1xf32>
    %109 = arith.addf %104, %108 : vector<8x1xf32>
    %110 = arith.mulf %42, %6 : vector<8x4xf32>
    %cst_74 = arith.constant dense<0.000000e+00> : vector<8xf32>
    %111 = vector.multi_reduction <add>, %110, %cst_74 [1] : vector<8x4xf32> to vector<8xf32>
    %112 = vector.shape_cast %111 : vector<8xf32> to vector<8x1xf32>
    %cst_75 = arith.constant 1.250000e-01 : f32
    %113 = vector.broadcast %cst_75 : f32 to vector<8x1xf32>
    %114 = arith.mulf %109, %113 : vector<8x1xf32>
    %115 = arith.subf %4, %114 : vector<8x1xf32>
    %116 = arith.addf %115, %112 : vector<8x1xf32>
    %cst_76 = arith.constant 2.82842708 : f32
    %117 = arith.mulf %7, %cst_76 : f32
    %118 = vector.broadcast %117 : f32 to vector<8x1xf32>
    %119 = arith.mulf %91, %118 : vector<8x1xf32>
    %120 = arith.addf %116, %119 : vector<8x1xf32>
    %c1_77 = arith.constant 1 : index
    %c0_78 = arith.constant 0 : index
    %c0_79 = arith.constant 0 : index
    %121 = vector.load %arg0[%c1_77, %c0_78, %c0_79] : memref<8x8x4xf32, #tpu.memory_space<vmem>>, vector<1x8x4xf32>
    %122 = vector.shape_cast %121 : vector<1x8x4xf32> to vector<8x4xf32>
    %c1_80 = arith.constant 1 : index
    %123 = memref.load %arg1[%c1_80] : memref<8xf32, #tpu.memory_space<smem>>
    %c0_81 = arith.constant 0 : index
    %c0_82 = arith.constant 0 : index
    %124 = vector.load %arg3[%c0_81, %c0_82] : memref<4x32xf32, #tpu.memory_space<vmem>>, vector<4x32xf32>
    %cst_83 = arith.constant dense<0.000000e+00> : vector<8x32xf32>
    %125 = tpu.matmul %102, %124, %cst_83 {dimension_numbers = #tpu.dot_dimension_numbers<[1], [0], [0], [1], [0, 0, 1, 1], [], []>} : vector<8x4xf32>, vector<4x32xf32>, vector<8x32xf32> -> vector<8x32xf32>
    %c0_84 = arith.constant 0 : index
    %c0_85 = arith.constant 0 : index
    %126 = vector.load %arg4[%c0_84, %c0_85] : memref<1x32xf32, #tpu.memory_space<vmem>>, vector<1x32xf32>
    %cst_86 = arith.constant 1.250000e-01 : f32
    %127 = vector.broadcast %cst_86 : f32 to vector<1x32xf32>
    %128 = arith.mulf %127, %126 : vector<1x32xf32>
    %129 = vector.broadcast %128 : vector<1x32xf32> to vector<8x32xf32>
    %130 = arith.addf %125, %129 : vector<8x32xf32>
    %c0_87 = arith.constant 0 : index
    %c0_88 = arith.constant 0 : index
    %131 = vector.load %arg5[%c0_87, %c0_88] : memref<1x32xf32, #tpu.memory_space<vmem>>, vector<1x32xf32>
    %132 = vector.broadcast %131 : vector<1x32xf32> to vector<8x32xf32>
    %133 = arith.addf %130, %132 : vector<8x32xf32>
    %cst_89 = arith.constant 0.000000e+00 : f32
    %134 = vector.broadcast %cst_89 : f32 to vector<8x32xf32>
    %135 = arith.maximumf %133, %134 : vector<8x32xf32>
    %c0_90 = arith.constant 0 : index
    %c0_91 = arith.constant 0 : index
    %c0_92 = arith.constant 0 : index
    %136 = vector.load %arg6[%c0_90, %c0_91, %c0_92] : memref<2x32x32xf32, #tpu.memory_space<vmem>>, vector<1x32x32xf32>
    %137 = vector.shape_cast %136 : vector<1x32x32xf32> to vector<32x32xf32>
    %cst_93 = arith.constant dense<0.000000e+00> : vector<8x32xf32>
    %138 = tpu.matmul %135, %137, %cst_93 {dimension_numbers = #tpu.dot_dimension_numbers<[1], [0], [0], [1], [0, 0, 1, 1], [], []>} : vector<8x32xf32>, vector<32x32xf32>, vector<8x32xf32> -> vector<8x32xf32>
    %c0_94 = arith.constant 0 : index
    %c0_95 = arith.constant 0 : index
    %c0_96 = arith.constant 0 : index
    %139 = vector.load %arg7[%c0_94, %c0_95, %c0_96] : memref<2x1x32xf32, #tpu.memory_space<vmem>>, vector<1x1x32xf32>
    %140 = vector.shape_cast %139 : vector<1x1x32xf32> to vector<1x32xf32>
    %141 = vector.broadcast %140 : vector<1x32xf32> to vector<8x32xf32>
    %142 = arith.addf %138, %141 : vector<8x32xf32>
    %cst_97 = arith.constant 0.000000e+00 : f32
    %143 = vector.broadcast %cst_97 : f32 to vector<8x32xf32>
    %144 = arith.maximumf %142, %143 : vector<8x32xf32>
    %c1_98 = arith.constant 1 : index
    %c0_99 = arith.constant 0 : index
    %c0_100 = arith.constant 0 : index
    %145 = vector.load %arg6[%c1_98, %c0_99, %c0_100] : memref<2x32x32xf32, #tpu.memory_space<vmem>>, vector<1x32x32xf32>
    %146 = vector.shape_cast %145 : vector<1x32x32xf32> to vector<32x32xf32>
    %cst_101 = arith.constant dense<0.000000e+00> : vector<8x32xf32>
    %147 = tpu.matmul %144, %146, %cst_101 {dimension_numbers = #tpu.dot_dimension_numbers<[1], [0], [0], [1], [0, 0, 1, 1], [], []>} : vector<8x32xf32>, vector<32x32xf32>, vector<8x32xf32> -> vector<8x32xf32>
    %c1_102 = arith.constant 1 : index
    %c0_103 = arith.constant 0 : index
    %c0_104 = arith.constant 0 : index
    %148 = vector.load %arg7[%c1_102, %c0_103, %c0_104] : memref<2x1x32xf32, #tpu.memory_space<vmem>>, vector<1x1x32xf32>
    %149 = vector.shape_cast %148 : vector<1x1x32xf32> to vector<1x32xf32>
    %150 = vector.broadcast %149 : vector<1x32xf32> to vector<8x32xf32>
    %151 = arith.addf %147, %150 : vector<8x32xf32>
    %cst_105 = arith.constant 0.000000e+00 : f32
    %152 = vector.broadcast %cst_105 : f32 to vector<8x32xf32>
    %153 = arith.maximumf %151, %152 : vector<8x32xf32>
    %c0_106 = arith.constant 0 : index
    %c0_107 = arith.constant 0 : index
    %154 = vector.load %arg8[%c0_106, %c0_107] : memref<32x4xf32, #tpu.memory_space<vmem>>, vector<32x4xf32>
    %cst_108 = arith.constant dense<0.000000e+00> : vector<8x4xf32>
    %155 = tpu.matmul %153, %154, %cst_108 {dimension_numbers = #tpu.dot_dimension_numbers<[1], [0], [0], [1], [0, 0, 1, 1], [], []>} : vector<8x32xf32>, vector<32x4xf32>, vector<8x4xf32> -> vector<8x4xf32>
    %c0_109 = arith.constant 0 : index
    %c0_110 = arith.constant 0 : index
    %156 = vector.load %arg9[%c0_109, %c0_110] : memref<1x4xf32, #tpu.memory_space<vmem>>, vector<1x4xf32>
    %157 = vector.broadcast %156 : vector<1x4xf32> to vector<8x4xf32>
    %158 = arith.addf %155, %157 : vector<8x4xf32>
    %159 = arith.mulf %122, %122 : vector<8x4xf32>
    %cst_111 = arith.constant 1.250000e-01 : f32
    %160 = vector.broadcast %cst_111 : f32 to vector<8x4xf32>
    %161 = arith.subf %159, %160 : vector<8x4xf32>
    %cst_112 = arith.constant 2.000000e-02 : f32
    %162 = vector.broadcast %cst_112 : f32 to vector<8x4xf32>
    %163 = arith.mulf %162, %161 : vector<8x4xf32>
    %cst_113 = arith.constant 1.41421354 : f32
    %164 = vector.broadcast %cst_113 : f32 to vector<8x4xf32>
    %165 = arith.mulf %164, %161 : vector<8x4xf32>
    %166 = vector.broadcast %123 : f32 to vector<8x4xf32>
    %167 = arith.mulf %165, %166 : vector<8x4xf32>
    %168 = arith.mulf %158, %167 : vector<8x4xf32>
    %169 = arith.addf %102, %168 : vector<8x4xf32>
    %c0_114 = arith.constant 0 : index
    %c0_115 = arith.constant 0 : index
    %170 = vector.load %arg3[%c0_114, %c0_115] : memref<4x32xf32, #tpu.memory_space<vmem>>, vector<4x32xf32>
    %cst_116 = arith.constant dense<0.000000e+00> : vector<8x32xf32>
    %171 = tpu.matmul %169, %170, %cst_116 {dimension_numbers = #tpu.dot_dimension_numbers<[1], [0], [0], [1], [0, 0, 1, 1], [], []>} : vector<8x4xf32>, vector<4x32xf32>, vector<8x32xf32> -> vector<8x32xf32>
    %c0_117 = arith.constant 0 : index
    %c0_118 = arith.constant 0 : index
    %172 = vector.load %arg4[%c0_117, %c0_118] : memref<1x32xf32, #tpu.memory_space<vmem>>, vector<1x32xf32>
    %cst_119 = arith.constant 1.250000e-01 : f32
    %173 = vector.broadcast %cst_119 : f32 to vector<1x32xf32>
    %174 = arith.mulf %173, %172 : vector<1x32xf32>
    %175 = vector.broadcast %174 : vector<1x32xf32> to vector<8x32xf32>
    %176 = arith.addf %171, %175 : vector<8x32xf32>
    %c0_120 = arith.constant 0 : index
    %c0_121 = arith.constant 0 : index
    %177 = vector.load %arg5[%c0_120, %c0_121] : memref<1x32xf32, #tpu.memory_space<vmem>>, vector<1x32xf32>
    %178 = vector.broadcast %177 : vector<1x32xf32> to vector<8x32xf32>
    %179 = arith.addf %176, %178 : vector<8x32xf32>
    %cst_122 = arith.constant 0.000000e+00 : f32
    %180 = vector.broadcast %cst_122 : f32 to vector<8x32xf32>
    %181 = arith.maximumf %179, %180 : vector<8x32xf32>
    %c0_123 = arith.constant 0 : index
    %c0_124 = arith.constant 0 : index
    %c0_125 = arith.constant 0 : index
    %182 = vector.load %arg6[%c0_123, %c0_124, %c0_125] : memref<2x32x32xf32, #tpu.memory_space<vmem>>, vector<1x32x32xf32>
    %183 = vector.shape_cast %182 : vector<1x32x32xf32> to vector<32x32xf32>
    %cst_126 = arith.constant dense<0.000000e+00> : vector<8x32xf32>
    %184 = tpu.matmul %181, %183, %cst_126 {dimension_numbers = #tpu.dot_dimension_numbers<[1], [0], [0], [1], [0, 0, 1, 1], [], []>} : vector<8x32xf32>, vector<32x32xf32>, vector<8x32xf32> -> vector<8x32xf32>
    %c0_127 = arith.constant 0 : index
    %c0_128 = arith.constant 0 : index
    %c0_129 = arith.constant 0 : index
    %185 = vector.load %arg7[%c0_127, %c0_128, %c0_129] : memref<2x1x32xf32, #tpu.memory_space<vmem>>, vector<1x1x32xf32>
    %186 = vector.shape_cast %185 : vector<1x1x32xf32> to vector<1x32xf32>
    %187 = vector.broadcast %186 : vector<1x32xf32> to vector<8x32xf32>
    %188 = arith.addf %184, %187 : vector<8x32xf32>
    %cst_130 = arith.constant 0.000000e+00 : f32
    %189 = vector.broadcast %cst_130 : f32 to vector<8x32xf32>
    %190 = arith.maximumf %188, %189 : vector<8x32xf32>
    %c1_131 = arith.constant 1 : index
    %c0_132 = arith.constant 0 : index
    %c0_133 = arith.constant 0 : index
    %191 = vector.load %arg6[%c1_131, %c0_132, %c0_133] : memref<2x32x32xf32, #tpu.memory_space<vmem>>, vector<1x32x32xf32>
    %192 = vector.shape_cast %191 : vector<1x32x32xf32> to vector<32x32xf32>
    %cst_134 = arith.constant dense<0.000000e+00> : vector<8x32xf32>
    %193 = tpu.matmul %190, %192, %cst_134 {dimension_numbers = #tpu.dot_dimension_numbers<[1], [0], [0], [1], [0, 0, 1, 1], [], []>} : vector<8x32xf32>, vector<32x32xf32>, vector<8x32xf32> -> vector<8x32xf32>
    %c1_135 = arith.constant 1 : index
    %c0_136 = arith.constant 0 : index
    %c0_137 = arith.constant 0 : index
    %194 = vector.load %arg7[%c1_135, %c0_136, %c0_137] : memref<2x1x32xf32, #tpu.memory_space<vmem>>, vector<1x1x32xf32>
    %195 = vector.shape_cast %194 : vector<1x1x32xf32> to vector<1x32xf32>
    %196 = vector.broadcast %195 : vector<1x32xf32> to vector<8x32xf32>
    %197 = arith.addf %193, %196 : vector<8x32xf32>
    %cst_138 = arith.constant 0.000000e+00 : f32
    %198 = vector.broadcast %cst_138 : f32 to vector<8x32xf32>
    %199 = arith.maximumf %197, %198 : vector<8x32xf32>
    %c0_139 = arith.constant 0 : index
    %c0_140 = arith.constant 0 : index
    %200 = vector.load %arg8[%c0_139, %c0_140] : memref<32x4xf32, #tpu.memory_space<vmem>>, vector<32x4xf32>
    %cst_141 = arith.constant dense<0.000000e+00> : vector<8x4xf32>
    %201 = tpu.matmul %199, %200, %cst_141 {dimension_numbers = #tpu.dot_dimension_numbers<[1], [0], [0], [1], [0, 0, 1, 1], [], []>} : vector<8x32xf32>, vector<32x4xf32>, vector<8x4xf32> -> vector<8x4xf32>
    %c0_142 = arith.constant 0 : index
    %c0_143 = arith.constant 0 : index
    %202 = vector.load %arg9[%c0_142, %c0_143] : memref<1x4xf32, #tpu.memory_space<vmem>>, vector<1x4xf32>
    %203 = vector.broadcast %202 : vector<1x4xf32> to vector<8x4xf32>
    %204 = arith.addf %201, %203 : vector<8x4xf32>
    %205 = arith.subf %204, %158 : vector<8x4xf32>
    %cst_144 = arith.constant dense<0.000000e+00> : vector<8xf32>
    %206 = vector.multi_reduction <add>, %205, %cst_144 [1] : vector<8x4xf32> to vector<8xf32>
    %207 = vector.shape_cast %206 : vector<8xf32> to vector<8x1xf32>
    %cst_145 = arith.constant 1.000000e-01 : f32
    %208 = vector.broadcast %cst_145 : f32 to vector<8x4xf32>
    %209 = arith.mulf %208, %102 : vector<8x4xf32>
    %cst_146 = arith.constant 1.250000e-01 : f32
    %210 = vector.broadcast %cst_146 : f32 to vector<8x4xf32>
    %211 = arith.mulf %209, %210 : vector<8x4xf32>
    %212 = arith.addf %102, %211 : vector<8x4xf32>
    %cst_147 = arith.constant 2.000000e-01 : f32
    %213 = vector.broadcast %cst_147 : f32 to vector<8x4xf32>
    %214 = arith.mulf %213, %102 : vector<8x4xf32>
    %215 = arith.mulf %214, %122 : vector<8x4xf32>
    %216 = arith.addf %212, %215 : vector<8x4xf32>
    %217 = arith.mulf %163, %102 : vector<8x4xf32>
    %218 = arith.addf %216, %217 : vector<8x4xf32>
    %cst_148 = arith.constant 5.000000e-02 : f32
    %219 = vector.broadcast %cst_148 : f32 to vector<8x1xf32>
    %220 = arith.mulf %219, %120 : vector<8x1xf32>
    %cst_149 = arith.constant dense<0.000000e+00> : vector<8xf32>
    %221 = vector.multi_reduction <add>, %158, %cst_149 [1] : vector<8x4xf32> to vector<8xf32>
    %222 = vector.shape_cast %221 : vector<8xf32> to vector<8x1xf32>
    %cst_150 = arith.constant 0.00999999977 : f32
    %223 = vector.broadcast %cst_150 : f32 to vector<8x1xf32>
    %224 = arith.mulf %223, %222 : vector<8x1xf32>
    %225 = arith.addf %220, %224 : vector<8x1xf32>
    %226 = arith.mulf %158, %122 : vector<8x4xf32>
    %cst_151 = arith.constant dense<0.000000e+00> : vector<8xf32>
    %227 = vector.multi_reduction <add>, %226, %cst_151 [1] : vector<8x4xf32> to vector<8xf32>
    %228 = vector.shape_cast %227 : vector<8xf32> to vector<8x1xf32>
    %cst_152 = arith.constant 1.250000e-01 : f32
    %229 = vector.broadcast %cst_152 : f32 to vector<8x1xf32>
    %230 = arith.mulf %225, %229 : vector<8x1xf32>
    %231 = arith.subf %120, %230 : vector<8x1xf32>
    %232 = arith.addf %231, %228 : vector<8x1xf32>
    %cst_153 = arith.constant 2.82842708 : f32
    %233 = arith.mulf %123, %cst_153 : f32
    %234 = vector.broadcast %233 : f32 to vector<8x1xf32>
    %235 = arith.mulf %207, %234 : vector<8x1xf32>
    %236 = arith.addf %232, %235 : vector<8x1xf32>
    %c2 = arith.constant 2 : index
    %c0_154 = arith.constant 0 : index
    %c0_155 = arith.constant 0 : index
    %237 = vector.load %arg0[%c2, %c0_154, %c0_155] : memref<8x8x4xf32, #tpu.memory_space<vmem>>, vector<1x8x4xf32>
    %238 = vector.shape_cast %237 : vector<1x8x4xf32> to vector<8x4xf32>
    %c2_156 = arith.constant 2 : index
    %239 = memref.load %arg1[%c2_156] : memref<8xf32, #tpu.memory_space<smem>>
    %c0_157 = arith.constant 0 : index
    %c0_158 = arith.constant 0 : index
    %240 = vector.load %arg3[%c0_157, %c0_158] : memref<4x32xf32, #tpu.memory_space<vmem>>, vector<4x32xf32>
    %cst_159 = arith.constant dense<0.000000e+00> : vector<8x32xf32>
    %241 = tpu.matmul %218, %240, %cst_159 {dimension_numbers = #tpu.dot_dimension_numbers<[1], [0], [0], [1], [0, 0, 1, 1], [], []>} : vector<8x4xf32>, vector<4x32xf32>, vector<8x32xf32> -> vector<8x32xf32>
    %c0_160 = arith.constant 0 : index
    %c0_161 = arith.constant 0 : index
    %242 = vector.load %arg4[%c0_160, %c0_161] : memref<1x32xf32, #tpu.memory_space<vmem>>, vector<1x32xf32>
    %cst_162 = arith.constant 2.500000e-01 : f32
    %243 = vector.broadcast %cst_162 : f32 to vector<1x32xf32>
    %244 = arith.mulf %243, %242 : vector<1x32xf32>
    %245 = vector.broadcast %244 : vector<1x32xf32> to vector<8x32xf32>
    %246 = arith.addf %241, %245 : vector<8x32xf32>
    %c0_163 = arith.constant 0 : index
    %c0_164 = arith.constant 0 : index
    %247 = vector.load %arg5[%c0_163, %c0_164] : memref<1x32xf32, #tpu.memory_space<vmem>>, vector<1x32xf32>
    %248 = vector.broadcast %247 : vector<1x32xf32> to vector<8x32xf32>
    %249 = arith.addf %246, %248 : vector<8x32xf32>
    %cst_165 = arith.constant 0.000000e+00 : f32
    %250 = vector.broadcast %cst_165 : f32 to vector<8x32xf32>
    %251 = arith.maximumf %249, %250 : vector<8x32xf32>
    %c0_166 = arith.constant 0 : index
    %c0_167 = arith.constant 0 : index
    %c0_168 = arith.constant 0 : index
    %252 = vector.load %arg6[%c0_166, %c0_167, %c0_168] : memref<2x32x32xf32, #tpu.memory_space<vmem>>, vector<1x32x32xf32>
    %253 = vector.shape_cast %252 : vector<1x32x32xf32> to vector<32x32xf32>
    %cst_169 = arith.constant dense<0.000000e+00> : vector<8x32xf32>
    %254 = tpu.matmul %251, %253, %cst_169 {dimension_numbers = #tpu.dot_dimension_numbers<[1], [0], [0], [1], [0, 0, 1, 1], [], []>} : vector<8x32xf32>, vector<32x32xf32>, vector<8x32xf32> -> vector<8x32xf32>
    %c0_170 = arith.constant 0 : index
    %c0_171 = arith.constant 0 : index
    %c0_172 = arith.constant 0 : index
    %255 = vector.load %arg7[%c0_170, %c0_171, %c0_172] : memref<2x1x32xf32, #tpu.memory_space<vmem>>, vector<1x1x32xf32>
    %256 = vector.shape_cast %255 : vector<1x1x32xf32> to vector<1x32xf32>
    %257 = vector.broadcast %256 : vector<1x32xf32> to vector<8x32xf32>
    %258 = arith.addf %254, %257 : vector<8x32xf32>
    %cst_173 = arith.constant 0.000000e+00 : f32
    %259 = vector.broadcast %cst_173 : f32 to vector<8x32xf32>
    %260 = arith.maximumf %258, %259 : vector<8x32xf32>
    %c1_174 = arith.constant 1 : index
    %c0_175 = arith.constant 0 : index
    %c0_176 = arith.constant 0 : index
    %261 = vector.load %arg6[%c1_174, %c0_175, %c0_176] : memref<2x32x32xf32, #tpu.memory_space<vmem>>, vector<1x32x32xf32>
    %262 = vector.shape_cast %261 : vector<1x32x32xf32> to vector<32x32xf32>
    %cst_177 = arith.constant dense<0.000000e+00> : vector<8x32xf32>
    %263 = tpu.matmul %260, %262, %cst_177 {dimension_numbers = #tpu.dot_dimension_numbers<[1], [0], [0], [1], [0, 0, 1, 1], [], []>} : vector<8x32xf32>, vector<32x32xf32>, vector<8x32xf32> -> vector<8x32xf32>
    %c1_178 = arith.constant 1 : index
    %c0_179 = arith.constant 0 : index
    %c0_180 = arith.constant 0 : index
    %264 = vector.load %arg7[%c1_178, %c0_179, %c0_180] : memref<2x1x32xf32, #tpu.memory_space<vmem>>, vector<1x1x32xf32>
    %265 = vector.shape_cast %264 : vector<1x1x32xf32> to vector<1x32xf32>
    %266 = vector.broadcast %265 : vector<1x32xf32> to vector<8x32xf32>
    %267 = arith.addf %263, %266 : vector<8x32xf32>
    %cst_181 = arith.constant 0.000000e+00 : f32
    %268 = vector.broadcast %cst_181 : f32 to vector<8x32xf32>
    %269 = arith.maximumf %267, %268 : vector<8x32xf32>
    %c0_182 = arith.constant 0 : index
    %c0_183 = arith.constant 0 : index
    %270 = vector.load %arg8[%c0_182, %c0_183] : memref<32x4xf32, #tpu.memory_space<vmem>>, vector<32x4xf32>
    %cst_184 = arith.constant dense<0.000000e+00> : vector<8x4xf32>
    %271 = tpu.matmul %269, %270, %cst_184 {dimension_numbers = #tpu.dot_dimension_numbers<[1], [0], [0], [1], [0, 0, 1, 1], [], []>} : vector<8x32xf32>, vector<32x4xf32>, vector<8x4xf32> -> vector<8x4xf32>
    %c0_185 = arith.constant 0 : index
    %c0_186 = arith.constant 0 : index
    %272 = vector.load %arg9[%c0_185, %c0_186] : memref<1x4xf32, #tpu.memory_space<vmem>>, vector<1x4xf32>
    %273 = vector.broadcast %272 : vector<1x4xf32> to vector<8x4xf32>
    %274 = arith.addf %271, %273 : vector<8x4xf32>
    %275 = arith.mulf %238, %238 : vector<8x4xf32>
    %cst_187 = arith.constant 1.250000e-01 : f32
    %276 = vector.broadcast %cst_187 : f32 to vector<8x4xf32>
    %277 = arith.subf %275, %276 : vector<8x4xf32>
    %cst_188 = arith.constant 2.000000e-02 : f32
    %278 = vector.broadcast %cst_188 : f32 to vector<8x4xf32>
    %279 = arith.mulf %278, %277 : vector<8x4xf32>
    %cst_189 = arith.constant 1.41421354 : f32
    %280 = vector.broadcast %cst_189 : f32 to vector<8x4xf32>
    %281 = arith.mulf %280, %277 : vector<8x4xf32>
    %282 = vector.broadcast %239 : f32 to vector<8x4xf32>
    %283 = arith.mulf %281, %282 : vector<8x4xf32>
    %284 = arith.mulf %274, %283 : vector<8x4xf32>
    %285 = arith.addf %218, %284 : vector<8x4xf32>
    %c0_190 = arith.constant 0 : index
    %c0_191 = arith.constant 0 : index
    %286 = vector.load %arg3[%c0_190, %c0_191] : memref<4x32xf32, #tpu.memory_space<vmem>>, vector<4x32xf32>
    %cst_192 = arith.constant dense<0.000000e+00> : vector<8x32xf32>
    %287 = tpu.matmul %285, %286, %cst_192 {dimension_numbers = #tpu.dot_dimension_numbers<[1], [0], [0], [1], [0, 0, 1, 1], [], []>} : vector<8x4xf32>, vector<4x32xf32>, vector<8x32xf32> -> vector<8x32xf32>
    %c0_193 = arith.constant 0 : index
    %c0_194 = arith.constant 0 : index
    %288 = vector.load %arg4[%c0_193, %c0_194] : memref<1x32xf32, #tpu.memory_space<vmem>>, vector<1x32xf32>
    %cst_195 = arith.constant 2.500000e-01 : f32
    %289 = vector.broadcast %cst_195 : f32 to vector<1x32xf32>
    %290 = arith.mulf %289, %288 : vector<1x32xf32>
    %291 = vector.broadcast %290 : vector<1x32xf32> to vector<8x32xf32>
    %292 = arith.addf %287, %291 : vector<8x32xf32>
    %c0_196 = arith.constant 0 : index
    %c0_197 = arith.constant 0 : index
    %293 = vector.load %arg5[%c0_196, %c0_197] : memref<1x32xf32, #tpu.memory_space<vmem>>, vector<1x32xf32>
    %294 = vector.broadcast %293 : vector<1x32xf32> to vector<8x32xf32>
    %295 = arith.addf %292, %294 : vector<8x32xf32>
    %cst_198 = arith.constant 0.000000e+00 : f32
    %296 = vector.broadcast %cst_198 : f32 to vector<8x32xf32>
    %297 = arith.maximumf %295, %296 : vector<8x32xf32>
    %c0_199 = arith.constant 0 : index
    %c0_200 = arith.constant 0 : index
    %c0_201 = arith.constant 0 : index
    %298 = vector.load %arg6[%c0_199, %c0_200, %c0_201] : memref<2x32x32xf32, #tpu.memory_space<vmem>>, vector<1x32x32xf32>
    %299 = vector.shape_cast %298 : vector<1x32x32xf32> to vector<32x32xf32>
    %cst_202 = arith.constant dense<0.000000e+00> : vector<8x32xf32>
    %300 = tpu.matmul %297, %299, %cst_202 {dimension_numbers = #tpu.dot_dimension_numbers<[1], [0], [0], [1], [0, 0, 1, 1], [], []>} : vector<8x32xf32>, vector<32x32xf32>, vector<8x32xf32> -> vector<8x32xf32>
    %c0_203 = arith.constant 0 : index
    %c0_204 = arith.constant 0 : index
    %c0_205 = arith.constant 0 : index
    %301 = vector.load %arg7[%c0_203, %c0_204, %c0_205] : memref<2x1x32xf32, #tpu.memory_space<vmem>>, vector<1x1x32xf32>
    %302 = vector.shape_cast %301 : vector<1x1x32xf32> to vector<1x32xf32>
    %303 = vector.broadcast %302 : vector<1x32xf32> to vector<8x32xf32>
    %304 = arith.addf %300, %303 : vector<8x32xf32>
    %cst_206 = arith.constant 0.000000e+00 : f32
    %305 = vector.broadcast %cst_206 : f32 to vector<8x32xf32>
    %306 = arith.maximumf %304, %305 : vector<8x32xf32>
    %c1_207 = arith.constant 1 : index
    %c0_208 = arith.constant 0 : index
    %c0_209 = arith.constant 0 : index
    %307 = vector.load %arg6[%c1_207, %c0_208, %c0_209] : memref<2x32x32xf32, #tpu.memory_space<vmem>>, vector<1x32x32xf32>
    %308 = vector.shape_cast %307 : vector<1x32x32xf32> to vector<32x32xf32>
    %cst_210 = arith.constant dense<0.000000e+00> : vector<8x32xf32>
    %309 = tpu.matmul %306, %308, %cst_210 {dimension_numbers = #tpu.dot_dimension_numbers<[1], [0], [0], [1], [0, 0, 1, 1], [], []>} : vector<8x32xf32>, vector<32x32xf32>, vector<8x32xf32> -> vector<8x32xf32>
    %c1_211 = arith.constant 1 : index
    %c0_212 = arith.constant 0 : index
    %c0_213 = arith.constant 0 : index
    %310 = vector.load %arg7[%c1_211, %c0_212, %c0_213] : memref<2x1x32xf32, #tpu.memory_space<vmem>>, vector<1x1x32xf32>
    %311 = vector.shape_cast %310 : vector<1x1x32xf32> to vector<1x32xf32>
    %312 = vector.broadcast %311 : vector<1x32xf32> to vector<8x32xf32>
    %313 = arith.addf %309, %312 : vector<8x32xf32>
    %cst_214 = arith.constant 0.000000e+00 : f32
    %314 = vector.broadcast %cst_214 : f32 to vector<8x32xf32>
    %315 = arith.maximumf %313, %314 : vector<8x32xf32>
    %c0_215 = arith.constant 0 : index
    %c0_216 = arith.constant 0 : index
    %316 = vector.load %arg8[%c0_215, %c0_216] : memref<32x4xf32, #tpu.memory_space<vmem>>, vector<32x4xf32>
    %cst_217 = arith.constant dense<0.000000e+00> : vector<8x4xf32>
    %317 = tpu.matmul %315, %316, %cst_217 {dimension_numbers = #tpu.dot_dimension_numbers<[1], [0], [0], [1], [0, 0, 1, 1], [], []>} : vector<8x32xf32>, vector<32x4xf32>, vector<8x4xf32> -> vector<8x4xf32>
    %c0_218 = arith.constant 0 : index
    %c0_219 = arith.constant 0 : index
    %318 = vector.load %arg9[%c0_218, %c0_219] : memref<1x4xf32, #tpu.memory_space<vmem>>, vector<1x4xf32>
    %319 = vector.broadcast %318 : vector<1x4xf32> to vector<8x4xf32>
    %320 = arith.addf %317, %319 : vector<8x4xf32>
    %321 = arith.subf %320, %274 : vector<8x4xf32>
    %cst_220 = arith.constant dense<0.000000e+00> : vector<8xf32>
    %322 = vector.multi_reduction <add>, %321, %cst_220 [1] : vector<8x4xf32> to vector<8xf32>
    %323 = vector.shape_cast %322 : vector<8xf32> to vector<8x1xf32>
    %cst_221 = arith.constant 1.000000e-01 : f32
    %324 = vector.broadcast %cst_221 : f32 to vector<8x4xf32>
    %325 = arith.mulf %324, %218 : vector<8x4xf32>
    %cst_222 = arith.constant 1.250000e-01 : f32
    %326 = vector.broadcast %cst_222 : f32 to vector<8x4xf32>
    %327 = arith.mulf %325, %326 : vector<8x4xf32>
    %328 = arith.addf %218, %327 : vector<8x4xf32>
    %cst_223 = arith.constant 2.000000e-01 : f32
    %329 = vector.broadcast %cst_223 : f32 to vector<8x4xf32>
    %330 = arith.mulf %329, %218 : vector<8x4xf32>
    %331 = arith.mulf %330, %238 : vector<8x4xf32>
    %332 = arith.addf %328, %331 : vector<8x4xf32>
    %333 = arith.mulf %279, %218 : vector<8x4xf32>
    %334 = arith.addf %332, %333 : vector<8x4xf32>
    %cst_224 = arith.constant 5.000000e-02 : f32
    %335 = vector.broadcast %cst_224 : f32 to vector<8x1xf32>
    %336 = arith.mulf %335, %236 : vector<8x1xf32>
    %cst_225 = arith.constant dense<0.000000e+00> : vector<8xf32>
    %337 = vector.multi_reduction <add>, %274, %cst_225 [1] : vector<8x4xf32> to vector<8xf32>
    %338 = vector.shape_cast %337 : vector<8xf32> to vector<8x1xf32>
    %cst_226 = arith.constant 0.00999999977 : f32
    %339 = vector.broadcast %cst_226 : f32 to vector<8x1xf32>
    %340 = arith.mulf %339, %338 : vector<8x1xf32>
    %341 = arith.addf %336, %340 : vector<8x1xf32>
    %342 = arith.mulf %274, %238 : vector<8x4xf32>
    %cst_227 = arith.constant dense<0.000000e+00> : vector<8xf32>
    %343 = vector.multi_reduction <add>, %342, %cst_227 [1] : vector<8x4xf32> to vector<8xf32>
    %344 = vector.shape_cast %343 : vector<8xf32> to vector<8x1xf32>
    %cst_228 = arith.constant 1.250000e-01 : f32
    %345 = vector.broadcast %cst_228 : f32 to vector<8x1xf32>
    %346 = arith.mulf %341, %345 : vector<8x1xf32>
    %347 = arith.subf %236, %346 : vector<8x1xf32>
    %348 = arith.addf %347, %344 : vector<8x1xf32>
    %cst_229 = arith.constant 2.82842708 : f32
    %349 = arith.mulf %239, %cst_229 : f32
    %350 = vector.broadcast %349 : f32 to vector<8x1xf32>
    %351 = arith.mulf %323, %350 : vector<8x1xf32>
    %352 = arith.addf %348, %351 : vector<8x1xf32>
    %c3 = arith.constant 3 : index
    %c0_230 = arith.constant 0 : index
    %c0_231 = arith.constant 0 : index
    %353 = vector.load %arg0[%c3, %c0_230, %c0_231] : memref<8x8x4xf32, #tpu.memory_space<vmem>>, vector<1x8x4xf32>
    %354 = vector.shape_cast %353 : vector<1x8x4xf32> to vector<8x4xf32>
    %c3_232 = arith.constant 3 : index
    %355 = memref.load %arg1[%c3_232] : memref<8xf32, #tpu.memory_space<smem>>
    %c0_233 = arith.constant 0 : index
    %c0_234 = arith.constant 0 : index
    %356 = vector.load %arg3[%c0_233, %c0_234] : memref<4x32xf32, #tpu.memory_space<vmem>>, vector<4x32xf32>
    %cst_235 = arith.constant dense<0.000000e+00> : vector<8x32xf32>
    %357 = tpu.matmul %334, %356, %cst_235 {dimension_numbers = #tpu.dot_dimension_numbers<[1], [0], [0], [1], [0, 0, 1, 1], [], []>} : vector<8x4xf32>, vector<4x32xf32>, vector<8x32xf32> -> vector<8x32xf32>
    %c0_236 = arith.constant 0 : index
    %c0_237 = arith.constant 0 : index
    %358 = vector.load %arg4[%c0_236, %c0_237] : memref<1x32xf32, #tpu.memory_space<vmem>>, vector<1x32xf32>
    %cst_238 = arith.constant 3.750000e-01 : f32
    %359 = vector.broadcast %cst_238 : f32 to vector<1x32xf32>
    %360 = arith.mulf %359, %358 : vector<1x32xf32>
    %361 = vector.broadcast %360 : vector<1x32xf32> to vector<8x32xf32>
    %362 = arith.addf %357, %361 : vector<8x32xf32>
    %c0_239 = arith.constant 0 : index
    %c0_240 = arith.constant 0 : index
    %363 = vector.load %arg5[%c0_239, %c0_240] : memref<1x32xf32, #tpu.memory_space<vmem>>, vector<1x32xf32>
    %364 = vector.broadcast %363 : vector<1x32xf32> to vector<8x32xf32>
    %365 = arith.addf %362, %364 : vector<8x32xf32>
    %cst_241 = arith.constant 0.000000e+00 : f32
    %366 = vector.broadcast %cst_241 : f32 to vector<8x32xf32>
    %367 = arith.maximumf %365, %366 : vector<8x32xf32>
    %c0_242 = arith.constant 0 : index
    %c0_243 = arith.constant 0 : index
    %c0_244 = arith.constant 0 : index
    %368 = vector.load %arg6[%c0_242, %c0_243, %c0_244] : memref<2x32x32xf32, #tpu.memory_space<vmem>>, vector<1x32x32xf32>
    %369 = vector.shape_cast %368 : vector<1x32x32xf32> to vector<32x32xf32>
    %cst_245 = arith.constant dense<0.000000e+00> : vector<8x32xf32>
    %370 = tpu.matmul %367, %369, %cst_245 {dimension_numbers = #tpu.dot_dimension_numbers<[1], [0], [0], [1], [0, 0, 1, 1], [], []>} : vector<8x32xf32>, vector<32x32xf32>, vector<8x32xf32> -> vector<8x32xf32>
    %c0_246 = arith.constant 0 : index
    %c0_247 = arith.constant 0 : index
    %c0_248 = arith.constant 0 : index
    %371 = vector.load %arg7[%c0_246, %c0_247, %c0_248] : memref<2x1x32xf32, #tpu.memory_space<vmem>>, vector<1x1x32xf32>
    %372 = vector.shape_cast %371 : vector<1x1x32xf32> to vector<1x32xf32>
    %373 = vector.broadcast %372 : vector<1x32xf32> to vector<8x32xf32>
    %374 = arith.addf %370, %373 : vector<8x32xf32>
    %cst_249 = arith.constant 0.000000e+00 : f32
    %375 = vector.broadcast %cst_249 : f32 to vector<8x32xf32>
    %376 = arith.maximumf %374, %375 : vector<8x32xf32>
    %c1_250 = arith.constant 1 : index
    %c0_251 = arith.constant 0 : index
    %c0_252 = arith.constant 0 : index
    %377 = vector.load %arg6[%c1_250, %c0_251, %c0_252] : memref<2x32x32xf32, #tpu.memory_space<vmem>>, vector<1x32x32xf32>
    %378 = vector.shape_cast %377 : vector<1x32x32xf32> to vector<32x32xf32>
    %cst_253 = arith.constant dense<0.000000e+00> : vector<8x32xf32>
    %379 = tpu.matmul %376, %378, %cst_253 {dimension_numbers = #tpu.dot_dimension_numbers<[1], [0], [0], [1], [0, 0, 1, 1], [], []>} : vector<8x32xf32>, vector<32x32xf32>, vector<8x32xf32> -> vector<8x32xf32>
    %c1_254 = arith.constant 1 : index
    %c0_255 = arith.constant 0 : index
    %c0_256 = arith.constant 0 : index
    %380 = vector.load %arg7[%c1_254, %c0_255, %c0_256] : memref<2x1x32xf32, #tpu.memory_space<vmem>>, vector<1x1x32xf32>
    %381 = vector.shape_cast %380 : vector<1x1x32xf32> to vector<1x32xf32>
    %382 = vector.broadcast %381 : vector<1x32xf32> to vector<8x32xf32>
    %383 = arith.addf %379, %382 : vector<8x32xf32>
    %cst_257 = arith.constant 0.000000e+00 : f32
    %384 = vector.broadcast %cst_257 : f32 to vector<8x32xf32>
    %385 = arith.maximumf %383, %384 : vector<8x32xf32>
    %c0_258 = arith.constant 0 : index
    %c0_259 = arith.constant 0 : index
    %386 = vector.load %arg8[%c0_258, %c0_259] : memref<32x4xf32, #tpu.memory_space<vmem>>, vector<32x4xf32>
    %cst_260 = arith.constant dense<0.000000e+00> : vector<8x4xf32>
    %387 = tpu.matmul %385, %386, %cst_260 {dimension_numbers = #tpu.dot_dimension_numbers<[1], [0], [0], [1], [0, 0, 1, 1], [], []>} : vector<8x32xf32>, vector<32x4xf32>, vector<8x4xf32> -> vector<8x4xf32>
    %c0_261 = arith.constant 0 : index
    %c0_262 = arith.constant 0 : index
    %388 = vector.load %arg9[%c0_261, %c0_262] : memref<1x4xf32, #tpu.memory_space<vmem>>, vector<1x4xf32>
    %389 = vector.broadcast %388 : vector<1x4xf32> to vector<8x4xf32>
    %390 = arith.addf %387, %389 : vector<8x4xf32>
    %391 = arith.mulf %354, %354 : vector<8x4xf32>
    %cst_263 = arith.constant 1.250000e-01 : f32
    %392 = vector.broadcast %cst_263 : f32 to vector<8x4xf32>
    %393 = arith.subf %391, %392 : vector<8x4xf32>
    %cst_264 = arith.constant 2.000000e-02 : f32
    %394 = vector.broadcast %cst_264 : f32 to vector<8x4xf32>
    %395 = arith.mulf %394, %393 : vector<8x4xf32>
    %cst_265 = arith.constant 1.41421354 : f32
    %396 = vector.broadcast %cst_265 : f32 to vector<8x4xf32>
    %397 = arith.mulf %396, %393 : vector<8x4xf32>
    %398 = vector.broadcast %355 : f32 to vector<8x4xf32>
    %399 = arith.mulf %397, %398 : vector<8x4xf32>
    %400 = arith.mulf %390, %399 : vector<8x4xf32>
    %401 = arith.addf %334, %400 : vector<8x4xf32>
    %c0_266 = arith.constant 0 : index
    %c0_267 = arith.constant 0 : index
    %402 = vector.load %arg3[%c0_266, %c0_267] : memref<4x32xf32, #tpu.memory_space<vmem>>, vector<4x32xf32>
    %cst_268 = arith.constant dense<0.000000e+00> : vector<8x32xf32>
    %403 = tpu.matmul %401, %402, %cst_268 {dimension_numbers = #tpu.dot_dimension_numbers<[1], [0], [0], [1], [0, 0, 1, 1], [], []>} : vector<8x4xf32>, vector<4x32xf32>, vector<8x32xf32> -> vector<8x32xf32>
    %c0_269 = arith.constant 0 : index
    %c0_270 = arith.constant 0 : index
    %404 = vector.load %arg4[%c0_269, %c0_270] : memref<1x32xf32, #tpu.memory_space<vmem>>, vector<1x32xf32>
    %cst_271 = arith.constant 3.750000e-01 : f32
    %405 = vector.broadcast %cst_271 : f32 to vector<1x32xf32>
    %406 = arith.mulf %405, %404 : vector<1x32xf32>
    %407 = vector.broadcast %406 : vector<1x32xf32> to vector<8x32xf32>
    %408 = arith.addf %403, %407 : vector<8x32xf32>
    %c0_272 = arith.constant 0 : index
    %c0_273 = arith.constant 0 : index
    %409 = vector.load %arg5[%c0_272, %c0_273] : memref<1x32xf32, #tpu.memory_space<vmem>>, vector<1x32xf32>
    %410 = vector.broadcast %409 : vector<1x32xf32> to vector<8x32xf32>
    %411 = arith.addf %408, %410 : vector<8x32xf32>
    %cst_274 = arith.constant 0.000000e+00 : f32
    %412 = vector.broadcast %cst_274 : f32 to vector<8x32xf32>
    %413 = arith.maximumf %411, %412 : vector<8x32xf32>
    %c0_275 = arith.constant 0 : index
    %c0_276 = arith.constant 0 : index
    %c0_277 = arith.constant 0 : index
    %414 = vector.load %arg6[%c0_275, %c0_276, %c0_277] : memref<2x32x32xf32, #tpu.memory_space<vmem>>, vector<1x32x32xf32>
    %415 = vector.shape_cast %414 : vector<1x32x32xf32> to vector<32x32xf32>
    %cst_278 = arith.constant dense<0.000000e+00> : vector<8x32xf32>
    %416 = tpu.matmul %413, %415, %cst_278 {dimension_numbers = #tpu.dot_dimension_numbers<[1], [0], [0], [1], [0, 0, 1, 1], [], []>} : vector<8x32xf32>, vector<32x32xf32>, vector<8x32xf32> -> vector<8x32xf32>
    %c0_279 = arith.constant 0 : index
    %c0_280 = arith.constant 0 : index
    %c0_281 = arith.constant 0 : index
    %417 = vector.load %arg7[%c0_279, %c0_280, %c0_281] : memref<2x1x32xf32, #tpu.memory_space<vmem>>, vector<1x1x32xf32>
    %418 = vector.shape_cast %417 : vector<1x1x32xf32> to vector<1x32xf32>
    %419 = vector.broadcast %418 : vector<1x32xf32> to vector<8x32xf32>
    %420 = arith.addf %416, %419 : vector<8x32xf32>
    %cst_282 = arith.constant 0.000000e+00 : f32
    %421 = vector.broadcast %cst_282 : f32 to vector<8x32xf32>
    %422 = arith.maximumf %420, %421 : vector<8x32xf32>
    %c1_283 = arith.constant 1 : index
    %c0_284 = arith.constant 0 : index
    %c0_285 = arith.constant 0 : index
    %423 = vector.load %arg6[%c1_283, %c0_284, %c0_285] : memref<2x32x32xf32, #tpu.memory_space<vmem>>, vector<1x32x32xf32>
    %424 = vector.shape_cast %423 : vector<1x32x32xf32> to vector<32x32xf32>
    %cst_286 = arith.constant dense<0.000000e+00> : vector<8x32xf32>
    %425 = tpu.matmul %422, %424, %cst_286 {dimension_numbers = #tpu.dot_dimension_numbers<[1], [0], [0], [1], [0, 0, 1, 1], [], []>} : vector<8x32xf32>, vector<32x32xf32>, vector<8x32xf32> -> vector<8x32xf32>
    %c1_287 = arith.constant 1 : index
    %c0_288 = arith.constant 0 : index
    %c0_289 = arith.constant 0 : index
    %426 = vector.load %arg7[%c1_287, %c0_288, %c0_289] : memref<2x1x32xf32, #tpu.memory_space<vmem>>, vector<1x1x32xf32>
    %427 = vector.shape_cast %426 : vector<1x1x32xf32> to vector<1x32xf32>
    %428 = vector.broadcast %427 : vector<1x32xf32> to vector<8x32xf32>
    %429 = arith.addf %425, %428 : vector<8x32xf32>
    %cst_290 = arith.constant 0.000000e+00 : f32
    %430 = vector.broadcast %cst_290 : f32 to vector<8x32xf32>
    %431 = arith.maximumf %429, %430 : vector<8x32xf32>
    %c0_291 = arith.constant 0 : index
    %c0_292 = arith.constant 0 : index
    %432 = vector.load %arg8[%c0_291, %c0_292] : memref<32x4xf32, #tpu.memory_space<vmem>>, vector<32x4xf32>
    %cst_293 = arith.constant dense<0.000000e+00> : vector<8x4xf32>
    %433 = tpu.matmul %431, %432, %cst_293 {dimension_numbers = #tpu.dot_dimension_numbers<[1], [0], [0], [1], [0, 0, 1, 1], [], []>} : vector<8x32xf32>, vector<32x4xf32>, vector<8x4xf32> -> vector<8x4xf32>
    %c0_294 = arith.constant 0 : index
    %c0_295 = arith.constant 0 : index
    %434 = vector.load %arg9[%c0_294, %c0_295] : memref<1x4xf32, #tpu.memory_space<vmem>>, vector<1x4xf32>
    %435 = vector.broadcast %434 : vector<1x4xf32> to vector<8x4xf32>
    %436 = arith.addf %433, %435 : vector<8x4xf32>
    %437 = arith.subf %436, %390 : vector<8x4xf32>
    %cst_296 = arith.constant dense<0.000000e+00> : vector<8xf32>
    %438 = vector.multi_reduction <add>, %437, %cst_296 [1] : vector<8x4xf32> to vector<8xf32>
    %439 = vector.shape_cast %438 : vector<8xf32> to vector<8x1xf32>
    %cst_297 = arith.constant 1.000000e-01 : f32
    %440 = vector.broadcast %cst_297 : f32 to vector<8x4xf32>
    %441 = arith.mulf %440, %334 : vector<8x4xf32>
    %cst_298 = arith.constant 1.250000e-01 : f32
    %442 = vector.broadcast %cst_298 : f32 to vector<8x4xf32>
    %443 = arith.mulf %441, %442 : vector<8x4xf32>
    %444 = arith.addf %334, %443 : vector<8x4xf32>
    %cst_299 = arith.constant 2.000000e-01 : f32
    %445 = vector.broadcast %cst_299 : f32 to vector<8x4xf32>
    %446 = arith.mulf %445, %334 : vector<8x4xf32>
    %447 = arith.mulf %446, %354 : vector<8x4xf32>
    %448 = arith.addf %444, %447 : vector<8x4xf32>
    %449 = arith.mulf %395, %334 : vector<8x4xf32>
    %450 = arith.addf %448, %449 : vector<8x4xf32>
    %cst_300 = arith.constant 5.000000e-02 : f32
    %451 = vector.broadcast %cst_300 : f32 to vector<8x1xf32>
    %452 = arith.mulf %451, %352 : vector<8x1xf32>
    %cst_301 = arith.constant dense<0.000000e+00> : vector<8xf32>
    %453 = vector.multi_reduction <add>, %390, %cst_301 [1] : vector<8x4xf32> to vector<8xf32>
    %454 = vector.shape_cast %453 : vector<8xf32> to vector<8x1xf32>
    %cst_302 = arith.constant 0.00999999977 : f32
    %455 = vector.broadcast %cst_302 : f32 to vector<8x1xf32>
    %456 = arith.mulf %455, %454 : vector<8x1xf32>
    %457 = arith.addf %452, %456 : vector<8x1xf32>
    %458 = arith.mulf %390, %354 : vector<8x4xf32>
    %cst_303 = arith.constant dense<0.000000e+00> : vector<8xf32>
    %459 = vector.multi_reduction <add>, %458, %cst_303 [1] : vector<8x4xf32> to vector<8xf32>
    %460 = vector.shape_cast %459 : vector<8xf32> to vector<8x1xf32>
    %cst_304 = arith.constant 1.250000e-01 : f32
    %461 = vector.broadcast %cst_304 : f32 to vector<8x1xf32>
    %462 = arith.mulf %457, %461 : vector<8x1xf32>
    %463 = arith.subf %352, %462 : vector<8x1xf32>
    %464 = arith.addf %463, %460 : vector<8x1xf32>
    %cst_305 = arith.constant 2.82842708 : f32
    %465 = arith.mulf %355, %cst_305 : f32
    %466 = vector.broadcast %465 : f32 to vector<8x1xf32>
    %467 = arith.mulf %439, %466 : vector<8x1xf32>
    %468 = arith.addf %464, %467 : vector<8x1xf32>
    %c4 = arith.constant 4 : index
    %c0_306 = arith.constant 0 : index
    %c0_307 = arith.constant 0 : index
    %469 = vector.load %arg0[%c4, %c0_306, %c0_307] : memref<8x8x4xf32, #tpu.memory_space<vmem>>, vector<1x8x4xf32>
    %470 = vector.shape_cast %469 : vector<1x8x4xf32> to vector<8x4xf32>
    %c4_308 = arith.constant 4 : index
    %471 = memref.load %arg1[%c4_308] : memref<8xf32, #tpu.memory_space<smem>>
    %c0_309 = arith.constant 0 : index
    %c0_310 = arith.constant 0 : index
    %472 = vector.load %arg3[%c0_309, %c0_310] : memref<4x32xf32, #tpu.memory_space<vmem>>, vector<4x32xf32>
    %cst_311 = arith.constant dense<0.000000e+00> : vector<8x32xf32>
    %473 = tpu.matmul %450, %472, %cst_311 {dimension_numbers = #tpu.dot_dimension_numbers<[1], [0], [0], [1], [0, 0, 1, 1], [], []>} : vector<8x4xf32>, vector<4x32xf32>, vector<8x32xf32> -> vector<8x32xf32>
    %c0_312 = arith.constant 0 : index
    %c0_313 = arith.constant 0 : index
    %474 = vector.load %arg4[%c0_312, %c0_313] : memref<1x32xf32, #tpu.memory_space<vmem>>, vector<1x32xf32>
    %cst_314 = arith.constant 5.000000e-01 : f32
    %475 = vector.broadcast %cst_314 : f32 to vector<1x32xf32>
    %476 = arith.mulf %475, %474 : vector<1x32xf32>
    %477 = vector.broadcast %476 : vector<1x32xf32> to vector<8x32xf32>
    %478 = arith.addf %473, %477 : vector<8x32xf32>
    %c0_315 = arith.constant 0 : index
    %c0_316 = arith.constant 0 : index
    %479 = vector.load %arg5[%c0_315, %c0_316] : memref<1x32xf32, #tpu.memory_space<vmem>>, vector<1x32xf32>
    %480 = vector.broadcast %479 : vector<1x32xf32> to vector<8x32xf32>
    %481 = arith.addf %478, %480 : vector<8x32xf32>
    %cst_317 = arith.constant 0.000000e+00 : f32
    %482 = vector.broadcast %cst_317 : f32 to vector<8x32xf32>
    %483 = arith.maximumf %481, %482 : vector<8x32xf32>
    %c0_318 = arith.constant 0 : index
    %c0_319 = arith.constant 0 : index
    %c0_320 = arith.constant 0 : index
    %484 = vector.load %arg6[%c0_318, %c0_319, %c0_320] : memref<2x32x32xf32, #tpu.memory_space<vmem>>, vector<1x32x32xf32>
    %485 = vector.shape_cast %484 : vector<1x32x32xf32> to vector<32x32xf32>
    %cst_321 = arith.constant dense<0.000000e+00> : vector<8x32xf32>
    %486 = tpu.matmul %483, %485, %cst_321 {dimension_numbers = #tpu.dot_dimension_numbers<[1], [0], [0], [1], [0, 0, 1, 1], [], []>} : vector<8x32xf32>, vector<32x32xf32>, vector<8x32xf32> -> vector<8x32xf32>
    %c0_322 = arith.constant 0 : index
    %c0_323 = arith.constant 0 : index
    %c0_324 = arith.constant 0 : index
    %487 = vector.load %arg7[%c0_322, %c0_323, %c0_324] : memref<2x1x32xf32, #tpu.memory_space<vmem>>, vector<1x1x32xf32>
    %488 = vector.shape_cast %487 : vector<1x1x32xf32> to vector<1x32xf32>
    %489 = vector.broadcast %488 : vector<1x32xf32> to vector<8x32xf32>
    %490 = arith.addf %486, %489 : vector<8x32xf32>
    %cst_325 = arith.constant 0.000000e+00 : f32
    %491 = vector.broadcast %cst_325 : f32 to vector<8x32xf32>
    %492 = arith.maximumf %490, %491 : vector<8x32xf32>
    %c1_326 = arith.constant 1 : index
    %c0_327 = arith.constant 0 : index
    %c0_328 = arith.constant 0 : index
    %493 = vector.load %arg6[%c1_326, %c0_327, %c0_328] : memref<2x32x32xf32, #tpu.memory_space<vmem>>, vector<1x32x32xf32>
    %494 = vector.shape_cast %493 : vector<1x32x32xf32> to vector<32x32xf32>
    %cst_329 = arith.constant dense<0.000000e+00> : vector<8x32xf32>
    %495 = tpu.matmul %492, %494, %cst_329 {dimension_numbers = #tpu.dot_dimension_numbers<[1], [0], [0], [1], [0, 0, 1, 1], [], []>} : vector<8x32xf32>, vector<32x32xf32>, vector<8x32xf32> -> vector<8x32xf32>
    %c1_330 = arith.constant 1 : index
    %c0_331 = arith.constant 0 : index
    %c0_332 = arith.constant 0 : index
    %496 = vector.load %arg7[%c1_330, %c0_331, %c0_332] : memref<2x1x32xf32, #tpu.memory_space<vmem>>, vector<1x1x32xf32>
    %497 = vector.shape_cast %496 : vector<1x1x32xf32> to vector<1x32xf32>
    %498 = vector.broadcast %497 : vector<1x32xf32> to vector<8x32xf32>
    %499 = arith.addf %495, %498 : vector<8x32xf32>
    %cst_333 = arith.constant 0.000000e+00 : f32
    %500 = vector.broadcast %cst_333 : f32 to vector<8x32xf32>
    %501 = arith.maximumf %499, %500 : vector<8x32xf32>
    %c0_334 = arith.constant 0 : index
    %c0_335 = arith.constant 0 : index
    %502 = vector.load %arg8[%c0_334, %c0_335] : memref<32x4xf32, #tpu.memory_space<vmem>>, vector<32x4xf32>
    %cst_336 = arith.constant dense<0.000000e+00> : vector<8x4xf32>
    %503 = tpu.matmul %501, %502, %cst_336 {dimension_numbers = #tpu.dot_dimension_numbers<[1], [0], [0], [1], [0, 0, 1, 1], [], []>} : vector<8x32xf32>, vector<32x4xf32>, vector<8x4xf32> -> vector<8x4xf32>
    %c0_337 = arith.constant 0 : index
    %c0_338 = arith.constant 0 : index
    %504 = vector.load %arg9[%c0_337, %c0_338] : memref<1x4xf32, #tpu.memory_space<vmem>>, vector<1x4xf32>
    %505 = vector.broadcast %504 : vector<1x4xf32> to vector<8x4xf32>
    %506 = arith.addf %503, %505 : vector<8x4xf32>
    %507 = arith.mulf %470, %470 : vector<8x4xf32>
    %cst_339 = arith.constant 1.250000e-01 : f32
    %508 = vector.broadcast %cst_339 : f32 to vector<8x4xf32>
    %509 = arith.subf %507, %508 : vector<8x4xf32>
    %cst_340 = arith.constant 2.000000e-02 : f32
    %510 = vector.broadcast %cst_340 : f32 to vector<8x4xf32>
    %511 = arith.mulf %510, %509 : vector<8x4xf32>
    %cst_341 = arith.constant 1.41421354 : f32
    %512 = vector.broadcast %cst_341 : f32 to vector<8x4xf32>
    %513 = arith.mulf %512, %509 : vector<8x4xf32>
    %514 = vector.broadcast %471 : f32 to vector<8x4xf32>
    %515 = arith.mulf %513, %514 : vector<8x4xf32>
    %516 = arith.mulf %506, %515 : vector<8x4xf32>
    %517 = arith.addf %450, %516 : vector<8x4xf32>
    %c0_342 = arith.constant 0 : index
    %c0_343 = arith.constant 0 : index
    %518 = vector.load %arg3[%c0_342, %c0_343] : memref<4x32xf32, #tpu.memory_space<vmem>>, vector<4x32xf32>
    %cst_344 = arith.constant dense<0.000000e+00> : vector<8x32xf32>
    %519 = tpu.matmul %517, %518, %cst_344 {dimension_numbers = #tpu.dot_dimension_numbers<[1], [0], [0], [1], [0, 0, 1, 1], [], []>} : vector<8x4xf32>, vector<4x32xf32>, vector<8x32xf32> -> vector<8x32xf32>
    %c0_345 = arith.constant 0 : index
    %c0_346 = arith.constant 0 : index
    %520 = vector.load %arg4[%c0_345, %c0_346] : memref<1x32xf32, #tpu.memory_space<vmem>>, vector<1x32xf32>
    %cst_347 = arith.constant 5.000000e-01 : f32
    %521 = vector.broadcast %cst_347 : f32 to vector<1x32xf32>
    %522 = arith.mulf %521, %520 : vector<1x32xf32>
    %523 = vector.broadcast %522 : vector<1x32xf32> to vector<8x32xf32>
    %524 = arith.addf %519, %523 : vector<8x32xf32>
    %c0_348 = arith.constant 0 : index
    %c0_349 = arith.constant 0 : index
    %525 = vector.load %arg5[%c0_348, %c0_349] : memref<1x32xf32, #tpu.memory_space<vmem>>, vector<1x32xf32>
    %526 = vector.broadcast %525 : vector<1x32xf32> to vector<8x32xf32>
    %527 = arith.addf %524, %526 : vector<8x32xf32>
    %cst_350 = arith.constant 0.000000e+00 : f32
    %528 = vector.broadcast %cst_350 : f32 to vector<8x32xf32>
    %529 = arith.maximumf %527, %528 : vector<8x32xf32>
    %c0_351 = arith.constant 0 : index
    %c0_352 = arith.constant 0 : index
    %c0_353 = arith.constant 0 : index
    %530 = vector.load %arg6[%c0_351, %c0_352, %c0_353] : memref<2x32x32xf32, #tpu.memory_space<vmem>>, vector<1x32x32xf32>
    %531 = vector.shape_cast %530 : vector<1x32x32xf32> to vector<32x32xf32>
    %cst_354 = arith.constant dense<0.000000e+00> : vector<8x32xf32>
    %532 = tpu.matmul %529, %531, %cst_354 {dimension_numbers = #tpu.dot_dimension_numbers<[1], [0], [0], [1], [0, 0, 1, 1], [], []>} : vector<8x32xf32>, vector<32x32xf32>, vector<8x32xf32> -> vector<8x32xf32>
    %c0_355 = arith.constant 0 : index
    %c0_356 = arith.constant 0 : index
    %c0_357 = arith.constant 0 : index
    %533 = vector.load %arg7[%c0_355, %c0_356, %c0_357] : memref<2x1x32xf32, #tpu.memory_space<vmem>>, vector<1x1x32xf32>
    %534 = vector.shape_cast %533 : vector<1x1x32xf32> to vector<1x32xf32>
    %535 = vector.broadcast %534 : vector<1x32xf32> to vector<8x32xf32>
    %536 = arith.addf %532, %535 : vector<8x32xf32>
    %cst_358 = arith.constant 0.000000e+00 : f32
    %537 = vector.broadcast %cst_358 : f32 to vector<8x32xf32>
    %538 = arith.maximumf %536, %537 : vector<8x32xf32>
    %c1_359 = arith.constant 1 : index
    %c0_360 = arith.constant 0 : index
    %c0_361 = arith.constant 0 : index
    %539 = vector.load %arg6[%c1_359, %c0_360, %c0_361] : memref<2x32x32xf32, #tpu.memory_space<vmem>>, vector<1x32x32xf32>
    %540 = vector.shape_cast %539 : vector<1x32x32xf32> to vector<32x32xf32>
    %cst_362 = arith.constant dense<0.000000e+00> : vector<8x32xf32>
    %541 = tpu.matmul %538, %540, %cst_362 {dimension_numbers = #tpu.dot_dimension_numbers<[1], [0], [0], [1], [0, 0, 1, 1], [], []>} : vector<8x32xf32>, vector<32x32xf32>, vector<8x32xf32> -> vector<8x32xf32>
    %c1_363 = arith.constant 1 : index
    %c0_364 = arith.constant 0 : index
    %c0_365 = arith.constant 0 : index
    %542 = vector.load %arg7[%c1_363, %c0_364, %c0_365] : memref<2x1x32xf32, #tpu.memory_space<vmem>>, vector<1x1x32xf32>
    %543 = vector.shape_cast %542 : vector<1x1x32xf32> to vector<1x32xf32>
    %544 = vector.broadcast %543 : vector<1x32xf32> to vector<8x32xf32>
    %545 = arith.addf %541, %544 : vector<8x32xf32>
    %cst_366 = arith.constant 0.000000e+00 : f32
    %546 = vector.broadcast %cst_366 : f32 to vector<8x32xf32>
    %547 = arith.maximumf %545, %546 : vector<8x32xf32>
    %c0_367 = arith.constant 0 : index
    %c0_368 = arith.constant 0 : index
    %548 = vector.load %arg8[%c0_367, %c0_368] : memref<32x4xf32, #tpu.memory_space<vmem>>, vector<32x4xf32>
    %cst_369 = arith.constant dense<0.000000e+00> : vector<8x4xf32>
    %549 = tpu.matmul %547, %548, %cst_369 {dimension_numbers = #tpu.dot_dimension_numbers<[1], [0], [0], [1], [0, 0, 1, 1], [], []>} : vector<8x32xf32>, vector<32x4xf32>, vector<8x4xf32> -> vector<8x4xf32>
    %c0_370 = arith.constant 0 : index
    %c0_371 = arith.constant 0 : index
    %550 = vector.load %arg9[%c0_370, %c0_371] : memref<1x4xf32, #tpu.memory_space<vmem>>, vector<1x4xf32>
    %551 = vector.broadcast %550 : vector<1x4xf32> to vector<8x4xf32>
    %552 = arith.addf %549, %551 : vector<8x4xf32>
    %553 = arith.subf %552, %506 : vector<8x4xf32>
    %cst_372 = arith.constant dense<0.000000e+00> : vector<8xf32>
    %554 = vector.multi_reduction <add>, %553, %cst_372 [1] : vector<8x4xf32> to vector<8xf32>
    %555 = vector.shape_cast %554 : vector<8xf32> to vector<8x1xf32>
    %cst_373 = arith.constant 1.000000e-01 : f32
    %556 = vector.broadcast %cst_373 : f32 to vector<8x4xf32>
    %557 = arith.mulf %556, %450 : vector<8x4xf32>
    %cst_374 = arith.constant 1.250000e-01 : f32
    %558 = vector.broadcast %cst_374 : f32 to vector<8x4xf32>
    %559 = arith.mulf %557, %558 : vector<8x4xf32>
    %560 = arith.addf %450, %559 : vector<8x4xf32>
    %cst_375 = arith.constant 2.000000e-01 : f32
    %561 = vector.broadcast %cst_375 : f32 to vector<8x4xf32>
    %562 = arith.mulf %561, %450 : vector<8x4xf32>
    %563 = arith.mulf %562, %470 : vector<8x4xf32>
    %564 = arith.addf %560, %563 : vector<8x4xf32>
    %565 = arith.mulf %511, %450 : vector<8x4xf32>
    %566 = arith.addf %564, %565 : vector<8x4xf32>
    %cst_376 = arith.constant 5.000000e-02 : f32
    %567 = vector.broadcast %cst_376 : f32 to vector<8x1xf32>
    %568 = arith.mulf %567, %468 : vector<8x1xf32>
    %cst_377 = arith.constant dense<0.000000e+00> : vector<8xf32>
    %569 = vector.multi_reduction <add>, %506, %cst_377 [1] : vector<8x4xf32> to vector<8xf32>
    %570 = vector.shape_cast %569 : vector<8xf32> to vector<8x1xf32>
    %cst_378 = arith.constant 0.00999999977 : f32
    %571 = vector.broadcast %cst_378 : f32 to vector<8x1xf32>
    %572 = arith.mulf %571, %570 : vector<8x1xf32>
    %573 = arith.addf %568, %572 : vector<8x1xf32>
    %574 = arith.mulf %506, %470 : vector<8x4xf32>
    %cst_379 = arith.constant dense<0.000000e+00> : vector<8xf32>
    %575 = vector.multi_reduction <add>, %574, %cst_379 [1] : vector<8x4xf32> to vector<8xf32>
    %576 = vector.shape_cast %575 : vector<8xf32> to vector<8x1xf32>
    %cst_380 = arith.constant 1.250000e-01 : f32
    %577 = vector.broadcast %cst_380 : f32 to vector<8x1xf32>
    %578 = arith.mulf %573, %577 : vector<8x1xf32>
    %579 = arith.subf %468, %578 : vector<8x1xf32>
    %580 = arith.addf %579, %576 : vector<8x1xf32>
    %cst_381 = arith.constant 2.82842708 : f32
    %581 = arith.mulf %471, %cst_381 : f32
    %582 = vector.broadcast %581 : f32 to vector<8x1xf32>
    %583 = arith.mulf %555, %582 : vector<8x1xf32>
    %584 = arith.addf %580, %583 : vector<8x1xf32>
    %c5 = arith.constant 5 : index
    %c0_382 = arith.constant 0 : index
    %c0_383 = arith.constant 0 : index
    %585 = vector.load %arg0[%c5, %c0_382, %c0_383] : memref<8x8x4xf32, #tpu.memory_space<vmem>>, vector<1x8x4xf32>
    %586 = vector.shape_cast %585 : vector<1x8x4xf32> to vector<8x4xf32>
    %c5_384 = arith.constant 5 : index
    %587 = memref.load %arg1[%c5_384] : memref<8xf32, #tpu.memory_space<smem>>
    %c0_385 = arith.constant 0 : index
    %c0_386 = arith.constant 0 : index
    %588 = vector.load %arg3[%c0_385, %c0_386] : memref<4x32xf32, #tpu.memory_space<vmem>>, vector<4x32xf32>
    %cst_387 = arith.constant dense<0.000000e+00> : vector<8x32xf32>
    %589 = tpu.matmul %566, %588, %cst_387 {dimension_numbers = #tpu.dot_dimension_numbers<[1], [0], [0], [1], [0, 0, 1, 1], [], []>} : vector<8x4xf32>, vector<4x32xf32>, vector<8x32xf32> -> vector<8x32xf32>
    %c0_388 = arith.constant 0 : index
    %c0_389 = arith.constant 0 : index
    %590 = vector.load %arg4[%c0_388, %c0_389] : memref<1x32xf32, #tpu.memory_space<vmem>>, vector<1x32xf32>
    %cst_390 = arith.constant 6.250000e-01 : f32
    %591 = vector.broadcast %cst_390 : f32 to vector<1x32xf32>
    %592 = arith.mulf %591, %590 : vector<1x32xf32>
    %593 = vector.broadcast %592 : vector<1x32xf32> to vector<8x32xf32>
    %594 = arith.addf %589, %593 : vector<8x32xf32>
    %c0_391 = arith.constant 0 : index
    %c0_392 = arith.constant 0 : index
    %595 = vector.load %arg5[%c0_391, %c0_392] : memref<1x32xf32, #tpu.memory_space<vmem>>, vector<1x32xf32>
    %596 = vector.broadcast %595 : vector<1x32xf32> to vector<8x32xf32>
    %597 = arith.addf %594, %596 : vector<8x32xf32>
    %cst_393 = arith.constant 0.000000e+00 : f32
    %598 = vector.broadcast %cst_393 : f32 to vector<8x32xf32>
    %599 = arith.maximumf %597, %598 : vector<8x32xf32>
    %c0_394 = arith.constant 0 : index
    %c0_395 = arith.constant 0 : index
    %c0_396 = arith.constant 0 : index
    %600 = vector.load %arg6[%c0_394, %c0_395, %c0_396] : memref<2x32x32xf32, #tpu.memory_space<vmem>>, vector<1x32x32xf32>
    %601 = vector.shape_cast %600 : vector<1x32x32xf32> to vector<32x32xf32>
    %cst_397 = arith.constant dense<0.000000e+00> : vector<8x32xf32>
    %602 = tpu.matmul %599, %601, %cst_397 {dimension_numbers = #tpu.dot_dimension_numbers<[1], [0], [0], [1], [0, 0, 1, 1], [], []>} : vector<8x32xf32>, vector<32x32xf32>, vector<8x32xf32> -> vector<8x32xf32>
    %c0_398 = arith.constant 0 : index
    %c0_399 = arith.constant 0 : index
    %c0_400 = arith.constant 0 : index
    %603 = vector.load %arg7[%c0_398, %c0_399, %c0_400] : memref<2x1x32xf32, #tpu.memory_space<vmem>>, vector<1x1x32xf32>
    %604 = vector.shape_cast %603 : vector<1x1x32xf32> to vector<1x32xf32>
    %605 = vector.broadcast %604 : vector<1x32xf32> to vector<8x32xf32>
    %606 = arith.addf %602, %605 : vector<8x32xf32>
    %cst_401 = arith.constant 0.000000e+00 : f32
    %607 = vector.broadcast %cst_401 : f32 to vector<8x32xf32>
    %608 = arith.maximumf %606, %607 : vector<8x32xf32>
    %c1_402 = arith.constant 1 : index
    %c0_403 = arith.constant 0 : index
    %c0_404 = arith.constant 0 : index
    %609 = vector.load %arg6[%c1_402, %c0_403, %c0_404] : memref<2x32x32xf32, #tpu.memory_space<vmem>>, vector<1x32x32xf32>
    %610 = vector.shape_cast %609 : vector<1x32x32xf32> to vector<32x32xf32>
    %cst_405 = arith.constant dense<0.000000e+00> : vector<8x32xf32>
    %611 = tpu.matmul %608, %610, %cst_405 {dimension_numbers = #tpu.dot_dimension_numbers<[1], [0], [0], [1], [0, 0, 1, 1], [], []>} : vector<8x32xf32>, vector<32x32xf32>, vector<8x32xf32> -> vector<8x32xf32>
    %c1_406 = arith.constant 1 : index
    %c0_407 = arith.constant 0 : index
    %c0_408 = arith.constant 0 : index
    %612 = vector.load %arg7[%c1_406, %c0_407, %c0_408] : memref<2x1x32xf32, #tpu.memory_space<vmem>>, vector<1x1x32xf32>
    %613 = vector.shape_cast %612 : vector<1x1x32xf32> to vector<1x32xf32>
    %614 = vector.broadcast %613 : vector<1x32xf32> to vector<8x32xf32>
    %615 = arith.addf %611, %614 : vector<8x32xf32>
    %cst_409 = arith.constant 0.000000e+00 : f32
    %616 = vector.broadcast %cst_409 : f32 to vector<8x32xf32>
    %617 = arith.maximumf %615, %616 : vector<8x32xf32>
    %c0_410 = arith.constant 0 : index
    %c0_411 = arith.constant 0 : index
    %618 = vector.load %arg8[%c0_410, %c0_411] : memref<32x4xf32, #tpu.memory_space<vmem>>, vector<32x4xf32>
    %cst_412 = arith.constant dense<0.000000e+00> : vector<8x4xf32>
    %619 = tpu.matmul %617, %618, %cst_412 {dimension_numbers = #tpu.dot_dimension_numbers<[1], [0], [0], [1], [0, 0, 1, 1], [], []>} : vector<8x32xf32>, vector<32x4xf32>, vector<8x4xf32> -> vector<8x4xf32>
    %c0_413 = arith.constant 0 : index
    %c0_414 = arith.constant 0 : index
    %620 = vector.load %arg9[%c0_413, %c0_414] : memref<1x4xf32, #tpu.memory_space<vmem>>, vector<1x4xf32>
    %621 = vector.broadcast %620 : vector<1x4xf32> to vector<8x4xf32>
    %622 = arith.addf %619, %621 : vector<8x4xf32>
    %623 = arith.mulf %586, %586 : vector<8x4xf32>
    %cst_415 = arith.constant 1.250000e-01 : f32
    %624 = vector.broadcast %cst_415 : f32 to vector<8x4xf32>
    %625 = arith.subf %623, %624 : vector<8x4xf32>
    %cst_416 = arith.constant 2.000000e-02 : f32
    %626 = vector.broadcast %cst_416 : f32 to vector<8x4xf32>
    %627 = arith.mulf %626, %625 : vector<8x4xf32>
    %cst_417 = arith.constant 1.41421354 : f32
    %628 = vector.broadcast %cst_417 : f32 to vector<8x4xf32>
    %629 = arith.mulf %628, %625 : vector<8x4xf32>
    %630 = vector.broadcast %587 : f32 to vector<8x4xf32>
    %631 = arith.mulf %629, %630 : vector<8x4xf32>
    %632 = arith.mulf %622, %631 : vector<8x4xf32>
    %633 = arith.addf %566, %632 : vector<8x4xf32>
    %c0_418 = arith.constant 0 : index
    %c0_419 = arith.constant 0 : index
    %634 = vector.load %arg3[%c0_418, %c0_419] : memref<4x32xf32, #tpu.memory_space<vmem>>, vector<4x32xf32>
    %cst_420 = arith.constant dense<0.000000e+00> : vector<8x32xf32>
    %635 = tpu.matmul %633, %634, %cst_420 {dimension_numbers = #tpu.dot_dimension_numbers<[1], [0], [0], [1], [0, 0, 1, 1], [], []>} : vector<8x4xf32>, vector<4x32xf32>, vector<8x32xf32> -> vector<8x32xf32>
    %c0_421 = arith.constant 0 : index
    %c0_422 = arith.constant 0 : index
    %636 = vector.load %arg4[%c0_421, %c0_422] : memref<1x32xf32, #tpu.memory_space<vmem>>, vector<1x32xf32>
    %cst_423 = arith.constant 6.250000e-01 : f32
    %637 = vector.broadcast %cst_423 : f32 to vector<1x32xf32>
    %638 = arith.mulf %637, %636 : vector<1x32xf32>
    %639 = vector.broadcast %638 : vector<1x32xf32> to vector<8x32xf32>
    %640 = arith.addf %635, %639 : vector<8x32xf32>
    %c0_424 = arith.constant 0 : index
    %c0_425 = arith.constant 0 : index
    %641 = vector.load %arg5[%c0_424, %c0_425] : memref<1x32xf32, #tpu.memory_space<vmem>>, vector<1x32xf32>
    %642 = vector.broadcast %641 : vector<1x32xf32> to vector<8x32xf32>
    %643 = arith.addf %640, %642 : vector<8x32xf32>
    %cst_426 = arith.constant 0.000000e+00 : f32
    %644 = vector.broadcast %cst_426 : f32 to vector<8x32xf32>
    %645 = arith.maximumf %643, %644 : vector<8x32xf32>
    %c0_427 = arith.constant 0 : index
    %c0_428 = arith.constant 0 : index
    %c0_429 = arith.constant 0 : index
    %646 = vector.load %arg6[%c0_427, %c0_428, %c0_429] : memref<2x32x32xf32, #tpu.memory_space<vmem>>, vector<1x32x32xf32>
    %647 = vector.shape_cast %646 : vector<1x32x32xf32> to vector<32x32xf32>
    %cst_430 = arith.constant dense<0.000000e+00> : vector<8x32xf32>
    %648 = tpu.matmul %645, %647, %cst_430 {dimension_numbers = #tpu.dot_dimension_numbers<[1], [0], [0], [1], [0, 0, 1, 1], [], []>} : vector<8x32xf32>, vector<32x32xf32>, vector<8x32xf32> -> vector<8x32xf32>
    %c0_431 = arith.constant 0 : index
    %c0_432 = arith.constant 0 : index
    %c0_433 = arith.constant 0 : index
    %649 = vector.load %arg7[%c0_431, %c0_432, %c0_433] : memref<2x1x32xf32, #tpu.memory_space<vmem>>, vector<1x1x32xf32>
    %650 = vector.shape_cast %649 : vector<1x1x32xf32> to vector<1x32xf32>
    %651 = vector.broadcast %650 : vector<1x32xf32> to vector<8x32xf32>
    %652 = arith.addf %648, %651 : vector<8x32xf32>
    %cst_434 = arith.constant 0.000000e+00 : f32
    %653 = vector.broadcast %cst_434 : f32 to vector<8x32xf32>
    %654 = arith.maximumf %652, %653 : vector<8x32xf32>
    %c1_435 = arith.constant 1 : index
    %c0_436 = arith.constant 0 : index
    %c0_437 = arith.constant 0 : index
    %655 = vector.load %arg6[%c1_435, %c0_436, %c0_437] : memref<2x32x32xf32, #tpu.memory_space<vmem>>, vector<1x32x32xf32>
    %656 = vector.shape_cast %655 : vector<1x32x32xf32> to vector<32x32xf32>
    %cst_438 = arith.constant dense<0.000000e+00> : vector<8x32xf32>
    %657 = tpu.matmul %654, %656, %cst_438 {dimension_numbers = #tpu.dot_dimension_numbers<[1], [0], [0], [1], [0, 0, 1, 1], [], []>} : vector<8x32xf32>, vector<32x32xf32>, vector<8x32xf32> -> vector<8x32xf32>
    %c1_439 = arith.constant 1 : index
    %c0_440 = arith.constant 0 : index
    %c0_441 = arith.constant 0 : index
    %658 = vector.load %arg7[%c1_439, %c0_440, %c0_441] : memref<2x1x32xf32, #tpu.memory_space<vmem>>, vector<1x1x32xf32>
    %659 = vector.shape_cast %658 : vector<1x1x32xf32> to vector<1x32xf32>
    %660 = vector.broadcast %659 : vector<1x32xf32> to vector<8x32xf32>
    %661 = arith.addf %657, %660 : vector<8x32xf32>
    %cst_442 = arith.constant 0.000000e+00 : f32
    %662 = vector.broadcast %cst_442 : f32 to vector<8x32xf32>
    %663 = arith.maximumf %661, %662 : vector<8x32xf32>
    %c0_443 = arith.constant 0 : index
    %c0_444 = arith.constant 0 : index
    %664 = vector.load %arg8[%c0_443, %c0_444] : memref<32x4xf32, #tpu.memory_space<vmem>>, vector<32x4xf32>
    %cst_445 = arith.constant dense<0.000000e+00> : vector<8x4xf32>
    %665 = tpu.matmul %663, %664, %cst_445 {dimension_numbers = #tpu.dot_dimension_numbers<[1], [0], [0], [1], [0, 0, 1, 1], [], []>} : vector<8x32xf32>, vector<32x4xf32>, vector<8x4xf32> -> vector<8x4xf32>
    %c0_446 = arith.constant 0 : index
    %c0_447 = arith.constant 0 : index
    %666 = vector.load %arg9[%c0_446, %c0_447] : memref<1x4xf32, #tpu.memory_space<vmem>>, vector<1x4xf32>
    %667 = vector.broadcast %666 : vector<1x4xf32> to vector<8x4xf32>
    %668 = arith.addf %665, %667 : vector<8x4xf32>
    %669 = arith.subf %668, %622 : vector<8x4xf32>
    %cst_448 = arith.constant dense<0.000000e+00> : vector<8xf32>
    %670 = vector.multi_reduction <add>, %669, %cst_448 [1] : vector<8x4xf32> to vector<8xf32>
    %671 = vector.shape_cast %670 : vector<8xf32> to vector<8x1xf32>
    %cst_449 = arith.constant 1.000000e-01 : f32
    %672 = vector.broadcast %cst_449 : f32 to vector<8x4xf32>
    %673 = arith.mulf %672, %566 : vector<8x4xf32>
    %cst_450 = arith.constant 1.250000e-01 : f32
    %674 = vector.broadcast %cst_450 : f32 to vector<8x4xf32>
    %675 = arith.mulf %673, %674 : vector<8x4xf32>
    %676 = arith.addf %566, %675 : vector<8x4xf32>
    %cst_451 = arith.constant 2.000000e-01 : f32
    %677 = vector.broadcast %cst_451 : f32 to vector<8x4xf32>
    %678 = arith.mulf %677, %566 : vector<8x4xf32>
    %679 = arith.mulf %678, %586 : vector<8x4xf32>
    %680 = arith.addf %676, %679 : vector<8x4xf32>
    %681 = arith.mulf %627, %566 : vector<8x4xf32>
    %682 = arith.addf %680, %681 : vector<8x4xf32>
    %cst_452 = arith.constant 5.000000e-02 : f32
    %683 = vector.broadcast %cst_452 : f32 to vector<8x1xf32>
    %684 = arith.mulf %683, %584 : vector<8x1xf32>
    %cst_453 = arith.constant dense<0.000000e+00> : vector<8xf32>
    %685 = vector.multi_reduction <add>, %622, %cst_453 [1] : vector<8x4xf32> to vector<8xf32>
    %686 = vector.shape_cast %685 : vector<8xf32> to vector<8x1xf32>
    %cst_454 = arith.constant 0.00999999977 : f32
    %687 = vector.broadcast %cst_454 : f32 to vector<8x1xf32>
    %688 = arith.mulf %687, %686 : vector<8x1xf32>
    %689 = arith.addf %684, %688 : vector<8x1xf32>
    %690 = arith.mulf %622, %586 : vector<8x4xf32>
    %cst_455 = arith.constant dense<0.000000e+00> : vector<8xf32>
    %691 = vector.multi_reduction <add>, %690, %cst_455 [1] : vector<8x4xf32> to vector<8xf32>
    %692 = vector.shape_cast %691 : vector<8xf32> to vector<8x1xf32>
    %cst_456 = arith.constant 1.250000e-01 : f32
    %693 = vector.broadcast %cst_456 : f32 to vector<8x1xf32>
    %694 = arith.mulf %689, %693 : vector<8x1xf32>
    %695 = arith.subf %584, %694 : vector<8x1xf32>
    %696 = arith.addf %695, %692 : vector<8x1xf32>
    %cst_457 = arith.constant 2.82842708 : f32
    %697 = arith.mulf %587, %cst_457 : f32
    %698 = vector.broadcast %697 : f32 to vector<8x1xf32>
    %699 = arith.mulf %671, %698 : vector<8x1xf32>
    %700 = arith.addf %696, %699 : vector<8x1xf32>
    %c6 = arith.constant 6 : index
    %c0_458 = arith.constant 0 : index
    %c0_459 = arith.constant 0 : index
    %701 = vector.load %arg0[%c6, %c0_458, %c0_459] : memref<8x8x4xf32, #tpu.memory_space<vmem>>, vector<1x8x4xf32>
    %702 = vector.shape_cast %701 : vector<1x8x4xf32> to vector<8x4xf32>
    %c6_460 = arith.constant 6 : index
    %703 = memref.load %arg1[%c6_460] : memref<8xf32, #tpu.memory_space<smem>>
    %c0_461 = arith.constant 0 : index
    %c0_462 = arith.constant 0 : index
    %704 = vector.load %arg3[%c0_461, %c0_462] : memref<4x32xf32, #tpu.memory_space<vmem>>, vector<4x32xf32>
    %cst_463 = arith.constant dense<0.000000e+00> : vector<8x32xf32>
    %705 = tpu.matmul %682, %704, %cst_463 {dimension_numbers = #tpu.dot_dimension_numbers<[1], [0], [0], [1], [0, 0, 1, 1], [], []>} : vector<8x4xf32>, vector<4x32xf32>, vector<8x32xf32> -> vector<8x32xf32>
    %c0_464 = arith.constant 0 : index
    %c0_465 = arith.constant 0 : index
    %706 = vector.load %arg4[%c0_464, %c0_465] : memref<1x32xf32, #tpu.memory_space<vmem>>, vector<1x32xf32>
    %cst_466 = arith.constant 7.500000e-01 : f32
    %707 = vector.broadcast %cst_466 : f32 to vector<1x32xf32>
    %708 = arith.mulf %707, %706 : vector<1x32xf32>
    %709 = vector.broadcast %708 : vector<1x32xf32> to vector<8x32xf32>
    %710 = arith.addf %705, %709 : vector<8x32xf32>
    %c0_467 = arith.constant 0 : index
    %c0_468 = arith.constant 0 : index
    %711 = vector.load %arg5[%c0_467, %c0_468] : memref<1x32xf32, #tpu.memory_space<vmem>>, vector<1x32xf32>
    %712 = vector.broadcast %711 : vector<1x32xf32> to vector<8x32xf32>
    %713 = arith.addf %710, %712 : vector<8x32xf32>
    %cst_469 = arith.constant 0.000000e+00 : f32
    %714 = vector.broadcast %cst_469 : f32 to vector<8x32xf32>
    %715 = arith.maximumf %713, %714 : vector<8x32xf32>
    %c0_470 = arith.constant 0 : index
    %c0_471 = arith.constant 0 : index
    %c0_472 = arith.constant 0 : index
    %716 = vector.load %arg6[%c0_470, %c0_471, %c0_472] : memref<2x32x32xf32, #tpu.memory_space<vmem>>, vector<1x32x32xf32>
    %717 = vector.shape_cast %716 : vector<1x32x32xf32> to vector<32x32xf32>
    %cst_473 = arith.constant dense<0.000000e+00> : vector<8x32xf32>
    %718 = tpu.matmul %715, %717, %cst_473 {dimension_numbers = #tpu.dot_dimension_numbers<[1], [0], [0], [1], [0, 0, 1, 1], [], []>} : vector<8x32xf32>, vector<32x32xf32>, vector<8x32xf32> -> vector<8x32xf32>
    %c0_474 = arith.constant 0 : index
    %c0_475 = arith.constant 0 : index
    %c0_476 = arith.constant 0 : index
    %719 = vector.load %arg7[%c0_474, %c0_475, %c0_476] : memref<2x1x32xf32, #tpu.memory_space<vmem>>, vector<1x1x32xf32>
    %720 = vector.shape_cast %719 : vector<1x1x32xf32> to vector<1x32xf32>
    %721 = vector.broadcast %720 : vector<1x32xf32> to vector<8x32xf32>
    %722 = arith.addf %718, %721 : vector<8x32xf32>
    %cst_477 = arith.constant 0.000000e+00 : f32
    %723 = vector.broadcast %cst_477 : f32 to vector<8x32xf32>
    %724 = arith.maximumf %722, %723 : vector<8x32xf32>
    %c1_478 = arith.constant 1 : index
    %c0_479 = arith.constant 0 : index
    %c0_480 = arith.constant 0 : index
    %725 = vector.load %arg6[%c1_478, %c0_479, %c0_480] : memref<2x32x32xf32, #tpu.memory_space<vmem>>, vector<1x32x32xf32>
    %726 = vector.shape_cast %725 : vector<1x32x32xf32> to vector<32x32xf32>
    %cst_481 = arith.constant dense<0.000000e+00> : vector<8x32xf32>
    %727 = tpu.matmul %724, %726, %cst_481 {dimension_numbers = #tpu.dot_dimension_numbers<[1], [0], [0], [1], [0, 0, 1, 1], [], []>} : vector<8x32xf32>, vector<32x32xf32>, vector<8x32xf32> -> vector<8x32xf32>
    %c1_482 = arith.constant 1 : index
    %c0_483 = arith.constant 0 : index
    %c0_484 = arith.constant 0 : index
    %728 = vector.load %arg7[%c1_482, %c0_483, %c0_484] : memref<2x1x32xf32, #tpu.memory_space<vmem>>, vector<1x1x32xf32>
    %729 = vector.shape_cast %728 : vector<1x1x32xf32> to vector<1x32xf32>
    %730 = vector.broadcast %729 : vector<1x32xf32> to vector<8x32xf32>
    %731 = arith.addf %727, %730 : vector<8x32xf32>
    %cst_485 = arith.constant 0.000000e+00 : f32
    %732 = vector.broadcast %cst_485 : f32 to vector<8x32xf32>
    %733 = arith.maximumf %731, %732 : vector<8x32xf32>
    %c0_486 = arith.constant 0 : index
    %c0_487 = arith.constant 0 : index
    %734 = vector.load %arg8[%c0_486, %c0_487] : memref<32x4xf32, #tpu.memory_space<vmem>>, vector<32x4xf32>
    %cst_488 = arith.constant dense<0.000000e+00> : vector<8x4xf32>
    %735 = tpu.matmul %733, %734, %cst_488 {dimension_numbers = #tpu.dot_dimension_numbers<[1], [0], [0], [1], [0, 0, 1, 1], [], []>} : vector<8x32xf32>, vector<32x4xf32>, vector<8x4xf32> -> vector<8x4xf32>
    %c0_489 = arith.constant 0 : index
    %c0_490 = arith.constant 0 : index
    %736 = vector.load %arg9[%c0_489, %c0_490] : memref<1x4xf32, #tpu.memory_space<vmem>>, vector<1x4xf32>
    %737 = vector.broadcast %736 : vector<1x4xf32> to vector<8x4xf32>
    %738 = arith.addf %735, %737 : vector<8x4xf32>
    %739 = arith.mulf %702, %702 : vector<8x4xf32>
    %cst_491 = arith.constant 1.250000e-01 : f32
    %740 = vector.broadcast %cst_491 : f32 to vector<8x4xf32>
    %741 = arith.subf %739, %740 : vector<8x4xf32>
    %cst_492 = arith.constant 2.000000e-02 : f32
    %742 = vector.broadcast %cst_492 : f32 to vector<8x4xf32>
    %743 = arith.mulf %742, %741 : vector<8x4xf32>
    %cst_493 = arith.constant 1.41421354 : f32
    %744 = vector.broadcast %cst_493 : f32 to vector<8x4xf32>
    %745 = arith.mulf %744, %741 : vector<8x4xf32>
    %746 = vector.broadcast %703 : f32 to vector<8x4xf32>
    %747 = arith.mulf %745, %746 : vector<8x4xf32>
    %748 = arith.mulf %738, %747 : vector<8x4xf32>
    %749 = arith.addf %682, %748 : vector<8x4xf32>
    %c0_494 = arith.constant 0 : index
    %c0_495 = arith.constant 0 : index
    %750 = vector.load %arg3[%c0_494, %c0_495] : memref<4x32xf32, #tpu.memory_space<vmem>>, vector<4x32xf32>
    %cst_496 = arith.constant dense<0.000000e+00> : vector<8x32xf32>
    %751 = tpu.matmul %749, %750, %cst_496 {dimension_numbers = #tpu.dot_dimension_numbers<[1], [0], [0], [1], [0, 0, 1, 1], [], []>} : vector<8x4xf32>, vector<4x32xf32>, vector<8x32xf32> -> vector<8x32xf32>
    %c0_497 = arith.constant 0 : index
    %c0_498 = arith.constant 0 : index
    %752 = vector.load %arg4[%c0_497, %c0_498] : memref<1x32xf32, #tpu.memory_space<vmem>>, vector<1x32xf32>
    %cst_499 = arith.constant 7.500000e-01 : f32
    %753 = vector.broadcast %cst_499 : f32 to vector<1x32xf32>
    %754 = arith.mulf %753, %752 : vector<1x32xf32>
    %755 = vector.broadcast %754 : vector<1x32xf32> to vector<8x32xf32>
    %756 = arith.addf %751, %755 : vector<8x32xf32>
    %c0_500 = arith.constant 0 : index
    %c0_501 = arith.constant 0 : index
    %757 = vector.load %arg5[%c0_500, %c0_501] : memref<1x32xf32, #tpu.memory_space<vmem>>, vector<1x32xf32>
    %758 = vector.broadcast %757 : vector<1x32xf32> to vector<8x32xf32>
    %759 = arith.addf %756, %758 : vector<8x32xf32>
    %cst_502 = arith.constant 0.000000e+00 : f32
    %760 = vector.broadcast %cst_502 : f32 to vector<8x32xf32>
    %761 = arith.maximumf %759, %760 : vector<8x32xf32>
    %c0_503 = arith.constant 0 : index
    %c0_504 = arith.constant 0 : index
    %c0_505 = arith.constant 0 : index
    %762 = vector.load %arg6[%c0_503, %c0_504, %c0_505] : memref<2x32x32xf32, #tpu.memory_space<vmem>>, vector<1x32x32xf32>
    %763 = vector.shape_cast %762 : vector<1x32x32xf32> to vector<32x32xf32>
    %cst_506 = arith.constant dense<0.000000e+00> : vector<8x32xf32>
    %764 = tpu.matmul %761, %763, %cst_506 {dimension_numbers = #tpu.dot_dimension_numbers<[1], [0], [0], [1], [0, 0, 1, 1], [], []>} : vector<8x32xf32>, vector<32x32xf32>, vector<8x32xf32> -> vector<8x32xf32>
    %c0_507 = arith.constant 0 : index
    %c0_508 = arith.constant 0 : index
    %c0_509 = arith.constant 0 : index
    %765 = vector.load %arg7[%c0_507, %c0_508, %c0_509] : memref<2x1x32xf32, #tpu.memory_space<vmem>>, vector<1x1x32xf32>
    %766 = vector.shape_cast %765 : vector<1x1x32xf32> to vector<1x32xf32>
    %767 = vector.broadcast %766 : vector<1x32xf32> to vector<8x32xf32>
    %768 = arith.addf %764, %767 : vector<8x32xf32>
    %cst_510 = arith.constant 0.000000e+00 : f32
    %769 = vector.broadcast %cst_510 : f32 to vector<8x32xf32>
    %770 = arith.maximumf %768, %769 : vector<8x32xf32>
    %c1_511 = arith.constant 1 : index
    %c0_512 = arith.constant 0 : index
    %c0_513 = arith.constant 0 : index
    %771 = vector.load %arg6[%c1_511, %c0_512, %c0_513] : memref<2x32x32xf32, #tpu.memory_space<vmem>>, vector<1x32x32xf32>
    %772 = vector.shape_cast %771 : vector<1x32x32xf32> to vector<32x32xf32>
    %cst_514 = arith.constant dense<0.000000e+00> : vector<8x32xf32>
    %773 = tpu.matmul %770, %772, %cst_514 {dimension_numbers = #tpu.dot_dimension_numbers<[1], [0], [0], [1], [0, 0, 1, 1], [], []>} : vector<8x32xf32>, vector<32x32xf32>, vector<8x32xf32> -> vector<8x32xf32>
    %c1_515 = arith.constant 1 : index
    %c0_516 = arith.constant 0 : index
    %c0_517 = arith.constant 0 : index
    %774 = vector.load %arg7[%c1_515, %c0_516, %c0_517] : memref<2x1x32xf32, #tpu.memory_space<vmem>>, vector<1x1x32xf32>
    %775 = vector.shape_cast %774 : vector<1x1x32xf32> to vector<1x32xf32>
    %776 = vector.broadcast %775 : vector<1x32xf32> to vector<8x32xf32>
    %777 = arith.addf %773, %776 : vector<8x32xf32>
    %cst_518 = arith.constant 0.000000e+00 : f32
    %778 = vector.broadcast %cst_518 : f32 to vector<8x32xf32>
    %779 = arith.maximumf %777, %778 : vector<8x32xf32>
    %c0_519 = arith.constant 0 : index
    %c0_520 = arith.constant 0 : index
    %780 = vector.load %arg8[%c0_519, %c0_520] : memref<32x4xf32, #tpu.memory_space<vmem>>, vector<32x4xf32>
    %cst_521 = arith.constant dense<0.000000e+00> : vector<8x4xf32>
    %781 = tpu.matmul %779, %780, %cst_521 {dimension_numbers = #tpu.dot_dimension_numbers<[1], [0], [0], [1], [0, 0, 1, 1], [], []>} : vector<8x32xf32>, vector<32x4xf32>, vector<8x4xf32> -> vector<8x4xf32>
    %c0_522 = arith.constant 0 : index
    %c0_523 = arith.constant 0 : index
    %782 = vector.load %arg9[%c0_522, %c0_523] : memref<1x4xf32, #tpu.memory_space<vmem>>, vector<1x4xf32>
    %783 = vector.broadcast %782 : vector<1x4xf32> to vector<8x4xf32>
    %784 = arith.addf %781, %783 : vector<8x4xf32>
    %785 = arith.subf %784, %738 : vector<8x4xf32>
    %cst_524 = arith.constant dense<0.000000e+00> : vector<8xf32>
    %786 = vector.multi_reduction <add>, %785, %cst_524 [1] : vector<8x4xf32> to vector<8xf32>
    %787 = vector.shape_cast %786 : vector<8xf32> to vector<8x1xf32>
    %cst_525 = arith.constant 1.000000e-01 : f32
    %788 = vector.broadcast %cst_525 : f32 to vector<8x4xf32>
    %789 = arith.mulf %788, %682 : vector<8x4xf32>
    %cst_526 = arith.constant 1.250000e-01 : f32
    %790 = vector.broadcast %cst_526 : f32 to vector<8x4xf32>
    %791 = arith.mulf %789, %790 : vector<8x4xf32>
    %792 = arith.addf %682, %791 : vector<8x4xf32>
    %cst_527 = arith.constant 2.000000e-01 : f32
    %793 = vector.broadcast %cst_527 : f32 to vector<8x4xf32>
    %794 = arith.mulf %793, %682 : vector<8x4xf32>
    %795 = arith.mulf %794, %702 : vector<8x4xf32>
    %796 = arith.addf %792, %795 : vector<8x4xf32>
    %797 = arith.mulf %743, %682 : vector<8x4xf32>
    %798 = arith.addf %796, %797 : vector<8x4xf32>
    %cst_528 = arith.constant 5.000000e-02 : f32
    %799 = vector.broadcast %cst_528 : f32 to vector<8x1xf32>
    %800 = arith.mulf %799, %700 : vector<8x1xf32>
    %cst_529 = arith.constant dense<0.000000e+00> : vector<8xf32>
    %801 = vector.multi_reduction <add>, %738, %cst_529 [1] : vector<8x4xf32> to vector<8xf32>
    %802 = vector.shape_cast %801 : vector<8xf32> to vector<8x1xf32>
    %cst_530 = arith.constant 0.00999999977 : f32
    %803 = vector.broadcast %cst_530 : f32 to vector<8x1xf32>
    %804 = arith.mulf %803, %802 : vector<8x1xf32>
    %805 = arith.addf %800, %804 : vector<8x1xf32>
    %806 = arith.mulf %738, %702 : vector<8x4xf32>
    %cst_531 = arith.constant dense<0.000000e+00> : vector<8xf32>
    %807 = vector.multi_reduction <add>, %806, %cst_531 [1] : vector<8x4xf32> to vector<8xf32>
    %808 = vector.shape_cast %807 : vector<8xf32> to vector<8x1xf32>
    %cst_532 = arith.constant 1.250000e-01 : f32
    %809 = vector.broadcast %cst_532 : f32 to vector<8x1xf32>
    %810 = arith.mulf %805, %809 : vector<8x1xf32>
    %811 = arith.subf %700, %810 : vector<8x1xf32>
    %812 = arith.addf %811, %808 : vector<8x1xf32>
    %cst_533 = arith.constant 2.82842708 : f32
    %813 = arith.mulf %703, %cst_533 : f32
    %814 = vector.broadcast %813 : f32 to vector<8x1xf32>
    %815 = arith.mulf %787, %814 : vector<8x1xf32>
    %816 = arith.addf %812, %815 : vector<8x1xf32>
    %c7 = arith.constant 7 : index
    %c0_534 = arith.constant 0 : index
    %c0_535 = arith.constant 0 : index
    %817 = vector.load %arg0[%c7, %c0_534, %c0_535] : memref<8x8x4xf32, #tpu.memory_space<vmem>>, vector<1x8x4xf32>
    %818 = vector.shape_cast %817 : vector<1x8x4xf32> to vector<8x4xf32>
    %c7_536 = arith.constant 7 : index
    %819 = memref.load %arg1[%c7_536] : memref<8xf32, #tpu.memory_space<smem>>
    %c0_537 = arith.constant 0 : index
    %c0_538 = arith.constant 0 : index
    %820 = vector.load %arg3[%c0_537, %c0_538] : memref<4x32xf32, #tpu.memory_space<vmem>>, vector<4x32xf32>
    %cst_539 = arith.constant dense<0.000000e+00> : vector<8x32xf32>
    %821 = tpu.matmul %798, %820, %cst_539 {dimension_numbers = #tpu.dot_dimension_numbers<[1], [0], [0], [1], [0, 0, 1, 1], [], []>} : vector<8x4xf32>, vector<4x32xf32>, vector<8x32xf32> -> vector<8x32xf32>
    %c0_540 = arith.constant 0 : index
    %c0_541 = arith.constant 0 : index
    %822 = vector.load %arg4[%c0_540, %c0_541] : memref<1x32xf32, #tpu.memory_space<vmem>>, vector<1x32xf32>
    %cst_542 = arith.constant 8.750000e-01 : f32
    %823 = vector.broadcast %cst_542 : f32 to vector<1x32xf32>
    %824 = arith.mulf %823, %822 : vector<1x32xf32>
    %825 = vector.broadcast %824 : vector<1x32xf32> to vector<8x32xf32>
    %826 = arith.addf %821, %825 : vector<8x32xf32>
    %c0_543 = arith.constant 0 : index
    %c0_544 = arith.constant 0 : index
    %827 = vector.load %arg5[%c0_543, %c0_544] : memref<1x32xf32, #tpu.memory_space<vmem>>, vector<1x32xf32>
    %828 = vector.broadcast %827 : vector<1x32xf32> to vector<8x32xf32>
    %829 = arith.addf %826, %828 : vector<8x32xf32>
    %cst_545 = arith.constant 0.000000e+00 : f32
    %830 = vector.broadcast %cst_545 : f32 to vector<8x32xf32>
    %831 = arith.maximumf %829, %830 : vector<8x32xf32>
    %c0_546 = arith.constant 0 : index
    %c0_547 = arith.constant 0 : index
    %c0_548 = arith.constant 0 : index
    %832 = vector.load %arg6[%c0_546, %c0_547, %c0_548] : memref<2x32x32xf32, #tpu.memory_space<vmem>>, vector<1x32x32xf32>
    %833 = vector.shape_cast %832 : vector<1x32x32xf32> to vector<32x32xf32>
    %cst_549 = arith.constant dense<0.000000e+00> : vector<8x32xf32>
    %834 = tpu.matmul %831, %833, %cst_549 {dimension_numbers = #tpu.dot_dimension_numbers<[1], [0], [0], [1], [0, 0, 1, 1], [], []>} : vector<8x32xf32>, vector<32x32xf32>, vector<8x32xf32> -> vector<8x32xf32>
    %c0_550 = arith.constant 0 : index
    %c0_551 = arith.constant 0 : index
    %c0_552 = arith.constant 0 : index
    %835 = vector.load %arg7[%c0_550, %c0_551, %c0_552] : memref<2x1x32xf32, #tpu.memory_space<vmem>>, vector<1x1x32xf32>
    %836 = vector.shape_cast %835 : vector<1x1x32xf32> to vector<1x32xf32>
    %837 = vector.broadcast %836 : vector<1x32xf32> to vector<8x32xf32>
    %838 = arith.addf %834, %837 : vector<8x32xf32>
    %cst_553 = arith.constant 0.000000e+00 : f32
    %839 = vector.broadcast %cst_553 : f32 to vector<8x32xf32>
    %840 = arith.maximumf %838, %839 : vector<8x32xf32>
    %c1_554 = arith.constant 1 : index
    %c0_555 = arith.constant 0 : index
    %c0_556 = arith.constant 0 : index
    %841 = vector.load %arg6[%c1_554, %c0_555, %c0_556] : memref<2x32x32xf32, #tpu.memory_space<vmem>>, vector<1x32x32xf32>
    %842 = vector.shape_cast %841 : vector<1x32x32xf32> to vector<32x32xf32>
    %cst_557 = arith.constant dense<0.000000e+00> : vector<8x32xf32>
    %843 = tpu.matmul %840, %842, %cst_557 {dimension_numbers = #tpu.dot_dimension_numbers<[1], [0], [0], [1], [0, 0, 1, 1], [], []>} : vector<8x32xf32>, vector<32x32xf32>, vector<8x32xf32> -> vector<8x32xf32>
    %c1_558 = arith.constant 1 : index
    %c0_559 = arith.constant 0 : index
    %c0_560 = arith.constant 0 : index
    %844 = vector.load %arg7[%c1_558, %c0_559, %c0_560] : memref<2x1x32xf32, #tpu.memory_space<vmem>>, vector<1x1x32xf32>
    %845 = vector.shape_cast %844 : vector<1x1x32xf32> to vector<1x32xf32>
    %846 = vector.broadcast %845 : vector<1x32xf32> to vector<8x32xf32>
    %847 = arith.addf %843, %846 : vector<8x32xf32>
    %cst_561 = arith.constant 0.000000e+00 : f32
    %848 = vector.broadcast %cst_561 : f32 to vector<8x32xf32>
    %849 = arith.maximumf %847, %848 : vector<8x32xf32>
    %c0_562 = arith.constant 0 : index
    %c0_563 = arith.constant 0 : index
    %850 = vector.load %arg8[%c0_562, %c0_563] : memref<32x4xf32, #tpu.memory_space<vmem>>, vector<32x4xf32>
    %cst_564 = arith.constant dense<0.000000e+00> : vector<8x4xf32>
    %851 = tpu.matmul %849, %850, %cst_564 {dimension_numbers = #tpu.dot_dimension_numbers<[1], [0], [0], [1], [0, 0, 1, 1], [], []>} : vector<8x32xf32>, vector<32x4xf32>, vector<8x4xf32> -> vector<8x4xf32>
    %c0_565 = arith.constant 0 : index
    %c0_566 = arith.constant 0 : index
    %852 = vector.load %arg9[%c0_565, %c0_566] : memref<1x4xf32, #tpu.memory_space<vmem>>, vector<1x4xf32>
    %853 = vector.broadcast %852 : vector<1x4xf32> to vector<8x4xf32>
    %854 = arith.addf %851, %853 : vector<8x4xf32>
    %855 = arith.mulf %818, %818 : vector<8x4xf32>
    %cst_567 = arith.constant 1.250000e-01 : f32
    %856 = vector.broadcast %cst_567 : f32 to vector<8x4xf32>
    %857 = arith.subf %855, %856 : vector<8x4xf32>
    %cst_568 = arith.constant 2.000000e-02 : f32
    %858 = vector.broadcast %cst_568 : f32 to vector<8x4xf32>
    %859 = arith.mulf %858, %857 : vector<8x4xf32>
    %cst_569 = arith.constant 1.41421354 : f32
    %860 = vector.broadcast %cst_569 : f32 to vector<8x4xf32>
    %861 = arith.mulf %860, %857 : vector<8x4xf32>
    %862 = vector.broadcast %819 : f32 to vector<8x4xf32>
    %863 = arith.mulf %861, %862 : vector<8x4xf32>
    %864 = arith.mulf %854, %863 : vector<8x4xf32>
    %865 = arith.addf %798, %864 : vector<8x4xf32>
    %c0_570 = arith.constant 0 : index
    %c0_571 = arith.constant 0 : index
    %866 = vector.load %arg3[%c0_570, %c0_571] : memref<4x32xf32, #tpu.memory_space<vmem>>, vector<4x32xf32>
    %cst_572 = arith.constant dense<0.000000e+00> : vector<8x32xf32>
    %867 = tpu.matmul %865, %866, %cst_572 {dimension_numbers = #tpu.dot_dimension_numbers<[1], [0], [0], [1], [0, 0, 1, 1], [], []>} : vector<8x4xf32>, vector<4x32xf32>, vector<8x32xf32> -> vector<8x32xf32>
    %c0_573 = arith.constant 0 : index
    %c0_574 = arith.constant 0 : index
    %868 = vector.load %arg4[%c0_573, %c0_574] : memref<1x32xf32, #tpu.memory_space<vmem>>, vector<1x32xf32>
    %cst_575 = arith.constant 8.750000e-01 : f32
    %869 = vector.broadcast %cst_575 : f32 to vector<1x32xf32>
    %870 = arith.mulf %869, %868 : vector<1x32xf32>
    %871 = vector.broadcast %870 : vector<1x32xf32> to vector<8x32xf32>
    %872 = arith.addf %867, %871 : vector<8x32xf32>
    %c0_576 = arith.constant 0 : index
    %c0_577 = arith.constant 0 : index
    %873 = vector.load %arg5[%c0_576, %c0_577] : memref<1x32xf32, #tpu.memory_space<vmem>>, vector<1x32xf32>
    %874 = vector.broadcast %873 : vector<1x32xf32> to vector<8x32xf32>
    %875 = arith.addf %872, %874 : vector<8x32xf32>
    %cst_578 = arith.constant 0.000000e+00 : f32
    %876 = vector.broadcast %cst_578 : f32 to vector<8x32xf32>
    %877 = arith.maximumf %875, %876 : vector<8x32xf32>
    %c0_579 = arith.constant 0 : index
    %c0_580 = arith.constant 0 : index
    %c0_581 = arith.constant 0 : index
    %878 = vector.load %arg6[%c0_579, %c0_580, %c0_581] : memref<2x32x32xf32, #tpu.memory_space<vmem>>, vector<1x32x32xf32>
    %879 = vector.shape_cast %878 : vector<1x32x32xf32> to vector<32x32xf32>
    %cst_582 = arith.constant dense<0.000000e+00> : vector<8x32xf32>
    %880 = tpu.matmul %877, %879, %cst_582 {dimension_numbers = #tpu.dot_dimension_numbers<[1], [0], [0], [1], [0, 0, 1, 1], [], []>} : vector<8x32xf32>, vector<32x32xf32>, vector<8x32xf32> -> vector<8x32xf32>
    %c0_583 = arith.constant 0 : index
    %c0_584 = arith.constant 0 : index
    %c0_585 = arith.constant 0 : index
    %881 = vector.load %arg7[%c0_583, %c0_584, %c0_585] : memref<2x1x32xf32, #tpu.memory_space<vmem>>, vector<1x1x32xf32>
    %882 = vector.shape_cast %881 : vector<1x1x32xf32> to vector<1x32xf32>
    %883 = vector.broadcast %882 : vector<1x32xf32> to vector<8x32xf32>
    %884 = arith.addf %880, %883 : vector<8x32xf32>
    %cst_586 = arith.constant 0.000000e+00 : f32
    %885 = vector.broadcast %cst_586 : f32 to vector<8x32xf32>
    %886 = arith.maximumf %884, %885 : vector<8x32xf32>
    %c1_587 = arith.constant 1 : index
    %c0_588 = arith.constant 0 : index
    %c0_589 = arith.constant 0 : index
    %887 = vector.load %arg6[%c1_587, %c0_588, %c0_589] : memref<2x32x32xf32, #tpu.memory_space<vmem>>, vector<1x32x32xf32>
    %888 = vector.shape_cast %887 : vector<1x32x32xf32> to vector<32x32xf32>
    %cst_590 = arith.constant dense<0.000000e+00> : vector<8x32xf32>
    %889 = tpu.matmul %886, %888, %cst_590 {dimension_numbers = #tpu.dot_dimension_numbers<[1], [0], [0], [1], [0, 0, 1, 1], [], []>} : vector<8x32xf32>, vector<32x32xf32>, vector<8x32xf32> -> vector<8x32xf32>
    %c1_591 = arith.constant 1 : index
    %c0_592 = arith.constant 0 : index
    %c0_593 = arith.constant 0 : index
    %890 = vector.load %arg7[%c1_591, %c0_592, %c0_593] : memref<2x1x32xf32, #tpu.memory_space<vmem>>, vector<1x1x32xf32>
    %891 = vector.shape_cast %890 : vector<1x1x32xf32> to vector<1x32xf32>
    %892 = vector.broadcast %891 : vector<1x32xf32> to vector<8x32xf32>
    %893 = arith.addf %889, %892 : vector<8x32xf32>
    %cst_594 = arith.constant 0.000000e+00 : f32
    %894 = vector.broadcast %cst_594 : f32 to vector<8x32xf32>
    %895 = arith.maximumf %893, %894 : vector<8x32xf32>
    %c0_595 = arith.constant 0 : index
    %c0_596 = arith.constant 0 : index
    %896 = vector.load %arg8[%c0_595, %c0_596] : memref<32x4xf32, #tpu.memory_space<vmem>>, vector<32x4xf32>
    %cst_597 = arith.constant dense<0.000000e+00> : vector<8x4xf32>
    %897 = tpu.matmul %895, %896, %cst_597 {dimension_numbers = #tpu.dot_dimension_numbers<[1], [0], [0], [1], [0, 0, 1, 1], [], []>} : vector<8x32xf32>, vector<32x4xf32>, vector<8x4xf32> -> vector<8x4xf32>
    %c0_598 = arith.constant 0 : index
    %c0_599 = arith.constant 0 : index
    %898 = vector.load %arg9[%c0_598, %c0_599] : memref<1x4xf32, #tpu.memory_space<vmem>>, vector<1x4xf32>
    %899 = vector.broadcast %898 : vector<1x4xf32> to vector<8x4xf32>
    %900 = arith.addf %897, %899 : vector<8x4xf32>
    %901 = arith.subf %900, %854 : vector<8x4xf32>
    %cst_600 = arith.constant dense<0.000000e+00> : vector<8xf32>
    %902 = vector.multi_reduction <add>, %901, %cst_600 [1] : vector<8x4xf32> to vector<8xf32>
    %903 = vector.shape_cast %902 : vector<8xf32> to vector<8x1xf32>
    %cst_601 = arith.constant 1.000000e-01 : f32
    %904 = vector.broadcast %cst_601 : f32 to vector<8x4xf32>
    %905 = arith.mulf %904, %798 : vector<8x4xf32>
    %cst_602 = arith.constant 1.250000e-01 : f32
    %906 = vector.broadcast %cst_602 : f32 to vector<8x4xf32>
    %907 = arith.mulf %905, %906 : vector<8x4xf32>
    %908 = arith.addf %798, %907 : vector<8x4xf32>
    %cst_603 = arith.constant 2.000000e-01 : f32
    %909 = vector.broadcast %cst_603 : f32 to vector<8x4xf32>
    %910 = arith.mulf %909, %798 : vector<8x4xf32>
    %911 = arith.mulf %910, %818 : vector<8x4xf32>
    %912 = arith.addf %908, %911 : vector<8x4xf32>
    %913 = arith.mulf %859, %798 : vector<8x4xf32>
    %914 = arith.addf %912, %913 : vector<8x4xf32>
    %cst_604 = arith.constant 5.000000e-02 : f32
    %915 = vector.broadcast %cst_604 : f32 to vector<8x1xf32>
    %916 = arith.mulf %915, %816 : vector<8x1xf32>
    %cst_605 = arith.constant dense<0.000000e+00> : vector<8xf32>
    %917 = vector.multi_reduction <add>, %854, %cst_605 [1] : vector<8x4xf32> to vector<8xf32>
    %918 = vector.shape_cast %917 : vector<8xf32> to vector<8x1xf32>
    %cst_606 = arith.constant 0.00999999977 : f32
    %919 = vector.broadcast %cst_606 : f32 to vector<8x1xf32>
    %920 = arith.mulf %919, %918 : vector<8x1xf32>
    %921 = arith.addf %916, %920 : vector<8x1xf32>
    %922 = arith.mulf %854, %818 : vector<8x4xf32>
    %cst_607 = arith.constant dense<0.000000e+00> : vector<8xf32>
    %923 = vector.multi_reduction <add>, %922, %cst_607 [1] : vector<8x4xf32> to vector<8xf32>
    %924 = vector.shape_cast %923 : vector<8xf32> to vector<8x1xf32>
    %cst_608 = arith.constant 1.250000e-01 : f32
    %925 = vector.broadcast %cst_608 : f32 to vector<8x1xf32>
    %926 = arith.mulf %921, %925 : vector<8x1xf32>
    %927 = arith.subf %816, %926 : vector<8x1xf32>
    %928 = arith.addf %927, %924 : vector<8x1xf32>
    %cst_609 = arith.constant 2.82842708 : f32
    %929 = arith.mulf %819, %cst_609 : f32
    %930 = vector.broadcast %929 : f32 to vector<8x1xf32>
    %931 = arith.mulf %903, %930 : vector<8x1xf32>
    %932 = arith.addf %928, %931 : vector<8x1xf32>
    %c0_610 = arith.constant 0 : index
    %c0_611 = arith.constant 0 : index
    %933 = vector.load %arg10[%c0_610, %c0_611] : memref<8x4xf32, #tpu.memory_space<vmem>>, vector<8x4xf32>
    tpu.vector_store %arg10[%c0_610, %c0_611], %914 {strides = array<i32>} : memref<8x4xf32, #tpu.memory_space<vmem>>, vector<8x4xf32>,
    %c0_612 = arith.constant 0 : index
    %c0_613 = arith.constant 0 : index
    %934 = vector.load %arg11[%c0_612, %c0_613] : memref<8x1xf32, #tpu.memory_space<vmem>>, vector<8x1xf32>
    tpu.vector_store %arg11[%c0_612, %c0_613], %932 {strides = array<i32>} : memref<8x1xf32, #tpu.memory_space<vmem>>, vector<8x1xf32>,
    return
  }
}

</mosaic_0001>

<bundles_post_ra>
// kernel: forward.1
= control target key start
LH: loop header
LB: loop body
LE: loop exit
PB: predicated region body
PF: predicated region fallthrough
CT: control target
= control target key end

     0   :  { %18 = vsyncpa [#allocation4], 0  ;;  %s2131_s20 = smov [#allocation3]   ;;  %s2978_s0 = inlined_call_operand.vmem [shape: f32[8,8,4], index: 0, kind: input, shape index: {}]   ;;  %s2979_s1 = inlined_call_operand.vmem [shape: f32[8], index: 1, kind: input, shape index: {}]   ;;  %s2980_s2 = inlined_call_operand.<no memory space> [shape: f32[1], index: 2, kind: input, shape index: {}]   ;;  %s2981_s3 = inlined_call_operand.vmem [shape: f32[4,32], index: 3, kind: input, shape index: {}]   ;;  %s2982_s4 = inlined_call_operand.vmem [shape: f32[1,32], index: 4, kind: input, shape index: {}]   ;;  %s2983_s5 = inlined_call_operand.vmem [shape: f32[1,32], index: 5, kind: input, shape index: {}]   ;;  %s2984_s6 = inlined_call_operand.vmem [shape: f32[2,32,32], index: 6, kind: input, shape index: {}]   ;;  %s2985_s7 = inlined_call_operand.vmem [shape: f32[2,1,32], index: 7, kind: input, shape index: {}]   ;;  %s2986_s8 = inlined_call_operand.vmem [shape: f32[32,4], index: 8, kind: input, shape index: {}]   ;;  %s2987_s9 = inlined_call_operand.vmem [shape: f32[1,4], index: 9, kind: input, shape index: {}]   ;;  %s2988_s10 = inlined_call_operand.vmem [shape: f32[8,4], index: 10, kind: output, shape index: {0}]   ;;  %s2989_s11 = inlined_call_operand.vmem [shape: f32[8,1], index: 11, kind: output, shape index: {1}]  }
   0x1   :  { %s26_s19 = sshll.u32 %s2979_s1, 4  ;;  %s27_s19 = int_to_ptr.vmem [resolvable:$true] %s26_s19 }
   0x2   :  { %29 = dma.vmem_to_smem %s27_s19, 16, %s2131_s20, [#allocation4]  }
   0x3   :  { %2129 = dma.done.wait [#allocation4], 16  }
   0x4   :  { %2130 = vsyncadd [#allocation4], 4294967280 }
   0x5   :  { %50 = sfence }
   0x6   :  { %v2199_v0 = vld [vmem:[%s2981_s3] sm:$0xf]  ;;  %vm66_vm0 = vcmask 1043456   ;;  %vm62_vm1 = vcmask 31744   ;;  %v2132_v1 = vmov 1.0   ;;  %v2211_v2 = vld [vmem:[%s2984_s6 + $0x18] sm:$0xff] }
   0x7   :  { %1986 = vmatpush.msk.msra.mxu0 %vm66_vm0, %v2199_v0  ;;  %120 = vmatpush.msra.mxu1 %v2211_v2  ;;  %v2217_v3 = vld [vmem:[%s2984_s6 + $0x10] sm:$0xff]  ;;  %v2223_v4 = vld [vmem:[%s2984_s6 + $0x8] sm:$0xff]  ;;  %v2229_v5 = vld [vmem:[%s2984_s6] sm:$0xff]  ;;  %vm104_vm2 = vcmask 261120   ;;  %s2339_s17 = sld [smem:[#allocation3]]  ;;  %vm1975_vm3 = vcmask 7168  }
   0x8   :  { %1987 = vmatmul.msk.f32.vlgmr.msra.gmra.mxu0 %vm62_vm1, %v2132_v1  ;;  %v2235_v6 = vld [vmem:[%s2984_s6 + $0x38] sm:$0xff]  ;;  %v2245_v7 = vld [vmem:[%s2982_s4] sm:$0x1]  ;;  %v2267_v15 = vld [vmem:[%s2984_s6 + $0x30] sm:$0xff]  ;;  %s2415_s22 = sld [smem:[#allocation3 + $0x1]] }
   0x9   :  { %1997 = vmatpush.msk.msrb.mxu0 %vm66_vm0, %v2199_v0  ;;  %121 = vmatpush.msra.mxu1 %v2217_v3  ;;  %v2248_v8 = vmul.f32 0.0, %v2245_v7  ;;  %v2254_v10 = vld [vmem:[%s2983_s5] ss:$0 sm:$0xff]  ;;  %v2273_v16 = vld [vmem:[%s2984_s6 + $0x28] sm:$0xff]  ;;  %v2285_v18 = vld [vmem:[%s2986_s8 + $0x18] sm:$0xff]  ;;  %v2367_v50 = vmul.f32 0.125, %v2245_v7 }
   0xa   :  { %154 = vmatpush.msra.mxu2 %v2235_v6  ;;  %v2279_v17 = vld [vmem:[%s2984_s6 + $0x20] sm:$0xff]  ;;  %186 = vmatpush.msra.mxu3 %v2285_v18  ;;  %v2306_v23 = vld [vmem:[%s2986_s8 + $0x10] sm:$0xff]  ;;  %v2312_v24 = vld [vmem:[%s2986_s8 + $0x8] sm:$0xff]  ;;  %s2489_s24 = sld [smem:[#allocation3 + $0x2]] }
   0xb   :  { %2004 = vmatpush.msk.msra.mxu0 %vm66_vm0, %v2199_v0  ;;  %122 = vmatpush.msra.mxu1 %v2223_v4  ;;  %v60_v9 = vperm.slane %v2248_v8, 0  ;;  %v2295_v19 = vld [vmem:[%s2985_s7] ss:$0 sm:$0xff]  ;;  %v2328_v26 = vld [vmem:[%s2985_s7 + $0x1] ss:$0 sm:$0xff]  ;;  %v327_v53 = vperm.slane %v2367_v50, 0 }
   0xc   :  { %155 = vmatpush.msra.mxu2 %v2267_v15  ;;  %187 = vmatpush.msra.mxu3 %v2306_v23  ;;  %v2318_v25 = vld [vmem:[%s2986_s8] sm:$0xff]  ;;  %s2567_s27 = sld [smem:[#allocation3 + $0x3]] }
   0xd   :  { %123 = vmatpush.msra.mxu1 %v2229_v5  ;;  %v54_v30 = vld [vmem:[%s2978_s0] sm:$0xff]  ;;  %v198_v34 = vstv %s2339_s17  ;;  %s2642_s30 = sld [smem:[#allocation3 + $0x4]]  ;;  %s318_s21 = smul.f32 2.828427, %s2339_s17 }
   0xe   :  { %156 = vmatpush.msra.mxu2 %v2273_v16  ;;  %188 = vmatpush.msra.mxu3 %v2312_v24  ;;  %v194_v31 = vmul.f32 %v54_v30, %v54_v30  ;;  %v2345_v35 = vld [vmem:[%s2987_s9] ss:$0 sm:$0xff]  ;;  %v302_v41 = vmul.f32 0.2, %v54_v30  ;;  %s2717_s14 = sld [smem:[#allocation3 + $0x5]] }
   0xf   :  { %242 = vmatpush.msrb.mxu1 %v2211_v2  ;;  %s2862_s29 = sld [smem:[#allocation3 + $0x6]] }
  0x10   :  { %157 = vmatpush.msra.mxu2 %v2279_v17  ;;  %189 = vmatpush.msra.mxu3 %v2318_v25  ;;  %v1996_v32 = vadd.f32 -0.125, %v194_v31  ;;  %v303_v46 = vadd.f32 1.0125, %v302_v41  ;;  %v429_v31 = vstv %s2415_s22  ;;  %s790_s17 = smul.f32 2.828427, %s2489_s24 }
  0x11   :  { %243 = vmatpush.msrb.mxu1 %v2217_v3 }
  0x12   :  { %266 = vmatpush.msrb.mxu2 %v2235_v6  ;;  %290 = vmatpush.msrb.mxu3 %v2285_v18  ;;  %v197_v33 = vmul.f32 1.4142135, %v1996_v32  ;;  %v196_v45 = vmul.f32 0.02, %v1996_v32 }
  0x13   :  { %244 = vmatpush.msrb.mxu1 %v2223_v4 }
  0x14   :  { %267 = vmatpush.msrb.mxu2 %v2267_v15  ;;  %291 = vmatpush.msrb.mxu3 %v2306_v23  ;;  %v199_v36 = vmul.f32 %v198_v34, %v197_v33  ;;  %v2358_v47 = vadd.f32 %v303_v46, %v196_v45 }
  0x15   :  { %245 = vmatpush.msrb.mxu1 %v2229_v5 }
  0x16   :  { %268 = vmatpush.msrb.mxu2 %v2273_v16  ;;  %292 = vmatpush.msrb.mxu3 %v2312_v24  ;;  %v536_v34 = vmul.f32 0.2, %v2358_v47 }
  0x18   :  { %269 = vmatpush.msrb.mxu2 %v2279_v17  ;;  %293 = vmatpush.msrb.mxu3 %v2318_v25 }
  0x85   :  { %v87_v11 = vpop.f32.mrf.mxu0 }
  0x86   :  { %v88_v12 = vadd.f32 %v87_v11, %v60_v9 }
  0x88   :  { %v94_v13 = vadd.f32 %v2254_v10, %v88_v12 }
  0x8a   :  { %v95_v14 = vmax.f32 %v94_v13, 0.0 }
  0x8c   :  { %1988 = vmatmul.msk.f32.vlgmr.msra.gmra.mxu1 %vm104_vm2, %v95_v14  ;;  %v2411_v14 = vld [vmem:[%s2978_s0 + $0x8] sm:$0xff] }
  0x8d   :  { %369 = vmatpush.msra.mxu1 %v2211_v2 }
  0x8f   :  { %370 = vmatpush.msra.mxu1 %v2217_v3 }
  0x91   :  { %371 = vmatpush.msra.mxu1 %v2223_v4 }
  0x93   :  { %372 = vmatpush.msra.mxu1 %v2229_v5 }
 0x109   :  { %v125_v20 = vpop.f32.mrf.mxu1 }
 0x10a   :  { %v126_v21 = vadd.f32 %v2295_v19, %v125_v20  ;;  %v425_v20 = vmul.f32 %v2411_v14, %v2411_v14 }
 0x10c   :  { %v128_v22 = vmax.f32 %v126_v21, 0.0  ;;  %v2009_v21 = vadd.f32 -0.125, %v425_v20  ;;  %v2015_v20 = vld [vmem:[%s2978_s0 + $0x10] sm:$0xff] }
 0x10e   :  { %1994 = vmatmul.msk.f32.vlgmr.msra.gmra.mxu2 %vm104_vm2, %v128_v22 }
 0x10f   :  { %393 = vmatpush.msra.mxu2 %v2235_v6 }
 0x111   :  { %394 = vmatpush.msra.mxu2 %v2267_v15 }
 0x113   :  { %395 = vmatpush.msra.mxu2 %v2273_v16 }
 0x115   :  { %396 = vmatpush.msra.mxu2 %v2279_v17 }
 0x191   :  { %v159_v27 = vpop.f32.mrf.mxu2 }
 0x192   :  { %v160_v28 = vadd.f32 %v2328_v26, %v159_v27 }
 0x194   :  { %v162_v29 = vmax.f32 %v160_v28, 0.0 }
 0x196   :  { %1995 = vmatmul.msk.f32.vlgmr.msra.gmra.mxu3 %vm104_vm2, %v162_v29  ;;  %v428_v29 = vmul.f32 1.4142135, %v2009_v21 }
 0x197   :  { %417 = vmatpush.msra.mxu3 %v2285_v18 }
 0x198   :  { %v430_v33 = vmul.f32 %v429_v31, %v428_v29 }
 0x199   :  { %418 = vmatpush.msra.mxu3 %v2306_v23 }
 0x19b   :  { %419 = vmatpush.msra.mxu3 %v2312_v24 }
 0x19d   :  { %420 = vmatpush.msra.mxu3 %v2318_v25 }
 0x219   :  { %v191_v37 = vpop.f32.mrf.mxu3 }
 0x21a   :  { %v2348_v38 = vadd.f32 %v2345_v35, %v191_v37 }
 0x21c   :  { %v306_v39 = vsel %vm62_vm1, %v2348_v38, 0.0  ;;  %v311_v40 = vmul.f32 %v2348_v38, %v54_v30  ;;  %v200_v42 = vmul.f32 %v199_v36, %v2348_v38  ;;  %v533_v30 = vmul.f32 0.1, %v2358_v47 }
 0x21d   :  { %307 = vadd.xlane.f32.xlu0 %v306_v39 }
 0x21e   :  { %v312_v43 = vsel %vm62_vm1, %v311_v40, 0.0  ;;  %v201_v44 = vadd.f32 1.0, %v200_v42  ;;  %v534_v36 = vmul.f32 0.125, %v533_v30  ;;  %v427_v40 = vmul.f32 0.02, %v2009_v21 }
 0x21f   :  { %313 = vadd.xlane.f32.xlu1 %v312_v43  ;;  %v661_v21 = vmul.f32 %v2015_v20, %v2015_v20 }
 0x220   :  { %1998 = vmatmul.msk.f32.vlgmr.msrb.gmra.mxu0 %vm62_vm1, %v201_v44  ;;  %v535_v43 = vadd.f32 %v534_v36, %v2358_v47  ;;  %v539_v45 = vmul.f32 %v427_v40, %v2358_v47 }
 0x221   :  { %2010 = vmatpush.msk.msrb.mxu0 %vm66_vm0, %v2199_v0 }
 0x228   :  { %2005 = vmatmul.msk.f32.vlgmr.msra.gmra.mxu0 %vm62_vm1, %v2358_v47 }
 0x229   :  { %2017 = vmatpush.msk.msra.mxu0 %vm66_vm0, %v2199_v0 }
 0x29d   :  { %v222_v48 = vpop.f32.mrf.mxu0 }
 0x29e   :  { %v223_v49 = vadd.f32 %v222_v48, %v60_v9 }
 0x2a0   :  { %v225_v51 = vadd.f32 %v2254_v10, %v223_v49 }
 0x2a2   :  { %v226_v52 = vmax.f32 %v225_v51, 0.0 }
 0x2a4   :  { %1999 = vmatmul.msk.f32.vlgmr.msrb.gmra.mxu1 %vm104_vm2, %v226_v52 }
 0x2a5   :  { %v349_v54 = vpop.f32.mrf.mxu0  ;;  %473 = vmatpush.msrb.mxu1 %v2211_v2 }
 0x2a6   :  { %v350_v55 = vadd.f32 %v349_v54, %v327_v53 }
 0x2a7   :  { %474 = vmatpush.msrb.mxu1 %v2217_v3 }
 0x2a8   :  { %v352_v56 = vadd.f32 %v2254_v10, %v350_v55 }
 0x2a9   :  { %475 = vmatpush.msrb.mxu1 %v2223_v4 }
 0x2aa   :  { %v353_v57 = vmax.f32 %v352_v56, 0.0 }
 0x2ab   :  { %476 = vmatpush.msrb.mxu1 %v2229_v5 }
 0x2ac   :  { %2006 = vmatmul.msk.f32.vlgmr.msra.gmra.mxu1 %vm104_vm2, %v353_v57 }
 0x2ad   :  { %605 = vmatpush.msra.mxu1 %v2211_v2 }
 0x2af   :  { %606 = vmatpush.msra.mxu1 %v2217_v3 }
 0x2b1   :  { %607 = vmatpush.msra.mxu1 %v2223_v4 }
 0x2b3   :  { %608 = vmatpush.msra.mxu1 %v2229_v5 }
 0x321   :  { %v247_v58 = vpop.f32.mrf.mxu1 }
 0x322   :  { %v248_v59 = vadd.f32 %v2295_v19, %v247_v58 }
 0x324   :  { %v250_v60 = vmax.f32 %v248_v59, 0.0 }
 0x326   :  { %2000 = vmatmul.msk.f32.vlgmr.msrb.gmra.mxu2 %vm104_vm2, %v250_v60 }
 0x327   :  { %497 = vmatpush.msrb.mxu2 %v2235_v6 }
 0x329   :  { %v374_v61 = vpop.f32.mrf.mxu1  ;;  %498 = vmatpush.msrb.mxu2 %v2267_v15 }
 0x32a   :  { %v375_v62 = vadd.f32 %v2295_v19, %v374_v61 }
 0x32b   :  { %499 = vmatpush.msrb.mxu2 %v2273_v16 }
 0x32c   :  { %v377_v63 = vmax.f32 %v375_v62, 0.0 }
 0x32d   :  { %500 = vmatpush.msrb.mxu2 %v2279_v17 }
 0x32e   :  { %2007 = vmatmul.msk.f32.vlgmr.msra.gmra.mxu2 %vm104_vm2, %v377_v63 }
 0x32f   :  { %629 = vmatpush.msra.mxu2 %v2235_v6 }
 0x331   :  { %630 = vmatpush.msra.mxu2 %v2267_v15 }
 0x333   :  { %631 = vmatpush.msra.mxu2 %v2273_v16 }
 0x335   :  { %632 = vmatpush.msra.mxu2 %v2279_v17 }
 0x3a9   :  { %v271_v1 = vpop.f32.mrf.mxu2 }
 0x3aa   :  { %v272_v8 = vadd.f32 %v2328_v26, %v271_v1 }
 0x3ac   :  { %v274_v9 = vmax.f32 %v272_v8, 0.0 }
 0x3ae   :  { %2001 = vmatmul.msk.f32.vlgmr.msrb.gmra.mxu3 %vm104_vm2, %v274_v9 }
 0x3af   :  { %521 = vmatpush.msrb.mxu3 %v2285_v18 }
 0x3b1   :  { %v398_v11 = vpop.f32.mrf.mxu2  ;;  %522 = vmatpush.msrb.mxu3 %v2306_v23 }
 0x3b2   :  { %v399_v12 = vadd.f32 %v2328_v26, %v398_v11 }
 0x3b3   :  { %523 = vmatpush.msrb.mxu3 %v2312_v24 }
 0x3b4   :  { %v401_v13 = vmax.f32 %v399_v12, 0.0 }
 0x3b5   :  { %524 = vmatpush.msrb.mxu3 %v2318_v25 }
 0x3b6   :  { %2008 = vmatmul.msk.f32.vlgmr.msra.gmra.mxu3 %vm104_vm2, %v401_v13 }
 0x3b7   :  { %653 = vmatpush.msra.mxu3 %v2285_v18 }
 0x3b9   :  { %654 = vmatpush.msra.mxu3 %v2306_v23 }
 0x3bb   :  { %655 = vmatpush.msra.mxu3 %v2312_v24 }
 0x3bd   :  { %656 = vmatpush.msra.mxu3 %v2318_v25 }
 0x431   :  { %v295_v22 = vpop.f32.mrf.mxu3 }
 0x432   :  { %v296_v27 = vadd.f32 %v2345_v35, %v295_v22  ;;  %v2022_v22 = vadd.f32 -0.125, %v661_v21 }
 0x434   :  { %v298_v28 = vsub.f32 %v296_v27, %v2348_v38  ;;  %v537_v38 = vmul.f32 %v2411_v14, %v536_v34  ;;  %v664_v30 = vmul.f32 1.4142135, %v2022_v22 }
 0x436   :  { %v299_v32 = vsel %vm62_vm1, %v298_v28, 0.0  ;;  %v538_v46 = vadd.f32 %v537_v38, %v535_v43 }
 0x437   :  { %300 = vadd.xlane.f32.xlu0 %v299_v32  ;;  %v665_v32 = vstv %s2489_s24  ;;  %s1262_s24 = smul.f32 2.828427, %s2642_s30 }
 0x438   :  { %v2436_v48 = vadd.f32 %v539_v45, %v538_v46  ;;  %v666_v34 = vmul.f32 %v665_v32, %v664_v30 }
 0x439   :  { %v422_v37 = vpop.f32.mrf.mxu3 }
 0x43a   :  { %v2424_v39 = vadd.f32 %v2345_v35, %v422_v37  ;;  %v769_v31 = vmul.f32 0.1, %v2436_v48  ;;  %v772_v36 = vmul.f32 0.2, %v2436_v48 }
 0x43c   :  { %v431_v41 = vmul.f32 %v430_v33, %v2424_v39  ;;  %v542_v42 = vsel %vm62_vm1, %v2424_v39, 0.0  ;;  %v770_v37 = vmul.f32 0.125, %v769_v31  ;;  %v547_v38 = vmul.f32 %v2411_v14, %v2424_v39 }
 0x43d   :  { %543 = vadd.xlane.f32.xlu1 %v542_v42  ;;  %v663_v42 = vmul.f32 0.02, %v2022_v22 }
 0x43e   :  { %v432_v44 = vadd.f32 %v431_v41, %v2358_v47  ;;  %v2445_v47 = vmul.f32 0.25, %v2245_v7  ;;  %v771_v46 = vadd.f32 %v770_v37, %v2436_v48  ;;  %v901_v37 = vstv %s2567_s27 }
 0x440   :  { %2011 = vmatmul.msk.f32.vlgmr.msrb.gmra.mxu0 %vm62_vm1, %v432_v44  ;;  %v563_v55 = vperm.slane %v2445_v47, 0  ;;  %v773_v44 = vmul.f32 %v2015_v20, %v772_v36 }
 0x441   :  { %2023 = vmatpush.msk.msrb.mxu0 %vm66_vm0, %v2199_v0 }
 0x442   :  { %v774_v14 = vadd.f32 %v773_v44, %v771_v46 }
 0x448   :  { %2018 = vmatmul.msk.f32.vlgmr.msra.gmra.mxu0 %vm62_vm1, %v2436_v48 }
 0x449   :  { %2030 = vmatpush.msk.msra.mxu0 %vm66_vm0, %v2199_v0 }
 0x4bd   :  { %v453_v49 = vpop.f32.mrf.mxu0 }
 0x4be   :  { %v454_v51 = vadd.f32 %v453_v49, %v327_v53 }
 0x4c0   :  { %v456_v52 = vadd.f32 %v2254_v10, %v454_v51  ;;  %v548_v51 = vsel %vm62_vm1, %v547_v38, 0.0 }
 0x4c2   :  { %v457_v54 = vmax.f32 %v456_v52, 0.0  ;;  %v775_v52 = vmul.f32 %v663_v42, %v2436_v48 }
 0x4c4   :  { %2012 = vmatmul.msk.f32.vlgmr.msrb.gmra.mxu1 %vm104_vm2, %v457_v54  ;;  %v2513_v54 = vadd.f32 %v775_v52, %v774_v14 }
 0x4c5   :  { %v585_v56 = vpop.f32.mrf.mxu0  ;;  %709 = vmatpush.msrb.mxu1 %v2211_v2 }
 0x4c6   :  { %v586_v57 = vadd.f32 %v585_v56, %v563_v55  ;;  %v1005_v36 = vmul.f32 0.1, %v2513_v54  ;;  %v1008_v38 = vmul.f32 0.2, %v2513_v54 }
 0x4c7   :  { %710 = vmatpush.msrb.mxu1 %v2217_v3 }
 0x4c8   :  { %v588_v50 = vadd.f32 %v2254_v10, %v586_v57 }
 0x4c9   :  { %711 = vmatpush.msrb.mxu1 %v2223_v4 }
 0x4ca   :  { %v589_v53 = vmax.f32 %v588_v50, 0.0  ;;  %v2523_v50 = vmul.f32 0.375, %v2245_v7 }
 0x4cb   :  { %712 = vmatpush.msrb.mxu1 %v2229_v5 }
 0x4cc   :  { %2019 = vmatmul.msk.f32.vlgmr.msra.gmra.mxu1 %vm104_vm2, %v589_v53 }
 0x4cd   :  { %841 = vmatpush.msra.mxu1 %v2211_v2 }
 0x4cf   :  { %842 = vmatpush.msra.mxu1 %v2217_v3 }
 0x4d1   :  { %843 = vmatpush.msra.mxu1 %v2223_v4 }
 0x4d3   :  { %844 = vmatpush.msra.mxu1 %v2229_v5 }
 0x541   :  { %v478_v58 = vpop.f32.mrf.mxu1 }
 0x542   :  { %v479_v59 = vadd.f32 %v2295_v19, %v478_v58 }
 0x544   :  { %v481_v60 = vmax.f32 %v479_v59, 0.0  ;;  %v799_v59 = vperm.slane %v2523_v50, 0 }
 0x546   :  { %2013 = vmatmul.msk.f32.vlgmr.msrb.gmra.mxu2 %vm104_vm2, %v481_v60 }
 0x547   :  { %733 = vmatpush.msrb.mxu2 %v2235_v6 }
 0x549   :  { %v610_v61 = vpop.f32.mrf.mxu1  ;;  %734 = vmatpush.msrb.mxu2 %v2267_v15 }
 0x54a   :  { %v611_v62 = vadd.f32 %v2295_v19, %v610_v61 }
 0x54b   :  { %735 = vmatpush.msrb.mxu2 %v2273_v16 }
 0x54c   :  { %v613_v63 = vmax.f32 %v611_v62, 0.0 }
 0x54d   :  { %736 = vmatpush.msrb.mxu2 %v2279_v17 }
 0x54e   :  { %2020 = vmatmul.msk.f32.vlgmr.msra.gmra.mxu2 %vm104_vm2, %v613_v63 }
 0x54f   :  { %865 = vmatpush.msra.mxu2 %v2235_v6 }
 0x551   :  { %866 = vmatpush.msra.mxu2 %v2267_v15 }
 0x553   :  { %867 = vmatpush.msra.mxu2 %v2273_v16 }
 0x555   :  { %868 = vmatpush.msra.mxu2 %v2279_v17 }
 0x5c9   :  { %v502_v1 = vpop.f32.mrf.mxu2 }
 0x5ca   :  { %v503_v8 = vadd.f32 %v2328_v26, %v502_v1 }
 0x5cc   :  { %v505_v9 = vmax.f32 %v503_v8, 0.0 }
 0x5ce   :  { %2014 = vmatmul.msk.f32.vlgmr.msrb.gmra.mxu3 %vm104_vm2, %v505_v9 }
 0x5cf   :  { %757 = vmatpush.msrb.mxu3 %v2285_v18 }
 0x5d1   :  { %v634_v11 = vpop.f32.mrf.mxu2  ;;  %758 = vmatpush.msrb.mxu3 %v2306_v23 }
 0x5d2   :  { %v635_v12 = vadd.f32 %v2328_v26, %v634_v11 }
 0x5d3   :  { %759 = vmatpush.msrb.mxu3 %v2312_v24 }
 0x5d4   :  { %v637_v13 = vmax.f32 %v635_v12, 0.0 }
 0x5d5   :  { %760 = vmatpush.msrb.mxu3 %v2318_v25 }
 0x5d6   :  { %2021 = vmatmul.msk.f32.vlgmr.msra.gmra.mxu3 %vm104_vm2, %v637_v13 }
 0x5d7   :  { %889 = vmatpush.msra.mxu3 %v2285_v18 }
 0x5d9   :  { %890 = vmatpush.msra.mxu3 %v2306_v23 }
 0x5db   :  { %891 = vmatpush.msra.mxu3 %v2312_v24 }
 0x5dd   :  { %892 = vmatpush.msra.mxu3 %v2318_v25 }
 0x651   :  { %v526_v27 = vpop.f32.mrf.mxu3 }
 0x652   :  { %v527_v28 = vadd.f32 %v2345_v35, %v526_v27 }
 0x654   :  { %v529_v29 = vsub.f32 %v527_v28, %v2424_v39  ;;  %v2028_v28 = vld [vmem:[%s2978_s0 + $0x18] sm:$0xff] }
 0x656   :  { %v530_v33 = vsel %vm62_vm1, %v529_v29, 0.0  ;;  %v897_v29 = vmul.f32 %v2028_v28, %v2028_v28 }
 0x657   :  { %531 = vadd.xlane.f32.xlu2 %v530_v33 }
 0x658   :  { %v2035_v30 = vadd.f32 -0.125, %v897_v29 }
 0x659   :  { %v658_v40 = vpop.f32.mrf.mxu3 }
 0x65a   :  { %v2498_v41 = vadd.f32 %v2345_v35, %v658_v40  ;;  %v899_v46 = vmul.f32 0.02, %v2035_v30 }
 0x65c   :  { %v667_v43 = vmul.f32 %v666_v34, %v2498_v41  ;;  %v778_v45 = vsel %vm62_vm1, %v2498_v41, 0.0  ;;  %v783_v39 = vmul.f32 %v2015_v20, %v2498_v41  ;;  %v900_v34 = vmul.f32 1.4142135, %v2035_v30  ;;  %v2041_v30 = vld [vmem:[%s2978_s0 + $0x20] sm:$0xff] }
 0x65d   :  { %779 = vadd.xlane.f32.xlu0 %v778_v45 }
 0x65e   :  { %v668_v49 = vadd.f32 %v667_v43, %v2436_v48  ;;  %v784_v56 = vsel %vm62_vm1, %v783_v39, 0.0  ;;  %v902_v42 = vmul.f32 %v901_v37, %v900_v34  ;;  %v1006_v43 = vmul.f32 0.125, %v1005_v36 }
 0x65f   :  { %549 = vadd.xlane.f32.xlu2 %v548_v51 }
 0x660   :  { %2024 = vmatmul.msk.f32.vlgmr.msrb.gmra.mxu0 %vm62_vm1, %v668_v49  ;;  %v1009_v49 = vmul.f32 %v2028_v28, %v1008_v38  ;;  %v1007_v52 = vadd.f32 %v1006_v43, %v2513_v54  ;;  %v1137_v38 = vstv %s2642_s30  ;;  %s1734_s30 = smul.f32 2.828427, %s2862_s29 }
 0x661   :  { %2036 = vmatpush.msk.msrb.mxu0 %vm66_vm0, %v2199_v0 }
 0x667   :  { %785 = vadd.xlane.f32.xlu2 %v784_v56 }
 0x668   :  { %2031 = vmatmul.msk.f32.vlgmr.msra.gmra.mxu0 %vm62_vm1, %v2513_v54 }
 0x669   :  { %2043 = vmatpush.msk.msra.mxu0 %vm66_vm0, %v2199_v0 }
 0x6dd   :  { %v689_v48 = vpop.f32.mrf.mxu0 }
 0x6de   :  { %v690_v57 = vadd.f32 %v689_v48, %v563_v55  ;;  %v1010_v48 = vadd.f32 %v1009_v49, %v1007_v52 }
 0x6e0   :  { %v692_v53 = vadd.f32 %v2254_v10, %v690_v57  ;;  %v1011_v57 = vmul.f32 %v899_v46, %v2513_v54 }
 0x6e2   :  { %v693_v58 = vmax.f32 %v692_v53, 0.0  ;;  %v2589_v53 = vadd.f32 %v1011_v57, %v1010_v48 }
 0x6e4   :  { %2025 = vmatmul.msk.f32.vlgmr.msrb.gmra.mxu1 %vm104_vm2, %v693_v58  ;;  %v1244_v43 = vmul.f32 0.2, %v2589_v53 }
 0x6e5   :  { %v821_v60 = vpop.f32.mrf.mxu0  ;;  %945 = vmatpush.msrb.mxu1 %v2211_v2 }
 0x6e6   :  { %v822_v61 = vadd.f32 %v821_v60, %v799_v59  ;;  %v1245_v52 = vmul.f32 %v2041_v30, %v1244_v43 }
 0x6e7   :  { %946 = vmatpush.msrb.mxu1 %v2217_v3 }
 0x6e8   :  { %v824_v47 = vadd.f32 %v2254_v10, %v822_v61  ;;  %v2598_v61 = vmul.f32 0.5, %v2245_v7 }
 0x6e9   :  { %947 = vmatpush.msrb.mxu1 %v2223_v4 }
 0x6ea   :  { %v825_v55 = vmax.f32 %v824_v47, 0.0 }
 0x6eb   :  { %948 = vmatpush.msrb.mxu1 %v2229_v5 }
 0x6ec   :  { %2032 = vmatmul.msk.f32.vlgmr.msra.gmra.mxu1 %vm104_vm2, %v825_v55  ;;  %v1035_v55 = vperm.slane %v2598_v61, 0 }
 0x6ed   :  { %1077 = vmatpush.msra.mxu1 %v2211_v2 }
 0x6ef   :  { %1078 = vmatpush.msra.mxu1 %v2217_v3 }
 0x6f1   :  { %1079 = vmatpush.msra.mxu1 %v2223_v4 }
 0x6f3   :  { %1080 = vmatpush.msra.mxu1 %v2229_v5 }
 0x761   :  { %v714_v62 = vpop.f32.mrf.mxu1 }
 0x762   :  { %v715_v63 = vadd.f32 %v2295_v19, %v714_v62 }
 0x764   :  { %v717_v1 = vmax.f32 %v715_v63, 0.0 }
 0x766   :  { %2026 = vmatmul.msk.f32.vlgmr.msrb.gmra.mxu2 %vm104_vm2, %v717_v1 }
 0x767   :  { %969 = vmatpush.msrb.mxu2 %v2235_v6 }
 0x769   :  { %v846_v8 = vpop.f32.mrf.mxu1  ;;  %970 = vmatpush.msrb.mxu2 %v2267_v15 }
 0x76a   :  { %v847_v9 = vadd.f32 %v2295_v19, %v846_v8 }
 0x76b   :  { %971 = vmatpush.msrb.mxu2 %v2273_v16 }
 0x76c   :  { %v849_v11 = vmax.f32 %v847_v9, 0.0 }
 0x76d   :  { %972 = vmatpush.msrb.mxu2 %v2279_v17 }
 0x76e   :  { %2033 = vmatmul.msk.f32.vlgmr.msra.gmra.mxu2 %vm104_vm2, %v849_v11 }
 0x76f   :  { %1101 = vmatpush.msra.mxu2 %v2235_v6 }
 0x771   :  { %1102 = vmatpush.msra.mxu2 %v2267_v15 }
 0x773   :  { %1103 = vmatpush.msra.mxu2 %v2273_v16 }
 0x775   :  { %1104 = vmatpush.msra.mxu2 %v2279_v17 }
 0x7e9   :  { %v738_v12 = vpop.f32.mrf.mxu2 }
 0x7ea   :  { %v739_v13 = vadd.f32 %v2328_v26, %v738_v12 }
 0x7ec   :  { %v741_v20 = vmax.f32 %v739_v13, 0.0 }
 0x7ee   :  { %2027 = vmatmul.msk.f32.vlgmr.msrb.gmra.mxu3 %vm104_vm2, %v741_v20 }
 0x7ef   :  { %993 = vmatpush.msrb.mxu3 %v2285_v18 }
 0x7f1   :  { %v870_v21 = vpop.f32.mrf.mxu2  ;;  %994 = vmatpush.msrb.mxu3 %v2306_v23 }
 0x7f2   :  { %v871_v22 = vadd.f32 %v2328_v26, %v870_v21 }
 0x7f3   :  { %995 = vmatpush.msrb.mxu3 %v2312_v24 }
 0x7f4   :  { %v873_v27 = vmax.f32 %v871_v22, 0.0 }
 0x7f5   :  { %996 = vmatpush.msrb.mxu3 %v2318_v25 }
 0x7f6   :  { %2034 = vmatmul.msk.f32.vlgmr.msra.gmra.mxu3 %vm104_vm2, %v873_v27 }
 0x7f7   :  { %1125 = vmatpush.msra.mxu3 %v2285_v18 }
 0x7f9   :  { %1126 = vmatpush.msra.mxu3 %v2306_v23 }
 0x7fb   :  { %1127 = vmatpush.msra.mxu3 %v2312_v24 }
 0x7fd   :  { %1128 = vmatpush.msra.mxu3 %v2318_v25 }
 0x871   :  { %v762_v31 = vpop.f32.mrf.mxu3 }
 0x872   :  { %v763_v32 = vadd.f32 %v2345_v35, %v762_v31  ;;  %v1133_v31 = vmul.f32 %v2041_v30, %v2041_v30 }
 0x874   :  { %v765_v33 = vsub.f32 %v763_v32, %v2498_v41  ;;  %v2048_v32 = vadd.f32 -0.125, %v1133_v31 }
 0x876   :  { %v766_v40 = vsel %vm62_vm1, %v765_v33, 0.0  ;;  %v1136_v37 = vmul.f32 1.4142135, %v2048_v32 }
 0x877   :  { %767 = vadd.xlane.f32.xlu1 %v766_v40  ;;  %v1241_v40 = vmul.f32 0.1, %v2589_v53 }
 0x879   :  { %v894_v44 = vpop.f32.mrf.mxu3  ;;  %v1242_v46 = vmul.f32 0.125, %v1241_v40 }
 0x87a   :  { %v2576_v45 = vadd.f32 %v2345_v35, %v894_v44  ;;  %v1138_v44 = vmul.f32 %v1137_v38, %v1136_v37 }
 0x87c   :  { %v1014_v41 = vsel %vm62_vm1, %v2576_v45, 0.0  ;;  %v903_v51 = vmul.f32 %v902_v42, %v2576_v45  ;;  %v1019_v14 = vmul.f32 %v2028_v28, %v2576_v45 }
 0x87d   :  { %1015 = vadd.xlane.f32.xlu0 %v1014_v41 }
 0x87e   :  { %v1020_v39 = vsel %vm62_vm1, %v1019_v14, 0.0  ;;  %v904_v56 = vadd.f32 %v903_v51, %v2513_v54  ;;  %v1135_v51 = vmul.f32 0.02, %v2048_v32 }
 0x87f   :  { %1021 = vadd.xlane.f32.xlu2 %v1020_v39  ;;  %v1243_v39 = vadd.f32 %v1242_v46, %v2589_v53 }
 0x880   :  { %2037 = vmatmul.msk.f32.vlgmr.msrb.gmra.mxu0 %vm62_vm1, %v904_v56 }
 0x881   :  { %2049 = vmatpush.msk.msrb.mxu0 %vm66_vm0, %v2199_v0 }
 0x888   :  { %2044 = vmatmul.msk.f32.vlgmr.msra.gmra.mxu0 %vm62_vm1, %v2589_v53 }
 0x889   :  { %2056 = vmatpush.msk.msra.mxu0 %vm66_vm0, %v2199_v0 }
 0x8fd   :  { %v925_v58 = vpop.f32.mrf.mxu0 }
 0x8fe   :  { %v926_v60 = vadd.f32 %v925_v58, %v799_v59  ;;  %v1246_v58 = vadd.f32 %v1245_v52, %v1243_v39 }
 0x900   :  { %v928_v54 = vadd.f32 %v2254_v10, %v926_v60  ;;  %v1247_v60 = vmul.f32 %v1135_v51, %v2589_v53 }
 0x902   :  { %v929_v47 = vmax.f32 %v928_v54, 0.0  ;;  %v2664_v54 = vadd.f32 %v1247_v60, %v1246_v58  ;;  %v2761_v58 = vld [vmem:[%s2984_s6 + $0x18] sm:$0xff] }
 0x904   :  { %2038 = vmatmul.msk.f32.vlgmr.msrb.gmra.mxu1 %vm104_vm2, %v929_v47 }
 0x905   :  { %v1057_v62 = vpop.f32.mrf.mxu0  ;;  %1181 = vmatpush.msrb.mxu1 %v2211_v2 }
 0x906   :  { %v1058_v63 = vadd.f32 %v1057_v62, %v1035_v55 }
 0x907   :  { %1182 = vmatpush.msrb.mxu1 %v2217_v3 }
 0x908   :  { %v1060_v50 = vadd.f32 %v2254_v10, %v1058_v63  ;;  %v2673_v63 = vmul.f32 0.625, %v2245_v7 }
 0x909   :  { %1183 = vmatpush.msrb.mxu1 %v2223_v4 }
 0x90a   :  { %v1061_v59 = vmax.f32 %v1060_v50, 0.0 }
 0x90b   :  { %1184 = vmatpush.msrb.mxu1 %v2229_v5 }
 0x90c   :  { %2045 = vmatmul.msk.f32.vlgmr.msra.gmra.mxu1 %vm104_vm2, %v1061_v59  ;;  %v1271_v59 = vperm.slane %v2673_v63, 0  ;;  %v2787_v63 = vld [vmem:[%s2984_s6] sm:$0xff] }
 0x90d   :  { %1313 = vmatpush.msra.mxu1 %v2211_v2 }
 0x90f   :  { %1314 = vmatpush.msra.mxu1 %v2217_v3 }
 0x911   :  { %1315 = vmatpush.msra.mxu1 %v2223_v4 }
 0x913   :  { %1316 = vmatpush.msra.mxu1 %v2229_v5 }
 0x981   :  { %v950_v1 = vpop.f32.mrf.mxu1 }
 0x982   :  { %v951_v8 = vadd.f32 %v2295_v19, %v950_v1 }
 0x984   :  { %v953_v9 = vmax.f32 %v951_v8, 0.0 }
 0x986   :  { %2039 = vmatmul.msk.f32.vlgmr.msrb.gmra.mxu2 %vm104_vm2, %v953_v9 }
 0x987   :  { %1205 = vmatpush.msrb.mxu2 %v2235_v6 }
 0x989   :  { %v1082_v11 = vpop.f32.mrf.mxu1  ;;  %1206 = vmatpush.msrb.mxu2 %v2267_v15 }
 0x98a   :  { %v1083_v12 = vadd.f32 %v2295_v19, %v1082_v11 }
 0x98b   :  { %1207 = vmatpush.msrb.mxu2 %v2273_v16 }
 0x98c   :  { %v1085_v13 = vmax.f32 %v1083_v12, 0.0 }
 0x98d   :  { %1208 = vmatpush.msrb.mxu2 %v2279_v17 }
 0x98e   :  { %2046 = vmatmul.msk.f32.vlgmr.msra.gmra.mxu2 %vm104_vm2, %v1085_v13 }
 0x98f   :  { %1337 = vmatpush.msra.mxu2 %v2235_v6 }
 0x991   :  { %1338 = vmatpush.msra.mxu2 %v2267_v15 }
 0x993   :  { %1339 = vmatpush.msra.mxu2 %v2273_v16 }
 0x995   :  { %1340 = vmatpush.msra.mxu2 %v2279_v17 }
 0xa09   :  { %v974_v20 = vpop.f32.mrf.mxu2 }
 0xa0a   :  { %v975_v21 = vadd.f32 %v2328_v26, %v974_v20 }
 0xa0c   :  { %v977_v22 = vmax.f32 %v975_v21, 0.0 }
 0xa0e   :  { %2040 = vmatmul.msk.f32.vlgmr.msrb.gmra.mxu3 %vm104_vm2, %v977_v22 }
 0xa0f   :  { %1229 = vmatpush.msrb.mxu3 %v2285_v18 }
 0xa11   :  { %v1106_v27 = vpop.f32.mrf.mxu2  ;;  %1230 = vmatpush.msrb.mxu3 %v2306_v23 }
 0xa12   :  { %v1107_v28 = vadd.f32 %v2328_v26, %v1106_v27 }
 0xa13   :  { %1231 = vmatpush.msrb.mxu3 %v2312_v24 }
 0xa14   :  { %v1109_v29 = vmax.f32 %v1107_v28, 0.0 }
 0xa15   :  { %1232 = vmatpush.msrb.mxu3 %v2318_v25 }
 0xa16   :  { %2047 = vmatmul.msk.f32.vlgmr.msra.gmra.mxu3 %vm104_vm2, %v1109_v29  ;;  %v1480_v29 = vmul.f32 0.2, %v2664_v54 }
 0xa17   :  { %1361 = vmatpush.msra.mxu3 %v2285_v18 }
 0xa19   :  { %1362 = vmatpush.msra.mxu3 %v2306_v23 }
 0xa1b   :  { %1363 = vmatpush.msra.mxu3 %v2312_v24 }
 0xa1d   :  { %1364 = vmatpush.msra.mxu3 %v2318_v25 }
 0xa91   :  { %v998_v33 = vpop.f32.mrf.mxu3 }
 0xa92   :  { %v999_v34 = vadd.f32 %v2345_v35, %v998_v33 }
 0xa94   :  { %v1001_v36 = vsub.f32 %v999_v34, %v2576_v45 }
 0xa96   :  { %v1002_v42 = vsel %vm62_vm1, %v1001_v36, 0.0 }
 0xa97   :  { %1003 = vadd.xlane.f32.xlu1 %v1002_v42 }
 0xa99   :  { %v1130_v49 = vpop.f32.mrf.mxu3 }
 0xa9a   :  { %v2651_v41 = vadd.f32 %v2345_v35, %v1130_v49 }
 0xa9c   :  { %v1250_v45 = vsel %vm62_vm1, %v2651_v41, 0.0  ;;  %v1139_v14 = vmul.f32 %v1138_v44, %v2651_v41  ;;  %v1255_v56 = vmul.f32 %v2041_v30, %v2651_v41 }
 0xa9d   :  { %1251 = vadd.xlane.f32.xlu0 %v1250_v45 }
 0xa9e   :  { %v1256_v48 = vsel %vm62_vm1, %v1255_v56, 0.0  ;;  %v1140_v57 = vadd.f32 %v1139_v14, %v2589_v53  ;;  %v2753_v14 = vmul.f32 0.75, %v2245_v7  ;;  %v2769_v7 = vld [vmem:[%s2984_s6 + $0x10] sm:$0xff] }
 0xa9f   :  { %1257 = vadd.xlane.f32.xlu2 %v1256_v48 }
 0xaa0   :  { %2050 = vmatmul.msk.f32.vlgmr.msrb.gmra.mxu0 %vm62_vm1, %v1140_v57  ;;  %v1507_v48 = vperm.slane %v2753_v14, 0 }
 0xaa1   :  { %2062 = vmatpush.msk.msrb.mxu0 %vm66_vm0, %v2199_v0 }
 0xaa8   :  { %2057 = vmatmul.msk.f32.vlgmr.msra.gmra.mxu0 %vm62_vm1, %v2664_v54 }
 0xaa9   :  { %2069 = vmatpush.msk.msra.mxu0 %vm66_vm0, %v2199_v0 }
 0xb1d   :  { %v1161_v47 = vpop.f32.mrf.mxu0 }
 0xb1e   :  { %v1162_v62 = vadd.f32 %v1161_v47, %v1035_v55  ;;  %v2781_v47 = vld [vmem:[%s2984_s6 + $0x8] sm:$0xff] }
 0xb20   :  { %v1164_v53 = vadd.f32 %v2254_v10, %v1162_v62 }
 0xb22   :  { %v1165_v50 = vmax.f32 %v1164_v53, 0.0 }
 0xb24   :  { %2051 = vmatmul.msk.f32.vlgmr.msrb.gmra.mxu1 %vm104_vm2, %v1165_v50 }
 0xb25   :  { %v1293_v1 = vpop.f32.mrf.mxu0  ;;  %1417 = vmatpush.msrb.mxu1 %v2211_v2 }
 0xb26   :  { %v1294_v0 = vadd.f32 %v1293_v1, %v1271_v59  ;;  %v2800_v1 = vld [vmem:[%s2984_s6 + $0x38] sm:$0xff] }
 0xb27   :  { %1418 = vmatpush.msrb.mxu1 %v2217_v3 }
 0xb28   :  { %v1296_v61 = vadd.f32 %v2254_v10, %v1294_v0 }
 0xb29   :  { %1419 = vmatpush.msrb.mxu1 %v2223_v4 }
 0xb2a   :  { %v1297_v55 = vmax.f32 %v1296_v61, 0.0  ;;  %v2806_v61 = vld [vmem:[%s2984_s6 + $0x30] sm:$0xff] }
 0xb2b   :  { %1420 = vmatpush.msrb.mxu1 %v2229_v5 }
 0xb2c   :  { %2058 = vmatmul.msk.f32.vlgmr.msra.gmra.mxu1 %vm104_vm2, %v1297_v55 }
 0xb2d   :  { %1549 = vmatpush.msra.mxu1 %v2211_v2 }
 0xb2f   :  { %1550 = vmatpush.msra.mxu1 %v2217_v3 }
 0xb31   :  { %1551 = vmatpush.msra.mxu1 %v2223_v4 }
 0xb33   :  { %1552 = vmatpush.msra.mxu1 %v2229_v5 }
 0xba1   :  { %v1186_v8 = vpop.f32.mrf.mxu1 }
 0xba2   :  { %v1187_v9 = vadd.f32 %v2295_v19, %v1186_v8  ;;  %v2813_v8 = vld [vmem:[%s2984_s6 + $0x28] sm:$0xff] }
 0xba4   :  { %v1189_v11 = vmax.f32 %v1187_v9, 0.0 }
 0xba6   :  { %2052 = vmatmul.msk.f32.vlgmr.msrb.gmra.mxu2 %vm104_vm2, %v1189_v11  ;;  %v2819_v11 = vld [vmem:[%s2984_s6 + $0x20] sm:$0xff] }
 0xba7   :  { %1441 = vmatpush.msrb.mxu2 %v2235_v6 }
 0xba9   :  { %v1318_v12 = vpop.f32.mrf.mxu1  ;;  %1442 = vmatpush.msrb.mxu2 %v2267_v15 }
 0xbaa   :  { %v1319_v13 = vadd.f32 %v2295_v19, %v1318_v12 }
 0xbab   :  { %1443 = vmatpush.msrb.mxu2 %v2273_v16 }
 0xbac   :  { %v1321_v2 = vmax.f32 %v1319_v13, 0.0 }
 0xbad   :  { %1444 = vmatpush.msrb.mxu2 %v2279_v17 }
 0xbae   :  { %2059 = vmatmul.msk.f32.vlgmr.msra.gmra.mxu2 %vm104_vm2, %v1321_v2  ;;  %v2832_v2 = vld [vmem:[%s2986_s8 + $0x18] sm:$0xff] }
 0xbaf   :  { %1573 = vmatpush.msra.mxu2 %v2235_v6 }
 0xbb1   :  { %1574 = vmatpush.msra.mxu2 %v2267_v15  ;;  %v2054_v15 = vld [vmem:[%s2978_s0 + $0x28] sm:$0xff] }
 0xbb2   :  { %v1481_v36 = vmul.f32 %v2054_v15, %v1480_v29 }
 0xbb3   :  { %1575 = vmatpush.msra.mxu2 %v2273_v16  ;;  %v1369_v16 = vmul.f32 %v2054_v15, %v2054_v15 }
 0xbb5   :  { %1576 = vmatpush.msra.mxu2 %v2279_v17  ;;  %v2061_v17 = vadd.f32 -0.125, %v1369_v16 }
 0xbb7   :  { %v1372_v28 = vmul.f32 1.4142135, %v2061_v17  ;;  %v1371_v34 = vmul.f32 0.02, %v2061_v17 }
 0xbb9   :  { %v1483_v49 = vmul.f32 %v1371_v34, %v2664_v54 }
 0xc29   :  { %v1210_v3 = vpop.f32.mrf.mxu2 }
 0xc2a   :  { %v1211_v4 = vadd.f32 %v2328_v26, %v1210_v3 }
 0xc2c   :  { %v1213_v5 = vmax.f32 %v1211_v4, 0.0  ;;  %v2838_v4 = vld [vmem:[%s2986_s8 + $0x10] sm:$0xff] }
 0xc2e   :  { %2053 = vmatmul.msk.f32.vlgmr.msrb.gmra.mxu3 %vm104_vm2, %v1213_v5 }
 0xc2f   :  { %1465 = vmatpush.msrb.mxu3 %v2285_v18 }
 0xc31   :  { %v1342_v20 = vpop.f32.mrf.mxu2  ;;  %1466 = vmatpush.msrb.mxu3 %v2306_v23 }
 0xc32   :  { %v1343_v21 = vadd.f32 %v2328_v26, %v1342_v20  ;;  %v2845_v20 = vld [vmem:[%s2986_s8 + $0x8] sm:$0xff] }
 0xc33   :  { %1467 = vmatpush.msrb.mxu3 %v2312_v24 }
 0xc34   :  { %v1345_v6 = vmax.f32 %v1343_v21, 0.0 }
 0xc35   :  { %1468 = vmatpush.msrb.mxu3 %v2318_v25 }
 0xc36   :  { %2060 = vmatmul.msk.f32.vlgmr.msra.gmra.mxu3 %vm104_vm2, %v1345_v6  ;;  %v2851_v6 = vld [vmem:[%s2986_s8] sm:$0xff] }
 0xc37   :  { %1597 = vmatpush.msra.mxu3 %v2285_v18 }
 0xc39   :  { %1598 = vmatpush.msra.mxu3 %v2306_v23  ;;  %v1477_v23 = vmul.f32 0.1, %v2664_v54 }
 0xc3b   :  { %1599 = vmatpush.msra.mxu3 %v2312_v24  ;;  %v1373_v24 = vstv %s2717_s14  ;;  %v1478_v31 = vmul.f32 0.125, %v1477_v23  ;;  %v1609_v23 = vstv %s2862_s29 }
 0xc3c   :  { %v1374_v30 = vmul.f32 %v1373_v24, %v1372_v28 }
 0xc3d   :  { %1600 = vmatpush.msra.mxu3 %v2318_v25  ;;  %v1479_v38 = vadd.f32 %v1478_v31, %v2664_v54 }
 0xc3f   :  { %v1482_v46 = vadd.f32 %v1481_v36, %v1479_v38 }
 0xc41   :  { %v2744_v51 = vadd.f32 %v1483_v49, %v1482_v46 }
 0xc43   :  { %v1713_v28 = vmul.f32 0.1, %v2744_v51 }
 0xcb1   :  { %v1234_v22 = vpop.f32.mrf.mxu3 }
 0xcb2   :  { %v1235_v27 = vadd.f32 %v2345_v35, %v1234_v22 }
 0xcb4   :  { %v1237_v18 = vsub.f32 %v1235_v27, %v2651_v41  ;;  %v2740_v41 = vld [vmem:[%s2981_s3] sm:$0xf] }
 0xcb6   :  { %v1238_v25 = vsel %vm62_vm1, %v1237_v18, 0.0 }
 0xcb7   :  { %1239 = vadd.xlane.f32.xlu1 %v1238_v25  ;;  %v1716_v25 = vmul.f32 0.2, %v2744_v51 }
 0xcb9   :  { %v1366_v32 = vpop.f32.mrf.mxu3 }
 0xcba   :  { %v2726_v33 = vadd.f32 %v2345_v35, %v1366_v32  ;;  %v2873_v32 = vld [vmem:[%s2987_s9] ss:$0 sm:$0xff] }
 0xcbc   :  { %v1486_v37 = vsel %vm62_vm1, %v2726_v33, 0.0  ;;  %v1375_v40 = vmul.f32 %v1374_v30, %v2726_v33  ;;  %v1491_v42 = vmul.f32 %v2054_v15, %v2726_v33  ;;  %v1714_v30 = vmul.f32 0.125, %v1713_v28 }
 0xcbd   :  { %1487 = vadd.xlane.f32.xlu0 %v1486_v37 }
 0xcbe   :  { %v1492_v43 = vsel %vm62_vm1, %v1491_v42, 0.0  ;;  %v1376_v44 = vadd.f32 %v1375_v40, %v2664_v54  ;;  %v1715_v40 = vadd.f32 %v1714_v30, %v2744_v51 }
 0xcbf   :  { %1493 = vadd.xlane.f32.xlu2 %v1492_v43 }
 0xcc0   :  { %2063 = vmatmul.msk.f32.vlgmr.msrb.gmra.mxu0 %vm62_vm1, %v1376_v44 }
 0xcc1   :  { %2075 = vmatpush.msk.msrb.mxu0 %vm66_vm0, %v2740_v41 }
 0xcc8   :  { %2070 = vmatmul.msk.f32.vlgmr.msra.gmra.mxu0 %vm62_vm1, %v2744_v51 }
 0xcc9   :  { %2082 = vmatpush.msk.msra.mxu0 %vm66_vm0, %v2740_v41 }
 0xd3d   :  { %v1397_v52 = vpop.f32.mrf.mxu0 }
 0xd3e   :  { %v1398_v45 = vadd.f32 %v1397_v52, %v1271_v59 }
 0xd40   :  { %v1400_v39 = vadd.f32 %v2254_v10, %v1398_v45  ;;  %v2775_v10 = vld [vmem:[%s2983_s5] ss:$0 sm:$0xff] }
 0xd42   :  { %v1401_v56 = vmax.f32 %v1400_v39, 0.0  ;;  %v2114_v39 = vld [vmem:[%s2982_s4] sm:$0x1] }
 0xd44   :  { %2064 = vmatmul.msk.f32.vlgmr.msrb.gmra.mxu1 %vm104_vm2, %v1401_v56  ;;  %v2898_v56 = vmul.f32 0.875, %v2114_v39 }
 0xd45   :  { %v1529_v57 = vpop.f32.mrf.mxu0  ;;  %1653 = vmatpush.msrb.mxu1 %v2761_v58 }
 0xd46   :  { %v1530_v60 = vadd.f32 %v1529_v57, %v1507_v48 }
 0xd47   :  { %1654 = vmatpush.msrb.mxu1 %v2769_v7 }
 0xd48   :  { %v1532_v54 = vadd.f32 %v2775_v10, %v1530_v60 }
 0xd49   :  { %1655 = vmatpush.msrb.mxu1 %v2781_v47 }
 0xd4a   :  { %v1533_v62 = vmax.f32 %v1532_v54, 0.0 }
 0xd4b   :  { %1656 = vmatpush.msrb.mxu1 %v2787_v63 }
 0xd4c   :  { %2071 = vmatmul.msk.f32.vlgmr.msra.gmra.mxu1 %vm104_vm2, %v1533_v62 }
 0xd4d   :  { %1785 = vmatpush.msra.mxu1 %v2761_v58 }
 0xd4f   :  { %1786 = vmatpush.msra.mxu1 %v2769_v7 }
 0xd51   :  { %1787 = vmatpush.msra.mxu1 %v2781_v47 }
 0xd53   :  { %1788 = vmatpush.msra.mxu1 %v2787_v63 }
 0xdc1   :  { %v1422_v53 = vpop.f32.mrf.mxu1 }
 0xdc2   :  { %v1423_v50 = vadd.f32 %v2295_v19, %v1422_v53  ;;  %v2914_v53 = vld [vmem:[%s2985_s7] ss:$0 sm:$0xff] }
 0xdc4   :  { %v1425_v59 = vmax.f32 %v1423_v50, 0.0 }
 0xdc6   :  { %2065 = vmatmul.msk.f32.vlgmr.msrb.gmra.mxu2 %vm104_vm2, %v1425_v59 }
 0xdc7   :  { %1677 = vmatpush.msrb.mxu2 %v2800_v1 }
 0xdc9   :  { %v1554_v0 = vpop.f32.mrf.mxu1  ;;  %1678 = vmatpush.msrb.mxu2 %v2806_v61 }
 0xdca   :  { %v1555_v55 = vadd.f32 %v2295_v19, %v1554_v0  ;;  %v2116_v0 = vld [vmem:[%s2985_s7 + $0x1] ss:$0 sm:$0xff] }
 0xdcb   :  { %1679 = vmatpush.msrb.mxu2 %v2813_v8 }
 0xdcc   :  { %v1557_v9 = vmax.f32 %v1555_v55, 0.0 }
 0xdcd   :  { %1680 = vmatpush.msrb.mxu2 %v2819_v11 }
 0xdce   :  { %2072 = vmatmul.msk.f32.vlgmr.msra.gmra.mxu2 %vm104_vm2, %v1557_v9 }
 0xdcf   :  { %1809 = vmatpush.msra.mxu2 %v2800_v1 }
 0xdd1   :  { %1810 = vmatpush.msra.mxu2 %v2806_v61 }
 0xdd3   :  { %1811 = vmatpush.msra.mxu2 %v2813_v8 }
 0xdd5   :  { %1812 = vmatpush.msra.mxu2 %v2819_v11 }
 0xe49   :  { %v1446_v19 = vpop.f32.mrf.mxu2 }
 0xe4a   :  { %v1447_v12 = vadd.f32 %v2328_v26, %v1446_v19 }
 0xe4c   :  { %v1449_v13 = vmax.f32 %v1447_v12, 0.0 }
 0xe4e   :  { %2066 = vmatmul.msk.f32.vlgmr.msrb.gmra.mxu3 %vm104_vm2, %v1449_v13 }
 0xe4f   :  { %1701 = vmatpush.msrb.mxu3 %v2832_v2 }
 0xe51   :  { %v1578_v3 = vpop.f32.mrf.mxu2  ;;  %1702 = vmatpush.msrb.mxu3 %v2838_v4 }
 0xe52   :  { %v1579_v5 = vadd.f32 %v2328_v26, %v1578_v3  ;;  %v2067_v26 = vld [vmem:[%s2978_s0 + $0x30] sm:$0xff] }
 0xe53   :  { %1703 = vmatpush.msrb.mxu3 %v2845_v20  ;;  %v1605_v15 = vmul.f32 %v2067_v26, %v2067_v26  ;;  %v1717_v34 = vmul.f32 %v2067_v26, %v1716_v25 }
 0xe54   :  { %v1581_v21 = vmax.f32 %v1579_v5, 0.0 }
 0xe55   :  { %1704 = vmatpush.msrb.mxu3 %v2851_v6  ;;  %v2074_v16 = vadd.f32 -0.125, %v1605_v15  ;;  %v1718_v44 = vadd.f32 %v1717_v34, %v1715_v40 }
 0xe56   :  { %2073 = vmatmul.msk.f32.vlgmr.msra.gmra.mxu3 %vm104_vm2, %v1581_v21 }
 0xe57   :  { %1833 = vmatpush.msra.mxu3 %v2832_v2  ;;  %v1608_v18 = vmul.f32 1.4142135, %v2074_v16 }
 0xe59   :  { %1834 = vmatpush.msra.mxu3 %v2838_v4  ;;  %v1610_v29 = vmul.f32 %v1609_v23, %v1608_v18 }
 0xe5b   :  { %1835 = vmatpush.msra.mxu3 %v2845_v20 }
 0xe5d   :  { %1836 = vmatpush.msra.mxu3 %v2851_v6 }
 0xed1   :  { %v1470_v17 = vpop.f32.mrf.mxu3 }
 0xed2   :  { %v1471_v22 = vadd.f32 %v2345_v35, %v1470_v17 }
 0xed4   :  { %v1473_v27 = vsub.f32 %v1471_v22, %v2726_v33  ;;  %v1607_v33 = vmul.f32 0.02, %v2074_v16 }
 0xed6   :  { %v1474_v24 = vsel %vm62_vm1, %v1473_v27, 0.0  ;;  %v1719_v46 = vmul.f32 %v1607_v33, %v2744_v51 }
 0xed7   :  { %1475 = vadd.xlane.f32.xlu1 %v1474_v24 }
 0xed8   :  { %v2889_v49 = vadd.f32 %v1719_v46, %v1718_v44 }
 0xed9   :  { %v1602_v31 = vpop.f32.mrf.mxu3 }
 0xeda   :  { %v2876_v35 = vadd.f32 %v2873_v32, %v1602_v31  ;;  %v1952_v3 = vmul.f32 0.2, %v2889_v49 }
 0xedc   :  { %v1722_v36 = vsel %vm62_vm1, %v2876_v35, 0.0  ;;  %v1611_v37 = vmul.f32 %v1610_v29, %v2876_v35  ;;  %v1727_v38 = vmul.f32 %v2067_v26, %v2876_v35 }
 0xedd   :  { %1723 = vadd.xlane.f32.xlu0 %v1722_v36 }
 0xede   :  { %v1728_v42 = vsel %vm62_vm1, %v1727_v38, 0.0  ;;  %v1612_v43 = vadd.f32 %v1611_v37, %v2744_v51 }
 0xedf   :  { %1729 = vadd.xlane.f32.xlu2 %v1728_v42 }
 0xee0   :  { %2076 = vmatmul.msk.f32.vlgmr.msrb.gmra.mxu0 %vm62_vm1, %v1612_v43 }
 0xee1   :  { %2088 = vmatpush.msk.msrb.mxu0 %vm66_vm0, %v2740_v41  ;;  %v1743_v41 = vperm.slane %v2898_v56, 0 }
 0xee8   :  { %2083 = vmatmul.msk.f32.vlgmr.msra.gmra.mxu0 %vm62_vm1, %v2889_v49 }
 0xf5d   :  { %v1633_v52 = vpop.f32.mrf.mxu0 }
 0xf5e   :  { %v1634_v45 = vadd.f32 %v1633_v52, %v1507_v48 }
 0xf60   :  { %v1636_v51 = vadd.f32 %v2775_v10, %v1634_v45 }
 0xf62   :  { %v1637_v57 = vmax.f32 %v1636_v51, 0.0  ;;  %v314_v51 = vpop.xlane.xlu1 %313 }
 0xf64   :  { %2077 = vmatmul.msk.f32.vlgmr.msrb.gmra.mxu1 %vm104_vm2, %v1637_v57  ;;  %v319_v57 = vstv %s318_s21 }
 0xf65   :  { %v1765_v60 = vpop.f32.mrf.mxu0  ;;  %1889 = vmatpush.msrb.mxu1 %v2761_v58 }
 0xf66   :  { %v1766_v14 = vadd.f32 %v1765_v60, %v1743_v41 }
 0xf67   :  { %1890 = vmatpush.msrb.mxu1 %v2769_v7 }
 0xf68   :  { %v1768_v48 = vadd.f32 %v2775_v10, %v1766_v14 }
 0xf69   :  { %1891 = vmatpush.msrb.mxu1 %v2781_v47 }
 0xf6a   :  { %v1769_v54 = vmax.f32 %v1768_v48, 0.0 }
 0xf6b   :  { %1892 = vmatpush.msrb.mxu1 %v2787_v63 }
 0xf6c   :  { %2084 = vmatmul.msk.f32.vlgmr.msra.gmra.mxu1 %vm104_vm2, %v1769_v54  ;;  %v544_v54 = vpop.xlane.xlu1 %543 }
 0xfe1   :  { %v1658_v62 = vpop.f32.mrf.mxu1 }
 0xfe2   :  { %v1659_v58 = vadd.f32 %v2914_v53, %v1658_v62 }
 0xfe4   :  { %v1661_v50 = vmax.f32 %v1659_v58, 0.0  ;;  %v532_v58 = vpop.xlane.xlu2 %531 }
 0xfe6   :  { %2078 = vmatmul.msk.f32.vlgmr.msrb.gmra.mxu2 %vm104_vm2, %v1661_v50 }
 0xfe7   :  { %1913 = vmatpush.msrb.mxu2 %v2800_v1 }
 0xfe9   :  { %v1790_v7 = vpop.f32.mrf.mxu1  ;;  %1914 = vmatpush.msrb.mxu2 %v2806_v61 }
 0xfea   :  { %v1791_v47 = vadd.f32 %v2914_v53, %v1790_v7 }
 0xfeb   :  { %1915 = vmatpush.msrb.mxu2 %v2813_v8 }
 0xfec   :  { %v1793_v63 = vmax.f32 %v1791_v47, 0.0 }
 0xfed   :  { %1916 = vmatpush.msrb.mxu2 %v2819_v11  ;;  %v2080_v11 = vld [vmem:[%s2978_s0 + $0x38] sm:$0xff]  ;;  %s2944_s0 = sld [smem:[#allocation3 + $0x7]] }
 0xfee   :  { %2085 = vmatmul.msk.f32.vlgmr.msra.gmra.mxu2 %vm104_vm2, %v1793_v63  ;;  %v1841_v19 = vmul.f32 %v2080_v11, %v2080_v11  ;;  %v1953_v5 = vmul.f32 %v2080_v11, %v1952_v3  ;;  %v550_v63 = vpop.xlane.xlu2 %549 }
 0xff0   :  { %v2087_v12 = vadd.f32 -0.125, %v1841_v19 }
 0xff2   :  { %v1843_v13 = vmul.f32 0.02, %v2087_v12  ;;  %v1844_v22 = vmul.f32 1.4142135, %v2087_v12 }
 0xff3   :  { %v1845_v27 = vstv %s2944_s0 }
 0xff4   :  { %v1955_v21 = vmul.f32 %v1843_v13, %v2889_v49  ;;  %v1846_v28 = vmul.f32 %v1845_v27, %v1844_v22 }
0x1069   :  { %v1682_v59 = vpop.f32.mrf.mxu2 }
0x106a   :  { %v1683_v55 = vadd.f32 %v2116_v0, %v1682_v59 }
0x106c   :  { %v1685_v9 = vmax.f32 %v1683_v55, 0.0 }
0x106e   :  { %2079 = vmatmul.msk.f32.vlgmr.msrb.gmra.mxu3 %vm104_vm2, %v1685_v9 }
0x106f   :  { %1937 = vmatpush.msrb.mxu3 %v2832_v2  ;;  %v1949_v2 = vmul.f32 0.1, %v2889_v49 }
0x1071   :  { %v1814_v1 = vpop.f32.mrf.mxu2  ;;  %1938 = vmatpush.msrb.mxu3 %v2838_v4  ;;  %v1950_v4 = vmul.f32 0.125, %v1949_v2 }
0x1072   :  { %v1815_v61 = vadd.f32 %v2116_v0, %v1814_v1 }
0x1073   :  { %1939 = vmatpush.msrb.mxu3 %v2845_v20  ;;  %v1951_v20 = vadd.f32 %v1950_v4, %v2889_v49 }
0x1074   :  { %v1817_v8 = vmax.f32 %v1815_v61, 0.0 }
0x1075   :  { %1940 = vmatpush.msrb.mxu3 %v2851_v6  ;;  %v1954_v6 = vadd.f32 %v1953_v5, %v1951_v20  ;;  %v791_v5 = vstv %s790_s17  ;;  %v768_v20 = vpop.xlane.xlu1 %767 }
0x1076   :  { %2086 = vmatmul.msk.f32.vlgmr.msra.gmra.mxu3 %vm104_vm2, %v1817_v8 }
0x1077   :  { %v1956_v26 = vadd.f32 %v1955_v21, %v1954_v6  ;;  %v792_v6 = vmul.f32 %v791_v5, %v768_v20 }
0x1079   :  { %1974 = vst.msk [vmem:[%s2988_s10] sm:$0xff] %vm62_vm1, %v1956_v26  ;;  %v786_v26 = vpop.xlane.xlu2 %785 }
0x10f1   :  { %v1706_v15 = vpop.f32.mrf.mxu3 }
0x10f2   :  { %v1707_v16 = vadd.f32 %v2873_v32, %v1706_v15 }
0x10f4   :  { %v1709_v17 = vsub.f32 %v1707_v16, %v2876_v35 }
0x10f6   :  { %v1710_v18 = vsel %vm62_vm1, %v1709_v17, 0.0 }
0x10f7   :  { %1711 = vadd.xlane.f32.xlu1 %v1710_v18 }
0x10f9   :  { %v1838_v23 = vpop.f32.mrf.mxu3 }
0x10fa   :  { %v1839_v24 = vadd.f32 %v2873_v32, %v1838_v23  ;;  %v1004_v23 = vpop.xlane.xlu1 %1003 }
0x10fc   :  { %v1958_v25 = vsel %vm62_vm1, %v1839_v24, 0.0  ;;  %v1847_v29 = vmul.f32 %v1846_v28, %v1839_v24  ;;  %v1963_v30 = vmul.f32 %v2080_v11, %v1839_v24 }
0x10fd   :  { %1959 = vadd.xlane.f32.xlu0 %v1958_v25 }
0x10fe   :  { %v1964_v31 = vsel %vm62_vm1, %v1963_v30, 0.0  ;;  %v1848_v33 = vadd.f32 %v1847_v29, %v2889_v49  ;;  %v308_v49 = vpop.xlane.xlu0 %307  ;;  %v1022_v29 = vpop.xlane.xlu2 %1021 }
0x10ff   :  { %1965 = vadd.xlane.f32.xlu2 %v1964_v31  ;;  %v309_v45 = vmul.f32 0.01, %v308_v49 }
0x1100   :  { %2089 = vmatmul.msk.f32.vlgmr.msrb.gmra.mxu0 %vm62_vm1, %v1848_v33 }
0x117d   :  { %v1869_v35 = vpop.f32.mrf.mxu0 }
0x117e   :  { %v1870_v34 = vadd.f32 %v1869_v35, %v1743_v41  ;;  %v301_v41 = vpop.xlane.xlu0 %300 }
0x117f   :  { %v320_v14 = vmul.f32 %v319_v57, %v301_v41 }
0x1180   :  { %v1872_v36 = vadd.f32 %v2775_v10, %v1870_v34  ;;  %v52_v10 = vstv %s2980_s2  ;;  %s554_s2 = smul.f32 2.828427, %s2415_s22 }
0x1181   :  { %v305_v52 = vmul.f32 0.05, %v52_v10  ;;  %s1026_s22 = smul.f32 2.828427, %s2567_s27 }
0x1182   :  { %v1873_v37 = vmax.f32 %v1872_v36, 0.0  ;;  %s1498_s27 = smul.f32 2.828427, %s2717_s14 }
0x1183   :  { %v310_v39 = vadd.f32 %v309_v45, %v305_v52  ;;  %v1027_v28 = vstv %s1026_s22  ;;  %s1970_s14 = smul.f32 2.828427, %s2944_s0 }
0x1184   :  { %2090 = vmatmul.msk.f32.vlgmr.msrb.gmra.mxu1 %vm104_vm2, %v1873_v37  ;;  %v1028_v25 = vmul.f32 %v1027_v28, %v1004_v23 }
0x1185   :  { %v315_v56 = vmul.f32 0.125, %v310_v39 }
0x1186   :  { %v780_v19 = vpop.xlane.xlu0 %779 }
0x1187   :  { %v316_v60 = vsub.f32 %v52_v10, %v315_v56  ;;  %v781_v2 = vmul.f32 0.01, %v780_v19 }
0x1189   :  { %v317_v48 = vadd.f32 %v316_v60, %v314_v51  ;;  %v1499_v51 = vstv %s1498_s27 }
0x118b   :  { %v321_v62 = vadd.f32 %v320_v14, %v317_v48 }
0x118d   :  { %v541_v50 = vmul.f32 0.05, %v321_v62 }
0x118e   :  { %v1016_v16 = vpop.xlane.xlu0 %1015 }
0x118f   :  { %v1017_v17 = vmul.f32 0.01, %v1016_v16 }
0x1196   :  { %v1252_v31 = vpop.xlane.xlu0 %1251 }
0x1197   :  { %v1253_v35 = vmul.f32 0.01, %v1252_v31 }
0x119e   :  { %v1488_v49 = vpop.xlane.xlu0 %1487 }
0x119f   :  { %v1489_v52 = vmul.f32 0.01, %v1488_v49 }
0x1201   :  { %v1894_v40 = vpop.f32.mrf.mxu1 }
0x1202   :  { %v1895_v38 = vadd.f32 %v2914_v53, %v1894_v40  ;;  %v545_v53 = vmul.f32 0.01, %v544_v54  ;;  %v1263_v40 = vstv %s1262_s24  ;;  %v1724_v54 = vpop.xlane.xlu0 %1723 }
0x1204   :  { %v1897_v42 = vmax.f32 %v1895_v38, 0.0  ;;  %v546_v7 = vadd.f32 %v545_v53, %v541_v50  ;;  %v1240_v38 = vpop.xlane.xlu1 %1239  ;;  %v1725_v53 = vmul.f32 0.01, %v1724_v54 }
0x1206   :  { %2091 = vmatmul.msk.f32.vlgmr.msrb.gmra.mxu2 %vm104_vm2, %v1897_v42  ;;  %v551_v47 = vmul.f32 0.125, %v546_v7 }
0x1208   :  { %v552_v59 = vsub.f32 %v321_v62, %v551_v47  ;;  %v1735_v47 = vstv %s1734_s30 }
0x120a   :  { %v553_v55 = vadd.f32 %v552_v59, %v550_v63 }
0x120c   :  { %v1476_v57 = vpop.xlane.xlu1 %1475 }
0x120d   :  { %v1500_v60 = vmul.f32 %v1499_v51, %v1476_v57 }
0x1214   :  { %v1712_v63 = vpop.xlane.xlu1 %1711 }
0x1289   :  { %v1918_v43 = vpop.f32.mrf.mxu2 }
0x128a   :  { %v1919_v44 = vadd.f32 %v2116_v0, %v1918_v43  ;;  %v555_v0 = vstv %s554_s2  ;;  %v1264_v43 = vmul.f32 %v1263_v40, %v1240_v38 }
0x128b   :  { %v556_v9 = vmul.f32 %v555_v0, %v532_v58  ;;  %v1736_v0 = vmul.f32 %v1735_v47, %v1712_v63 }
0x128c   :  { %v1921_v46 = vmax.f32 %v1919_v44, 0.0  ;;  %v1258_v44 = vpop.xlane.xlu2 %1257 }
0x128d   :  { %v557_v8 = vadd.f32 %v556_v9, %v553_v55 }
0x128e   :  { %2092 = vmatmul.msk.f32.vlgmr.msrb.gmra.mxu3 %vm104_vm2, %v1921_v46 }
0x128f   :  { %v777_v13 = vmul.f32 0.05, %v557_v8 }
0x1291   :  { %v782_v3 = vadd.f32 %v781_v2, %v777_v13  ;;  %v1971_v2 = vstv %s1970_s14 }
0x1293   :  { %v787_v4 = vmul.f32 0.125, %v782_v3 }
0x1294   :  { %v1494_v14 = vpop.xlane.xlu2 %1493 }
0x1295   :  { %v788_v21 = vsub.f32 %v557_v8, %v787_v4 }
0x1297   :  { %v789_v15 = vadd.f32 %v788_v21, %v786_v26 }
0x129c   :  { %v1730_v55 = vpop.xlane.xlu2 %1729 }
0x12a4   :  { %v1966_v3 = vpop.xlane.xlu2 %1965 }
0x1311   :  { %v1942_v1 = vpop.f32.mrf.mxu3 }
0x1312   :  { %v1943_v61 = vadd.f32 %v2873_v32, %v1942_v1  ;;  %v793_v32 = vadd.f32 %v792_v6, %v789_v15  ;;  %v1960_v1 = vpop.xlane.xlu0 %1959 }
0x1313   :  { %v1961_v8 = vmul.f32 0.01, %v1960_v1 }
0x1314   :  { %v1945_v11 = vsub.f32 %v1943_v61, %v1839_v24  ;;  %v1013_v22 = vmul.f32 0.05, %v793_v32 }
0x1316   :  { %v1946_v12 = vsel %vm62_vm1, %v1945_v11, 0.0  ;;  %v1018_v27 = vadd.f32 %v1017_v17, %v1013_v22 }
0x1317   :  { %1947 = vadd.xlane.f32.xlu1 %v1946_v12 }
0x1318   :  { %v1023_v18 = vmul.f32 0.125, %v1018_v27 }
0x131a   :  { %v1024_v24 = vsub.f32 %v793_v32, %v1023_v18 }
0x131c   :  { %v1025_v30 = vadd.f32 %v1024_v24, %v1022_v29 }
0x131e   :  { %v1029_v33 = vadd.f32 %v1028_v25, %v1025_v30 }
0x1320   :  { %v1249_v34 = vmul.f32 0.05, %v1029_v33 }
0x1322   :  { %v1254_v36 = vadd.f32 %v1253_v35, %v1249_v34 }
0x1324   :  { %v1259_v37 = vmul.f32 0.125, %v1254_v36 }
0x1326   :  { %v1260_v42 = vsub.f32 %v1029_v33, %v1259_v37 }
0x1328   :  { %v1261_v46 = vadd.f32 %v1260_v42, %v1258_v44 }
0x132a   :  { %v1265_v10 = vadd.f32 %v1264_v43, %v1261_v46 }
0x132c   :  { %v1485_v45 = vmul.f32 0.05, %v1265_v10 }
0x132e   :  { %v1490_v39 = vadd.f32 %v1489_v52, %v1485_v45 }
0x1330   :  { %v1495_v56 = vmul.f32 0.125, %v1490_v39 }
0x1332   :  { %v1496_v41 = vsub.f32 %v1265_v10, %v1495_v56 }
0x1334   :  { %v1497_v48 = vadd.f32 %v1496_v41, %v1494_v14 }
0x1336   :  { %v1501_v62 = vadd.f32 %v1500_v60, %v1497_v48 }
0x1338   :  { %v1721_v58 = vmul.f32 0.05, %v1501_v62 }
0x133a   :  { %v1726_v50 = vadd.f32 %v1725_v53, %v1721_v58 }
0x133c   :  { %v1731_v7 = vmul.f32 0.125, %v1726_v50 }
0x133e   :  { %v1732_v59 = vsub.f32 %v1501_v62, %v1731_v7 }
0x1340   :  { %v1733_v9 = vadd.f32 %v1732_v59, %v1730_v55 }
0x1342   :  { %v1737_v61 = vadd.f32 %v1736_v0, %v1733_v9 }
0x1344   :  { %v1957_v11 = vmul.f32 0.05, %v1737_v61 }
0x1346   :  { %v1962_v19 = vadd.f32 %v1961_v8, %v1957_v11 }
0x1348   :  { %v1967_v12 = vmul.f32 0.125, %v1962_v19 }
0x134a   :  { %v1968_v13 = vsub.f32 %v1737_v61, %v1967_v12 }
0x134c   :  { %v1969_v5 = vadd.f32 %v1968_v13, %v1966_v3 }
0x138a   :  { %v1948_v4 = vpop.xlane.xlu1 %1947 }
0x138b   :  { %v1972_v20 = vmul.f32 %v1971_v2, %v1948_v4 }
0x138d   :  { %v1973_v21 = vadd.f32 %v1972_v20, %v1969_v5 }
0x138f   :  { %1976 = vst.msk [vmem:[%s2989_s11] sm:$0xff] %vm1975_vm3, %v1973_v21 }
0x1390   :  { %1985 = vsyncpa [#allocation4], 1 }

</bundles_post_ra>
